<compile_context>
chip_gen: v5e
topology: v5e:2x2
jax: 0.10.0
libtpu: 0.0.40
codegen_flags: <defaults>
</compile_context>

<pallas_src>
import functools

import jax
import jax.numpy as jnp
from jax.experimental import pallas as pl
from jax.experimental.pallas import tpu as pltpu

EMBED_DIM = 128        # embed_dim
LSTM_OUT = 196         # lstm_out
MAX_FEATURES = 2000    # max_fatures
NUM_CLASSES = 2
H_PAD = 256            # LSTM_OUT padded up to a lane multiple of 128
MAX_T_BLK = 32         # timesteps processed per grid iteration (amortize per-step overhead)


def lstm_recurrence_kernel(xg_ref, whh_ref, h_out_ref, h_sc, c_sc, *,
                           seq_len, t_blk, masked):
    """Processes t_blk timesteps per grid step; h_sc / c_sc persist across the grid.

    xg_ref  : (t_blk, B_PAD, 4*H_PAD) f32  -- precomputed x @ W_ih + b (gate order i,f,g,o)
    whh_ref : (H_PAD, 4*H_PAD)        bf16 -- recurrent weights (zero-padded rows/cols)
    h_out_ref: (B_PAD, H_PAD)         f32  -- hidden state after the last timestep
    """
    blk = pl.program_id(0)

    @pl.when(blk == 0)
    def _():
        h_sc[...] = jnp.zeros_like(h_sc)
        c_sc[...] = jnp.zeros_like(c_sc)

    whh = whh_ref[...]                                   # bf16 (H_PAD, 4*H_PAD)

    def step(i, carry):
        h, c = carry                                     # f32 (B_PAD, H_PAD)
        gates = (jnp.dot(h.astype(jnp.bfloat16), whh,
                         preferred_element_type=jnp.float32)
                 + xg_ref[i])                            # (B_PAD, 4*H_PAD)
        i_g = jax.nn.sigmoid(gates[:, 0 * H_PAD:1 * H_PAD])
        f_g = jax.nn.sigmoid(gates[:, 1 * H_PAD:2 * H_PAD])
        g_g = jnp.tanh(gates[:, 2 * H_PAD:3 * H_PAD])
        o_g = jax.nn.sigmoid(gates[:, 3 * H_PAD:4 * H_PAD])
        c_new = f_g * c + i_g * g_g
        h_new = o_g * jnp.tanh(c_new)
        if masked:   # only present when T was padded up to a multiple of t_blk
            valid = (blk * t_blk + i) < seq_len
            h_new = jnp.where(valid, h_new, h)
            c_new = jnp.where(valid, c_new, c)
        return h_new, c_new

    h, c = jax.lax.fori_loop(0, t_blk, step, (h_sc[...], c_sc[...]), unroll=True)
    h_sc[...] = h
    c_sc[...] = c
    h_out_ref[...] = h


def _pad_gate_cols(w_t):
    """(in_dim, 4*LSTM_OUT) -> (in_dim, 4*H_PAD), each gate block zero-padded."""
    in_dim = w_t.shape[0]
    out = jnp.zeros((in_dim, 4 * H_PAD), jnp.float32)
    for g in range(4):
        out = out.at[:, g * H_PAD:g * H_PAD + LSTM_OUT].set(
            w_t[:, g * LSTM_OUT:(g + 1) * LSTM_OUT])
    return out


def init_params(key):
    k = jax.random.split(key, 7)
    s = 1.0 / float(jnp.sqrt(LSTM_OUT))
    return dict(
        embedding=jax.random.normal(k[0], (MAX_FEATURES, EMBED_DIM), jnp.float32),
        w_ih=jax.random.uniform(k[1], (4 * LSTM_OUT, EMBED_DIM), jnp.float32, -s, s),
        w_hh=jax.random.uniform(k[2], (4 * LSTM_OUT, LSTM_OUT), jnp.float32, -s, s),
        b_ih=jax.random.uniform(k[3], (4 * LSTM_OUT,), jnp.float32, -s, s),
        b_hh=jax.random.uniform(k[4], (4 * LSTM_OUT,), jnp.float32, -s, s),
        w_dense=jax.random.uniform(k[5], (NUM_CLASSES, LSTM_OUT), jnp.float32, -s, s),
        b_dense=jax.random.uniform(k[6], (NUM_CLASSES,), jnp.float32, -s, s),
    )


def prepare_model(params):
    """Done ONCE at model-load time (outside the jitted forward path)."""
    wih_p = _pad_gate_cols(params["w_ih"].T).astype(jnp.bfloat16)     # (128, 1024)
    whh_t = _pad_gate_cols(params["w_hh"].T)                          # (196, 1024)
    whh_p = jnp.zeros((H_PAD, 4 * H_PAD), jnp.float32).at[:LSTM_OUT].set(whh_t)
    whh_p = whh_p.astype(jnp.bfloat16)                                # (256, 1024)
    b_p = _pad_gate_cols((params["b_ih"] + params["b_hh"])[None, :])  # (1, 1024) f32
    return dict(
        embedding=params["embedding"],
        wih_p=wih_p, whh_p=whh_p, b_p=b_p,
        w_dense=params["w_dense"], b_dense=params["b_dense"],
    )


@jax.jit
def lstm_net_forward(token_ids, prepared):
    B, T = token_ids.shape
    B_PAD = max(8, -(-B // 8) * 8)          # sublane-aligned batch
    T_BLK = min(T, MAX_T_BLK)               # timesteps per grid iteration
    T_PAD = -(-T // T_BLK) * T_BLK

    emb = jnp.take(prepared["embedding"], token_ids, axis=0)          # (B, T, D)
    # nn.Dropout(0.4) and the intra-LSTM dropout are identity at inference time.

    # Hoisted, time-independent input projection: one (B*T,128)x(128,1024) bf16
    # matmul with f32 accumulation, instead of T skinny in-kernel matmuls.
    xg = jnp.einsum("btd,dg->btg", emb.astype(jnp.bfloat16), prepared["wih_p"],
                    preferred_element_type=jnp.float32) + prepared["b_p"]
    xg = jnp.transpose(xg, (1, 0, 2))                                  # (T, B, 4*H_PAD)
    xg = jnp.pad(xg, ((0, T_PAD - T), (0, B_PAD - B), (0, 0)))

    kernel = functools.partial(lstm_recurrence_kernel,
                               seq_len=T, t_blk=T_BLK, masked=(T_PAD != T))

    h_last = pl.pallas_call(
        kernel,
        out_shape=jax.ShapeDtypeStruct((B_PAD, H_PAD), jnp.float32),
        grid_spec=pltpu.PrefetchScalarGridSpec(
            num_scalar_prefetch=0,
            grid=(T_PAD // T_BLK,),
            in_specs=[
                pl.BlockSpec((T_BLK, B_PAD, 4 * H_PAD), lambda blk: (blk, 0, 0)),
                pl.BlockSpec((H_PAD, 4 * H_PAD), lambda blk: (0, 0)),
            ],
            out_specs=pl.BlockSpec((B_PAD, H_PAD), lambda blk: (0, 0)),
            scratch_shapes=[
                pltpu.VMEM((B_PAD, H_PAD), jnp.float32),   # h
                pltpu.VMEM((B_PAD, H_PAD), jnp.float32),   # c
            ],
        ),
        compiler_params=pltpu.CompilerParams(
            dimension_semantics=("arbitrary",)),           # recurrence is serial in time
    )(xg, prepared["whh_p"])

    # Final dense + log_softmax in XLA: a (B,196)x(196,2) projection run once;
    # keeping it out of the kernel keeps the kernel output lane-dense.
    h = h_last[:B, :LSTM_OUT]
    logits = h @ prepared["w_dense"].T + prepared["b_dense"]
    return jax.nn.log_softmax(logits, axis=1)


def lstm_net_reference(token_ids, params):
    """Pure-JAX f32 reference matching PyTorch LSTM semantics (eval mode)."""
    emb = jnp.take(params["embedding"], token_ids, axis=0)             # (B, T, D)
    B = emb.shape[0]
    H = LSTM_OUT
    w_ih_t = params["w_ih"].T
    w_hh_t = params["w_hh"].T
    b = params["b_ih"] + params["b_hh"]

    def step(carry, x_t):
        h, c = carry
        g = x_t @ w_ih_t + h @ w_hh_t + b
        i = jax.nn.sigmoid(g[:, 0:H])
        f = jax.nn.sigmoid(g[:, H:2 * H])
        gg = jnp.tanh(g[:, 2 * H:3 * H])
        o = jax.nn.sigmoid(g[:, 3 * H:4 * H])
        c = f * c + i * gg
        h = o * jnp.tanh(c)
        return (h, c), None

    h0 = jnp.zeros((B, H), jnp.float32)
    (h, _), _ = jax.lax.scan(step, (h0, h0), jnp.transpose(emb, (1, 0, 2)))
    logits = h @ params["w_dense"].T + params["b_dense"]
    return jax.nn.log_softmax(logits, axis=1)


if __name__ == "__main__":
    key = jax.random.PRNGKey(0)
    k_params, k_tokens = jax.random.split(key)
    params = init_params(k_params)
    prepared = prepare_model(params)   # padded / bf16 weights built once, outside jit

    B, T = 2, 8
    token_ids = jax.random.randint(k_tokens, (B, T), 0, MAX_FEATURES, dtype=jnp.int32)

    out = lstm_net_forward(token_ids, prepared)
    out = jax.block_until_ready(out)

    ref = lstm_net_reference(token_ids, params)
    assert out.shape == (B, NUM_CLASSES)
    # bf16 matmul operands with f32 accumulation -> slightly looser tolerance.
    assert jnp.allclose(out, ref, atol=2e-2, rtol=2e-2)

    print("KERNEL_OK")
</pallas_src>

<mosaic_0001>
module attributes {stable_mosaic.version = 11 : i64} {
  func.func @lstm_recurrence_kernel(%arg0: i32, %arg1: memref<8x8x1024xf32, #tpu.memory_space<vmem>>, %arg2: memref<256x1024xbf16, #tpu.memory_space<vmem>>, %arg3: memref<8x256xf32, #tpu.memory_space<vmem>>, %arg4: memref<8x256xf32, #tpu.memory_space<vmem>>, %arg5: memref<8x256xf32, #tpu.memory_space<vmem>>) attributes {dimension_semantics = [#tpu.dimension_semantics<arbitrary>], iteration_bounds = array<i64: 1>, scalar_prefetch = 0 : i64, scratch_operands = 2 : i64, tpu.core_type = #tpu.core_type<tc>, window_params = [{transform_indices = @transform_0, window_bounds = array<i64: 8, 8, 1024>}, {pipeline_mode = #tpu.pipeline_mode<synchronous>, transform_indices = @transform_1, window_bounds = array<i64: 256, 1024>}, {pipeline_mode = #tpu.pipeline_mode<synchronous>, transform_indices = @transform_2, window_bounds = array<i64: 8, 256>}]} {
    %c0_i32 = arith.constant 0 : i32
    %0 = arith.cmpi eq, %arg0, %c0_i32 : i32
    %1 = arith.extui %0 : i1 to i32
    %c0_i32_0 = arith.constant 0 : i32
    %2 = arith.cmpi ne, %1, %c0_i32_0 : i32
    scf.if %2 {
      %cst_60 = arith.constant 0.000000e+00 : f32
      %257 = vector.broadcast %cst_60 : f32 to vector<8x256xf32>
      %c0_61 = arith.constant 0 : index
      %c0_62 = arith.constant 0 : index
      %258 = vector.load %arg4[%c0_61, %c0_62] : memref<8x256xf32, #tpu.memory_space<vmem>>, vector<8x256xf32>
      tpu.vector_store %arg4[%c0_61, %c0_62], %257 {strides = array<i32>} : memref<8x256xf32, #tpu.memory_space<vmem>>, vector<8x256xf32>,
      %cst_63 = arith.constant 0.000000e+00 : f32
      %259 = vector.broadcast %cst_63 : f32 to vector<8x256xf32>
      %c0_64 = arith.constant 0 : index
      %c0_65 = arith.constant 0 : index
      %260 = vector.load %arg5[%c0_64, %c0_65] : memref<8x256xf32, #tpu.memory_space<vmem>>, vector<8x256xf32>
      tpu.vector_store %arg5[%c0_64, %c0_65], %259 {strides = array<i32>} : memref<8x256xf32, #tpu.memory_space<vmem>>, vector<8x256xf32>,
    } else {
    }
    %c0 = arith.constant 0 : index
    %c0_1 = arith.constant 0 : index
    %3 = vector.load %arg2[%c0, %c0_1] : memref<256x1024xbf16, #tpu.memory_space<vmem>>, vector<256x1024xbf16>
    %c0_2 = arith.constant 0 : index
    %c0_3 = arith.constant 0 : index
    %4 = vector.load %arg4[%c0_2, %c0_3] : memref<8x256xf32, #tpu.memory_space<vmem>>, vector<8x256xf32>
    %c0_4 = arith.constant 0 : index
    %c0_5 = arith.constant 0 : index
    %5 = vector.load %arg5[%c0_4, %c0_5] : memref<8x256xf32, #tpu.memory_space<vmem>>, vector<8x256xf32>
    %c0_i32_6 = arith.constant 0 : i32
    %6 = arith.truncf %4 : vector<8x256xf32> to vector<8x256xbf16>
    %cst = arith.constant dense<0.000000e+00> : vector<8x1024xf32>
    %7 = tpu.matmul %6, %3, %cst {dimension_numbers = #tpu.dot_dimension_numbers<[1], [0], [0], [1], [0, 0, 1, 1], [], []>} : vector<8x256xbf16>, vector<256x1024xbf16>, vector<8x1024xf32> -> vector<8x1024xf32>
    %8 = arith.index_cast %c0_i32_6 : i32 to index
    %c0_7 = arith.constant 0 : index
    %c0_8 = arith.constant 0 : index
    %9 = vector.load %arg1[%8, %c0_7, %c0_8] : memref<8x8x1024xf32, #tpu.memory_space<vmem>>, vector<1x8x1024xf32>
    %10 = vector.shape_cast %9 : vector<1x8x1024xf32> to vector<8x1024xf32>
    %11 = arith.addf %7, %10 : vector<8x1024xf32>
    %12 = vector.extract_strided_slice %11 {offsets = [0, 0], sizes = [8, 256], strides = [1, 1]} : vector<8x1024xf32> to vector<8x256xf32>
    %13 = arith.negf %12 : vector<8x256xf32>
    %14 = math.exp %13 : vector<8x256xf32>
    %cst_9 = arith.constant 1.000000e+00 : f32
    %15 = vector.broadcast %cst_9 : f32 to vector<8x256xf32>
    %16 = arith.addf %15, %14 : vector<8x256xf32>
    %17 = arith.divf %15, %16 : vector<8x256xf32>
    %18 = vector.extract_strided_slice %11 {offsets = [0, 256], sizes = [8, 256], strides = [1, 1]} : vector<8x1024xf32> to vector<8x256xf32>
    %19 = arith.negf %18 : vector<8x256xf32>
    %20 = math.exp %19 : vector<8x256xf32>
    %cst_10 = arith.constant 1.000000e+00 : f32
    %21 = vector.broadcast %cst_10 : f32 to vector<8x256xf32>
    %22 = arith.addf %21, %20 : vector<8x256xf32>
    %23 = arith.divf %21, %22 : vector<8x256xf32>
    %24 = vector.extract_strided_slice %11 {offsets = [0, 512], sizes = [8, 256], strides = [1, 1]} : vector<8x1024xf32> to vector<8x256xf32>
    %25 = math.tanh %24 : vector<8x256xf32>
    %26 = vector.extract_strided_slice %11 {offsets = [0, 768], sizes = [8, 256], strides = [1, 1]} : vector<8x1024xf32> to vector<8x256xf32>
    %27 = arith.negf %26 : vector<8x256xf32>
    %28 = math.exp %27 : vector<8x256xf32>
    %cst_11 = arith.constant 1.000000e+00 : f32
    %29 = vector.broadcast %cst_11 : f32 to vector<8x256xf32>
    %30 = arith.addf %29, %28 : vector<8x256xf32>
    %31 = arith.divf %29, %30 : vector<8x256xf32>
    %32 = arith.mulf %23, %5 : vector<8x256xf32>
    %33 = arith.mulf %17, %25 : vector<8x256xf32>
    %34 = arith.addf %32, %33 : vector<8x256xf32>
    %35 = math.tanh %34 : vector<8x256xf32>
    %36 = arith.mulf %31, %35 : vector<8x256xf32>
    %c1_i32 = arith.constant 1 : i32
    %37 = arith.truncf %36 : vector<8x256xf32> to vector<8x256xbf16>
    %cst_12 = arith.constant dense<0.000000e+00> : vector<8x1024xf32>
    %38 = tpu.matmul %37, %3, %cst_12 {dimension_numbers = #tpu.dot_dimension_numbers<[1], [0], [0], [1], [0, 0, 1, 1], [], []>} : vector<8x256xbf16>, vector<256x1024xbf16>, vector<8x1024xf32> -> vector<8x1024xf32>
    %39 = arith.index_cast %c1_i32 : i32 to index
    %c0_13 = arith.constant 0 : index
    %c0_14 = arith.constant 0 : index
    %40 = vector.load %arg1[%39, %c0_13, %c0_14] : memref<8x8x1024xf32, #tpu.memory_space<vmem>>, vector<1x8x1024xf32>
    %41 = vector.shape_cast %40 : vector<1x8x1024xf32> to vector<8x1024xf32>
    %42 = arith.addf %38, %41 : vector<8x1024xf32>
    %43 = vector.extract_strided_slice %42 {offsets = [0, 0], sizes = [8, 256], strides = [1, 1]} : vector<8x1024xf32> to vector<8x256xf32>
    %44 = arith.negf %43 : vector<8x256xf32>
    %45 = math.exp %44 : vector<8x256xf32>
    %cst_15 = arith.constant 1.000000e+00 : f32
    %46 = vector.broadcast %cst_15 : f32 to vector<8x256xf32>
    %47 = arith.addf %46, %45 : vector<8x256xf32>
    %48 = arith.divf %46, %47 : vector<8x256xf32>
    %49 = vector.extract_strided_slice %42 {offsets = [0, 256], sizes = [8, 256], strides = [1, 1]} : vector<8x1024xf32> to vector<8x256xf32>
    %50 = arith.negf %49 : vector<8x256xf32>
    %51 = math.exp %50 : vector<8x256xf32>
    %cst_16 = arith.constant 1.000000e+00 : f32
    %52 = vector.broadcast %cst_16 : f32 to vector<8x256xf32>
    %53 = arith.addf %52, %51 : vector<8x256xf32>
    %54 = arith.divf %52, %53 : vector<8x256xf32>
    %55 = vector.extract_strided_slice %42 {offsets = [0, 512], sizes = [8, 256], strides = [1, 1]} : vector<8x1024xf32> to vector<8x256xf32>
    %56 = math.tanh %55 : vector<8x256xf32>
    %57 = vector.extract_strided_slice %42 {offsets = [0, 768], sizes = [8, 256], strides = [1, 1]} : vector<8x1024xf32> to vector<8x256xf32>
    %58 = arith.negf %57 : vector<8x256xf32>
    %59 = math.exp %58 : vector<8x256xf32>
    %cst_17 = arith.constant 1.000000e+00 : f32
    %60 = vector.broadcast %cst_17 : f32 to vector<8x256xf32>
    %61 = arith.addf %60, %59 : vector<8x256xf32>
    %62 = arith.divf %60, %61 : vector<8x256xf32>
    %63 = arith.mulf %54, %34 : vector<8x256xf32>
    %64 = arith.mulf %48, %56 : vector<8x256xf32>
    %65 = arith.addf %63, %64 : vector<8x256xf32>
    %66 = math.tanh %65 : vector<8x256xf32>
    %67 = arith.mulf %62, %66 : vector<8x256xf32>
    %c2_i32 = arith.constant 2 : i32
    %68 = arith.truncf %67 : vector<8x256xf32> to vector<8x256xbf16>
    %cst_18 = arith.constant dense<0.000000e+00> : vector<8x1024xf32>
    %69 = tpu.matmul %68, %3, %cst_18 {dimension_numbers = #tpu.dot_dimension_numbers<[1], [0], [0], [1], [0, 0, 1, 1], [], []>} : vector<8x256xbf16>, vector<256x1024xbf16>, vector<8x1024xf32> -> vector<8x1024xf32>
    %70 = arith.index_cast %c2_i32 : i32 to index
    %c0_19 = arith.constant 0 : index
    %c0_20 = arith.constant 0 : index
    %71 = vector.load %arg1[%70, %c0_19, %c0_20] : memref<8x8x1024xf32, #tpu.memory_space<vmem>>, vector<1x8x1024xf32>
    %72 = vector.shape_cast %71 : vector<1x8x1024xf32> to vector<8x1024xf32>
    %73 = arith.addf %69, %72 : vector<8x1024xf32>
    %74 = vector.extract_strided_slice %73 {offsets = [0, 0], sizes = [8, 256], strides = [1, 1]} : vector<8x1024xf32> to vector<8x256xf32>
    %75 = arith.negf %74 : vector<8x256xf32>
    %76 = math.exp %75 : vector<8x256xf32>
    %cst_21 = arith.constant 1.000000e+00 : f32
    %77 = vector.broadcast %cst_21 : f32 to vector<8x256xf32>
    %78 = arith.addf %77, %76 : vector<8x256xf32>
    %79 = arith.divf %77, %78 : vector<8x256xf32>
    %80 = vector.extract_strided_slice %73 {offsets = [0, 256], sizes = [8, 256], strides = [1, 1]} : vector<8x1024xf32> to vector<8x256xf32>
    %81 = arith.negf %80 : vector<8x256xf32>
    %82 = math.exp %81 : vector<8x256xf32>
    %cst_22 = arith.constant 1.000000e+00 : f32
    %83 = vector.broadcast %cst_22 : f32 to vector<8x256xf32>
    %84 = arith.addf %83, %82 : vector<8x256xf32>
    %85 = arith.divf %83, %84 : vector<8x256xf32>
    %86 = vector.extract_strided_slice %73 {offsets = [0, 512], sizes = [8, 256], strides = [1, 1]} : vector<8x1024xf32> to vector<8x256xf32>
    %87 = math.tanh %86 : vector<8x256xf32>
    %88 = vector.extract_strided_slice %73 {offsets = [0, 768], sizes = [8, 256], strides = [1, 1]} : vector<8x1024xf32> to vector<8x256xf32>
    %89 = arith.negf %88 : vector<8x256xf32>
    %90 = math.exp %89 : vector<8x256xf32>
    %cst_23 = arith.constant 1.000000e+00 : f32
    %91 = vector.broadcast %cst_23 : f32 to vector<8x256xf32>
    %92 = arith.addf %91, %90 : vector<8x256xf32>
    %93 = arith.divf %91, %92 : vector<8x256xf32>
    %94 = arith.mulf %85, %65 : vector<8x256xf32>
    %95 = arith.mulf %79, %87 : vector<8x256xf32>
    %96 = arith.addf %94, %95 : vector<8x256xf32>
    %97 = math.tanh %96 : vector<8x256xf32>
    %98 = arith.mulf %93, %97 : vector<8x256xf32>
    %c3_i32 = arith.constant 3 : i32
    %99 = arith.truncf %98 : vector<8x256xf32> to vector<8x256xbf16>
    %cst_24 = arith.constant dense<0.000000e+00> : vector<8x1024xf32>
    %100 = tpu.matmul %99, %3, %cst_24 {dimension_numbers = #tpu.dot_dimension_numbers<[1], [0], [0], [1], [0, 0, 1, 1], [], []>} : vector<8x256xbf16>, vector<256x1024xbf16>, vector<8x1024xf32> -> vector<8x1024xf32>
    %101 = arith.index_cast %c3_i32 : i32 to index
    %c0_25 = arith.constant 0 : index
    %c0_26 = arith.constant 0 : index
    %102 = vector.load %arg1[%101, %c0_25, %c0_26] : memref<8x8x1024xf32, #tpu.memory_space<vmem>>, vector<1x8x1024xf32>
    %103 = vector.shape_cast %102 : vector<1x8x1024xf32> to vector<8x1024xf32>
    %104 = arith.addf %100, %103 : vector<8x1024xf32>
    %105 = vector.extract_strided_slice %104 {offsets = [0, 0], sizes = [8, 256], strides = [1, 1]} : vector<8x1024xf32> to vector<8x256xf32>
    %106 = arith.negf %105 : vector<8x256xf32>
    %107 = math.exp %106 : vector<8x256xf32>
    %cst_27 = arith.constant 1.000000e+00 : f32
    %108 = vector.broadcast %cst_27 : f32 to vector<8x256xf32>
    %109 = arith.addf %108, %107 : vector<8x256xf32>
    %110 = arith.divf %108, %109 : vector<8x256xf32>
    %111 = vector.extract_strided_slice %104 {offsets = [0, 256], sizes = [8, 256], strides = [1, 1]} : vector<8x1024xf32> to vector<8x256xf32>
    %112 = arith.negf %111 : vector<8x256xf32>
    %113 = math.exp %112 : vector<8x256xf32>
    %cst_28 = arith.constant 1.000000e+00 : f32
    %114 = vector.broadcast %cst_28 : f32 to vector<8x256xf32>
    %115 = arith.addf %114, %113 : vector<8x256xf32>
    %116 = arith.divf %114, %115 : vector<8x256xf32>
    %117 = vector.extract_strided_slice %104 {offsets = [0, 512], sizes = [8, 256], strides = [1, 1]} : vector<8x1024xf32> to vector<8x256xf32>
    %118 = math.tanh %117 : vector<8x256xf32>
    %119 = vector.extract_strided_slice %104 {offsets = [0, 768], sizes = [8, 256], strides = [1, 1]} : vector<8x1024xf32> to vector<8x256xf32>
    %120 = arith.negf %119 : vector<8x256xf32>
    %121 = math.exp %120 : vector<8x256xf32>
    %cst_29 = arith.constant 1.000000e+00 : f32
    %122 = vector.broadcast %cst_29 : f32 to vector<8x256xf32>
    %123 = arith.addf %122, %121 : vector<8x256xf32>
    %124 = arith.divf %122, %123 : vector<8x256xf32>
    %125 = arith.mulf %116, %96 : vector<8x256xf32>
    %126 = arith.mulf %110, %118 : vector<8x256xf32>
    %127 = arith.addf %125, %126 : vector<8x256xf32>
    %128 = math.tanh %127 : vector<8x256xf32>
    %129 = arith.mulf %124, %128 : vector<8x256xf32>
    %c4_i32 = arith.constant 4 : i32
    %130 = arith.truncf %129 : vector<8x256xf32> to vector<8x256xbf16>
    %cst_30 = arith.constant dense<0.000000e+00> : vector<8x1024xf32>
    %131 = tpu.matmul %130, %3, %cst_30 {dimension_numbers = #tpu.dot_dimension_numbers<[1], [0], [0], [1], [0, 0, 1, 1], [], []>} : vector<8x256xbf16>, vector<256x1024xbf16>, vector<8x1024xf32> -> vector<8x1024xf32>
    %132 = arith.index_cast %c4_i32 : i32 to index
    %c0_31 = arith.constant 0 : index
    %c0_32 = arith.constant 0 : index
    %133 = vector.load %arg1[%132, %c0_31, %c0_32] : memref<8x8x1024xf32, #tpu.memory_space<vmem>>, vector<1x8x1024xf32>
    %134 = vector.shape_cast %133 : vector<1x8x1024xf32> to vector<8x1024xf32>
    %135 = arith.addf %131, %134 : vector<8x1024xf32>
    %136 = vector.extract_strided_slice %135 {offsets = [0, 0], sizes = [8, 256], strides = [1, 1]} : vector<8x1024xf32> to vector<8x256xf32>
    %137 = arith.negf %136 : vector<8x256xf32>
    %138 = math.exp %137 : vector<8x256xf32>
    %cst_33 = arith.constant 1.000000e+00 : f32
    %139 = vector.broadcast %cst_33 : f32 to vector<8x256xf32>
    %140 = arith.addf %139, %138 : vector<8x256xf32>
    %141 = arith.divf %139, %140 : vector<8x256xf32>
    %142 = vector.extract_strided_slice %135 {offsets = [0, 256], sizes = [8, 256], strides = [1, 1]} : vector<8x1024xf32> to vector<8x256xf32>
    %143 = arith.negf %142 : vector<8x256xf32>
    %144 = math.exp %143 : vector<8x256xf32>
    %cst_34 = arith.constant 1.000000e+00 : f32
    %145 = vector.broadcast %cst_34 : f32 to vector<8x256xf32>
    %146 = arith.addf %145, %144 : vector<8x256xf32>
    %147 = arith.divf %145, %146 : vector<8x256xf32>
    %148 = vector.extract_strided_slice %135 {offsets = [0, 512], sizes = [8, 256], strides = [1, 1]} : vector<8x1024xf32> to vector<8x256xf32>
    %149 = math.tanh %148 : vector<8x256xf32>
    %150 = vector.extract_strided_slice %135 {offsets = [0, 768], sizes = [8, 256], strides = [1, 1]} : vector<8x1024xf32> to vector<8x256xf32>
    %151 = arith.negf %150 : vector<8x256xf32>
    %152 = math.exp %151 : vector<8x256xf32>
    %cst_35 = arith.constant 1.000000e+00 : f32
    %153 = vector.broadcast %cst_35 : f32 to vector<8x256xf32>
    %154 = arith.addf %153, %152 : vector<8x256xf32>
    %155 = arith.divf %153, %154 : vector<8x256xf32>
    %156 = arith.mulf %147, %127 : vector<8x256xf32>
    %157 = arith.mulf %141, %149 : vector<8x256xf32>
    %158 = arith.addf %156, %157 : vector<8x256xf32>
    %159 = math.tanh %158 : vector<8x256xf32>
    %160 = arith.mulf %155, %159 : vector<8x256xf32>
    %c5_i32 = arith.constant 5 : i32
    %161 = arith.truncf %160 : vector<8x256xf32> to vector<8x256xbf16>
    %cst_36 = arith.constant dense<0.000000e+00> : vector<8x1024xf32>
    %162 = tpu.matmul %161, %3, %cst_36 {dimension_numbers = #tpu.dot_dimension_numbers<[1], [0], [0], [1], [0, 0, 1, 1], [], []>} : vector<8x256xbf16>, vector<256x1024xbf16>, vector<8x1024xf32> -> vector<8x1024xf32>
    %163 = arith.index_cast %c5_i32 : i32 to index
    %c0_37 = arith.constant 0 : index
    %c0_38 = arith.constant 0 : index
    %164 = vector.load %arg1[%163, %c0_37, %c0_38] : memref<8x8x1024xf32, #tpu.memory_space<vmem>>, vector<1x8x1024xf32>
    %165 = vector.shape_cast %164 : vector<1x8x1024xf32> to vector<8x1024xf32>
    %166 = arith.addf %162, %165 : vector<8x1024xf32>
    %167 = vector.extract_strided_slice %166 {offsets = [0, 0], sizes = [8, 256], strides = [1, 1]} : vector<8x1024xf32> to vector<8x256xf32>
    %168 = arith.negf %167 : vector<8x256xf32>
    %169 = math.exp %168 : vector<8x256xf32>
    %cst_39 = arith.constant 1.000000e+00 : f32
    %170 = vector.broadcast %cst_39 : f32 to vector<8x256xf32>
    %171 = arith.addf %170, %169 : vector<8x256xf32>
    %172 = arith.divf %170, %171 : vector<8x256xf32>
    %173 = vector.extract_strided_slice %166 {offsets = [0, 256], sizes = [8, 256], strides = [1, 1]} : vector<8x1024xf32> to vector<8x256xf32>
    %174 = arith.negf %173 : vector<8x256xf32>
    %175 = math.exp %174 : vector<8x256xf32>
    %cst_40 = arith.constant 1.000000e+00 : f32
    %176 = vector.broadcast %cst_40 : f32 to vector<8x256xf32>
    %177 = arith.addf %176, %175 : vector<8x256xf32>
    %178 = arith.divf %176, %177 : vector<8x256xf32>
    %179 = vector.extract_strided_slice %166 {offsets = [0, 512], sizes = [8, 256], strides = [1, 1]} : vector<8x1024xf32> to vector<8x256xf32>
    %180 = math.tanh %179 : vector<8x256xf32>
    %181 = vector.extract_strided_slice %166 {offsets = [0, 768], sizes = [8, 256], strides = [1, 1]} : vector<8x1024xf32> to vector<8x256xf32>
    %182 = arith.negf %181 : vector<8x256xf32>
    %183 = math.exp %182 : vector<8x256xf32>
    %cst_41 = arith.constant 1.000000e+00 : f32
    %184 = vector.broadcast %cst_41 : f32 to vector<8x256xf32>
    %185 = arith.addf %184, %183 : vector<8x256xf32>
    %186 = arith.divf %184, %185 : vector<8x256xf32>
    %187 = arith.mulf %178, %158 : vector<8x256xf32>
    %188 = arith.mulf %172, %180 : vector<8x256xf32>
    %189 = arith.addf %187, %188 : vector<8x256xf32>
    %190 = math.tanh %189 : vector<8x256xf32>
    %191 = arith.mulf %186, %190 : vector<8x256xf32>
    %c6_i32 = arith.constant 6 : i32
    %192 = arith.truncf %191 : vector<8x256xf32> to vector<8x256xbf16>
    %cst_42 = arith.constant dense<0.000000e+00> : vector<8x1024xf32>
    %193 = tpu.matmul %192, %3, %cst_42 {dimension_numbers = #tpu.dot_dimension_numbers<[1], [0], [0], [1], [0, 0, 1, 1], [], []>} : vector<8x256xbf16>, vector<256x1024xbf16>, vector<8x1024xf32> -> vector<8x1024xf32>
    %194 = arith.index_cast %c6_i32 : i32 to index
    %c0_43 = arith.constant 0 : index
    %c0_44 = arith.constant 0 : index
    %195 = vector.load %arg1[%194, %c0_43, %c0_44] : memref<8x8x1024xf32, #tpu.memory_space<vmem>>, vector<1x8x1024xf32>
    %196 = vector.shape_cast %195 : vector<1x8x1024xf32> to vector<8x1024xf32>
    %197 = arith.addf %193, %196 : vector<8x1024xf32>
    %198 = vector.extract_strided_slice %197 {offsets = [0, 0], sizes = [8, 256], strides = [1, 1]} : vector<8x1024xf32> to vector<8x256xf32>
    %199 = arith.negf %198 : vector<8x256xf32>
    %200 = math.exp %199 : vector<8x256xf32>
    %cst_45 = arith.constant 1.000000e+00 : f32
    %201 = vector.broadcast %cst_45 : f32 to vector<8x256xf32>
    %202 = arith.addf %201, %200 : vector<8x256xf32>
    %203 = arith.divf %201, %202 : vector<8x256xf32>
    %204 = vector.extract_strided_slice %197 {offsets = [0, 256], sizes = [8, 256], strides = [1, 1]} : vector<8x1024xf32> to vector<8x256xf32>
    %205 = arith.negf %204 : vector<8x256xf32>
    %206 = math.exp %205 : vector<8x256xf32>
    %cst_46 = arith.constant 1.000000e+00 : f32
    %207 = vector.broadcast %cst_46 : f32 to vector<8x256xf32>
    %208 = arith.addf %207, %206 : vector<8x256xf32>
    %209 = arith.divf %207, %208 : vector<8x256xf32>
    %210 = vector.extract_strided_slice %197 {offsets = [0, 512], sizes = [8, 256], strides = [1, 1]} : vector<8x1024xf32> to vector<8x256xf32>
    %211 = math.tanh %210 : vector<8x256xf32>
    %212 = vector.extract_strided_slice %197 {offsets = [0, 768], sizes = [8, 256], strides = [1, 1]} : vector<8x1024xf32> to vector<8x256xf32>
    %213 = arith.negf %212 : vector<8x256xf32>
    %214 = math.exp %213 : vector<8x256xf32>
    %cst_47 = arith.constant 1.000000e+00 : f32
    %215 = vector.broadcast %cst_47 : f32 to vector<8x256xf32>
    %216 = arith.addf %215, %214 : vector<8x256xf32>
    %217 = arith.divf %215, %216 : vector<8x256xf32>
    %218 = arith.mulf %209, %189 : vector<8x256xf32>
    %219 = arith.mulf %203, %211 : vector<8x256xf32>
    %220 = arith.addf %218, %219 : vector<8x256xf32>
    %221 = math.tanh %220 : vector<8x256xf32>
    %222 = arith.mulf %217, %221 : vector<8x256xf32>
    %c7_i32 = arith.constant 7 : i32
    %223 = arith.truncf %222 : vector<8x256xf32> to vector<8x256xbf16>
    %cst_48 = arith.constant dense<0.000000e+00> : vector<8x1024xf32>
    %224 = tpu.matmul %223, %3, %cst_48 {dimension_numbers = #tpu.dot_dimension_numbers<[1], [0], [0], [1], [0, 0, 1, 1], [], []>} : vector<8x256xbf16>, vector<256x1024xbf16>, vector<8x1024xf32> -> vector<8x1024xf32>
    %225 = arith.index_cast %c7_i32 : i32 to index
    %c0_49 = arith.constant 0 : index
    %c0_50 = arith.constant 0 : index
    %226 = vector.load %arg1[%225, %c0_49, %c0_50] : memref<8x8x1024xf32, #tpu.memory_space<vmem>>, vector<1x8x1024xf32>
    %227 = vector.shape_cast %226 : vector<1x8x1024xf32> to vector<8x1024xf32>
    %228 = arith.addf %224, %227 : vector<8x1024xf32>
    %229 = vector.extract_strided_slice %228 {offsets = [0, 0], sizes = [8, 256], strides = [1, 1]} : vector<8x1024xf32> to vector<8x256xf32>
    %230 = arith.negf %229 : vector<8x256xf32>
    %231 = math.exp %230 : vector<8x256xf32>
    %cst_51 = arith.constant 1.000000e+00 : f32
    %232 = vector.broadcast %cst_51 : f32 to vector<8x256xf32>
    %233 = arith.addf %232, %231 : vector<8x256xf32>
    %234 = arith.divf %232, %233 : vector<8x256xf32>
    %235 = vector.extract_strided_slice %228 {offsets = [0, 256], sizes = [8, 256], strides = [1, 1]} : vector<8x1024xf32> to vector<8x256xf32>
    %236 = arith.negf %235 : vector<8x256xf32>
    %237 = math.exp %236 : vector<8x256xf32>
    %cst_52 = arith.constant 1.000000e+00 : f32
    %238 = vector.broadcast %cst_52 : f32 to vector<8x256xf32>
    %239 = arith.addf %238, %237 : vector<8x256xf32>
    %240 = arith.divf %238, %239 : vector<8x256xf32>
    %241 = vector.extract_strided_slice %228 {offsets = [0, 512], sizes = [8, 256], strides = [1, 1]} : vector<8x1024xf32> to vector<8x256xf32>
    %242 = math.tanh %241 : vector<8x256xf32>
    %243 = vector.extract_strided_slice %228 {offsets = [0, 768], sizes = [8, 256], strides = [1, 1]} : vector<8x1024xf32> to vector<8x256xf32>
    %244 = arith.negf %243 : vector<8x256xf32>
    %245 = math.exp %244 : vector<8x256xf32>
    %cst_53 = arith.constant 1.000000e+00 : f32
    %246 = vector.broadcast %cst_53 : f32 to vector<8x256xf32>
    %247 = arith.addf %246, %245 : vector<8x256xf32>
    %248 = arith.divf %246, %247 : vector<8x256xf32>
    %249 = arith.mulf %240, %220 : vector<8x256xf32>
    %250 = arith.mulf %234, %242 : vector<8x256xf32>
    %251 = arith.addf %249, %250 : vector<8x256xf32>
    %252 = math.tanh %251 : vector<8x256xf32>
    %253 = arith.mulf %248, %252 : vector<8x256xf32>
    %c8_i32 = arith.constant 8 : i32
    %c0_54 = arith.constant 0 : index
    %c0_55 = arith.constant 0 : index
    %254 = vector.load %arg4[%c0_54, %c0_55] : memref<8x256xf32, #tpu.memory_space<vmem>>, vector<8x256xf32>
    tpu.vector_store %arg4[%c0_54, %c0_55], %253 {strides = array<i32>} : memref<8x256xf32, #tpu.memory_space<vmem>>, vector<8x256xf32>,
    %c0_56 = arith.constant 0 : index
    %c0_57 = arith.constant 0 : index
    %255 = vector.load %arg5[%c0_56, %c0_57] : memref<8x256xf32, #tpu.memory_space<vmem>>, vector<8x256xf32>
    tpu.vector_store %arg5[%c0_56, %c0_57], %251 {strides = array<i32>} : memref<8x256xf32, #tpu.memory_space<vmem>>, vector<8x256xf32>,
    %c0_58 = arith.constant 0 : index
    %c0_59 = arith.constant 0 : index
    %256 = vector.load %arg3[%c0_58, %c0_59] : memref<8x256xf32, #tpu.memory_space<vmem>>, vector<8x256xf32>
    tpu.vector_store %arg3[%c0_58, %c0_59], %253 {strides = array<i32>} : memref<8x256xf32, #tpu.memory_space<vmem>>, vector<8x256xf32>,
    return
  }
  func.func @transform_0(%arg0: i32) -> (i32, i32, i32) {
    %c0_i32 = arith.constant 0 : i32
    %c0_i32_0 = arith.constant 0 : i32
    %c0_i32_1 = arith.constant 0 : i32
    return %arg0, %c0_i32, %c0_i32_0 : i32, i32, i32
  }
  func.func @transform_1(%arg0: i32) -> (i32, i32) {
    %c0_i32 = arith.constant 0 : i32
    %c0_i32_0 = arith.constant 0 : i32
    %c0_i32_1 = arith.constant 0 : i32
    return %c0_i32, %c0_i32_0 : i32, i32
  }
  func.func @transform_2(%arg0: i32) -> (i32, i32) {
    %c0_i32 = arith.constant 0 : i32
    %c0_i32_0 = arith.constant 0 : i32
    %c0_i32_1 = arith.constant 0 : i32
    return %c0_i32, %c0_i32_0 : i32, i32
  }
}

</mosaic_0001>

<bundles_post_ra>
// kernel: lstm_net_forward.1
= control target key start
LH: loop header
LB: loop body
LE: loop exit
PB: predicated region body
PF: predicated region fallthrough
CT: control target
= control target key end

     0   :  { %s7696_s1 = inlined_call_operand.vmem [shape: bf16[256,1024], index: 1, kind: input, shape index: {}]   ;;  %s7697_s0 = inlined_call_operand.vmem [shape: f32[8,8,1024], index: 0, kind: input, shape index: {}]   ;;  %s7698_s2 = inlined_call_operand.vmem [shape: f32[8,256], index: 2, kind: output, shape index: {}]  }
   0x1   :  { %v3786_v0 = vld [vmem:[%s7696_s1 + $0x1c0] sm:$0xf]  ;;  %v4232_v5 = vld [vmem:[%s7696_s1 + $0x1c4] sm:$0xf] }
   0x2   :  { %v4236_v1 = vld [vmem:[%s7696_s1 + $0x1dc] sm:$0xf0]  ;;  %v3788_v6 = vld [vmem:[%s7696_s1 + $0x1e0] sm:$0xf0] }
   0x3   :  { %v4042_v2 = vld [vmem:[%s7696_s1 + $0x3c0] sm:$0xf]  ;;  %v4586_v3 = vor.u32 %v4236_v1, %v3786_v0  ;;  %v4599_v8 = vor.u32 %v4232_v5, %v3788_v6  ;;  %v4296_v9 = vld [vmem:[%s7696_s1 + $0x3c4] sm:$0xf] }
   0x4   :  { %v4300_v4 = vld [vmem:[%s7696_s1 + $0x3dc] sm:$0xf0]  ;;  %v4044_v10 = vld [vmem:[%s7696_s1 + $0x3e0] sm:$0xf0] }
   0x5   :  { %7964 = vst [vmem:[#allocation4_spill] sm:$0xff] %v4586_v3  ;;  %v4597_v7 = vor.u32 %v4300_v4, %v4042_v2  ;;  %v3754_v11 = vld [vmem:[%s7696_s1 + $0x180] sm:$0xf]  ;;  %801 = vmatpush.bf16.msra.mxu0 %v4586_v3  ;;  %v4611_v12 = vor.u32 %v4296_v9, %v4044_v10  ;;  %827 = vmatpush.bf16.msra.mxu2 %v4599_v8  ;;  %v4224_v18 = vld [vmem:[%s7696_s1 + $0x184] sm:$0xf] }
   0x6   :  { %7966 = vst [vmem:[#allocation6_spill] sm:$0xff] %v4599_v8  ;;  %v4228_v13 = vld [vmem:[%s7696_s1 + $0x19c] sm:$0xf0]  ;;  %v3756_v19 = vld [vmem:[%s7696_s1 + $0x1a0] sm:$0xf0] }
   0x7   :  { %7965 = vst [vmem:[#allocation5_spill] sm:$0xff] %v4597_v7  ;;  %v4010_v14 = vld [vmem:[%s7696_s1 + $0x380] sm:$0xf]  ;;  %814 = vmatpush.bf16.msra.mxu1 %v4597_v7  ;;  %v4624_v16 = vor.u32 %v4228_v13, %v3754_v11  ;;  %v4288_v20 = vld [vmem:[%s7696_s1 + $0x384] sm:$0xf]  ;;  %840 = vmatpush.bf16.msra.mxu3 %v4611_v12  ;;  %v4638_v21 = vor.u32 %v4224_v18, %v3756_v19 }
   0x8   :  { %7967 = vst [vmem:[#allocation7_spill] sm:$0xff] %v4611_v12  ;;  %v4292_v15 = vld [vmem:[%s7696_s1 + $0x39c] sm:$0xf0]  ;;  %v4012_v22 = vld [vmem:[%s7696_s1 + $0x3a0] sm:$0xf0] }
   0x9   :  { %7968 = vst [vmem:[#allocation8_spill] sm:$0xff] %v4624_v16  ;;  %v4626_v17 = vor.u32 %v4292_v15, %v4010_v14  ;;  %v3722_v23 = vld [vmem:[%s7696_s1 + $0x140] sm:$0xf]  ;;  %v4649_v25 = vor.u32 %v4288_v20, %v4012_v22  ;;  %v4216_v28 = vld [vmem:[%s7696_s1 + $0x144] sm:$0xf]  ;;  %802 = vmatpush.bf16.msra.mxu0 %v4624_v16  ;;  %828 = vmatpush.bf16.msra.mxu2 %v4638_v21 }
   0xa   :  { %7970 = vst [vmem:[#allocation10_spill] sm:$0xff] %v4638_v21  ;;  %v4220_v24 = vld [vmem:[%s7696_s1 + $0x15c] sm:$0xf0]  ;;  %v3724_v30 = vld [vmem:[%s7696_s1 + $0x160] sm:$0xf0] }
   0xb   :  { %7969 = vst [vmem:[#allocation9_spill] sm:$0xff] %v4626_v17  ;;  %v3978_v26 = vld [vmem:[%s7696_s1 + $0x340] sm:$0xf]  ;;  %v4661_v29 = vor.u32 %v4220_v24, %v3722_v23  ;;  %v4280_v31 = vld [vmem:[%s7696_s1 + $0x344] sm:$0xf]  ;;  %815 = vmatpush.bf16.msra.mxu1 %v4626_v17  ;;  %v4676_v34 = vor.u32 %v4216_v28, %v3724_v30  ;;  %841 = vmatpush.bf16.msra.mxu3 %v4649_v25 }
   0xc   :  { %7971 = vst [vmem:[#allocation11_spill] sm:$0xff] %v4649_v25  ;;  %v4284_v27 = vld [vmem:[%s7696_s1 + $0x35c] sm:$0xf0]  ;;  %v3980_v32 = vld [vmem:[%s7696_s1 + $0x360] sm:$0xf0] }
   0xd   :  { %7972 = vst [vmem:[#allocation12_spill] sm:$0xff] %v4661_v29  ;;  %v4674_v33 = vor.u32 %v4284_v27, %v3978_v26  ;;  %v3690_v35 = vld [vmem:[%s7696_s1 + $0x100] sm:$0xf]  ;;  %v4688_v38 = vor.u32 %v4280_v31, %v3980_v32  ;;  %v4208_v40 = vld [vmem:[%s7696_s1 + $0x104] sm:$0xf]  ;;  %803 = vmatpush.bf16.msra.mxu0 %v4661_v29  ;;  %829 = vmatpush.bf16.msra.mxu2 %v4676_v34 }
   0xe   :  { %7974 = vst [vmem:[#allocation14_spill] sm:$0xff] %v4676_v34  ;;  %v4212_v36 = vld [vmem:[%s7696_s1 + $0x11c] sm:$0xf0]  ;;  %v3692_v41 = vld [vmem:[%s7696_s1 + $0x120] sm:$0xf0] }
   0xf   :  { %7973 = vst [vmem:[#allocation13_spill] sm:$0xff] %v4674_v33  ;;  %v3946_v37 = vld [vmem:[%s7696_s1 + $0x300] sm:$0xf]  ;;  %v4272_v42 = vld [vmem:[%s7696_s1 + $0x304] sm:$0xf]  ;;  %v4706_v44 = vor.u32 %v4212_v36, %v3690_v35  ;;  %816 = vmatpush.bf16.msra.mxu1 %v4674_v33  ;;  %v4712_v46 = vor.u32 %v4208_v40, %v3692_v41  ;;  %842 = vmatpush.bf16.msra.mxu3 %v4688_v38 }
  0x10   :  { %7975 = vst [vmem:[#allocation15_spill] sm:$0xff] %v4688_v38  ;;  %v4276_v39 = vld [vmem:[%s7696_s1 + $0x31c] sm:$0xf0]  ;;  %v3948_v43 = vld [vmem:[%s7696_s1 + $0x320] sm:$0xf0] }
  0x11   :  { %7976 = vst [vmem:[#allocation16_spill] sm:$0xff] %v4706_v44  ;;  %v4710_v45 = vor.u32 %v4276_v39, %v3946_v37  ;;  %v3658_v47 = vld [vmem:[%s7696_s1 + $0xc0] sm:$0xf]  ;;  %v4724_v50 = vor.u32 %v4272_v42, %v3948_v43  ;;  %v4200_v52 = vld [vmem:[%s7696_s1 + $0xc4] sm:$0xf]  ;;  %804 = vmatpush.bf16.msra.mxu0 %v4706_v44  ;;  %830 = vmatpush.bf16.msra.mxu2 %v4712_v46 }
  0x12   :  { %7978 = vst [vmem:[#allocation18_spill] sm:$0xff] %v4712_v46  ;;  %v4204_v48 = vld [vmem:[%s7696_s1 + $0xdc] sm:$0xf0]  ;;  %v3660_v53 = vld [vmem:[%s7696_s1 + $0xe0] sm:$0xf0] }
  0x13   :  { %7977 = vst [vmem:[#allocation17_spill] sm:$0xff] %v4710_v45  ;;  %v3914_v49 = vld [vmem:[%s7696_s1 + $0x2c0] sm:$0xf]  ;;  %v4264_v54 = vld [vmem:[%s7696_s1 + $0x2c4] sm:$0xf]  ;;  %v4742_v56 = vor.u32 %v4204_v48, %v3658_v47  ;;  %817 = vmatpush.bf16.msra.mxu1 %v4710_v45  ;;  %v4748_v58 = vor.u32 %v4200_v52, %v3660_v53  ;;  %843 = vmatpush.bf16.msra.mxu3 %v4724_v50 }
  0x14   :  { %7979 = vst [vmem:[#allocation19_spill] sm:$0xff] %v4724_v50  ;;  %v4268_v51 = vld [vmem:[%s7696_s1 + $0x2dc] sm:$0xf0]  ;;  %v3916_v55 = vld [vmem:[%s7696_s1 + $0x2e0] sm:$0xf0] }
  0x15   :  { %7980 = vst [vmem:[#allocation20_spill] sm:$0xff] %v4742_v56  ;;  %v4746_v57 = vor.u32 %v4268_v51, %v3914_v49  ;;  %v3626_v59 = vld [vmem:[%s7696_s1 + $0x80] sm:$0xf]  ;;  %v4760_v62 = vor.u32 %v4264_v54, %v3916_v55  ;;  %v4192_v0 = vld [vmem:[%s7696_s1 + $0x84] sm:$0xf]  ;;  %805 = vmatpush.bf16.msra.mxu0 %v4742_v56  ;;  %831 = vmatpush.bf16.msra.mxu2 %v4748_v58 }
  0x16   :  { %7982 = vst [vmem:[#allocation22_spill] sm:$0xff] %v4748_v58  ;;  %v4196_v60 = vld [vmem:[%s7696_s1 + $0x9c] sm:$0xf0]  ;;  %v3628_v1 = vld [vmem:[%s7696_s1 + $0xa0] sm:$0xf0] }
  0x17   :  { %7981 = vst [vmem:[#allocation21_spill] sm:$0xff] %v4746_v57  ;;  %v3882_v61 = vld [vmem:[%s7696_s1 + $0x280] sm:$0xf]  ;;  %v4256_v2 = vld [vmem:[%s7696_s1 + $0x284] sm:$0xf]  ;;  %v4778_v5 = vor.u32 %v4196_v60, %v3626_v59  ;;  %818 = vmatpush.bf16.msra.mxu1 %v4746_v57  ;;  %v4784_v9 = vor.u32 %v4192_v0, %v3628_v1  ;;  %844 = vmatpush.bf16.msra.mxu3 %v4760_v62 }
  0x18   :  { %7983 = vst [vmem:[#allocation23_spill] sm:$0xff] %v4760_v62  ;;  %v4260_v63 = vld [vmem:[%s7696_s1 + $0x29c] sm:$0xf0]  ;;  %v3884_v4 = vld [vmem:[%s7696_s1 + $0x2a0] sm:$0xf0] }
  0x19   :  { %7984 = vst [vmem:[#allocation24_spill] sm:$0xff] %v4778_v5  ;;  %v4782_v6 = vor.u32 %v4260_v63, %v3882_v61  ;;  %v3594_v10 = vld [vmem:[%s7696_s1 + $0x40] sm:$0xf]  ;;  %v4796_v14 = vor.u32 %v4256_v2, %v3884_v4  ;;  %v4184_v18 = vld [vmem:[%s7696_s1 + $0x44] sm:$0xf]  ;;  %806 = vmatpush.bf16.msra.mxu0 %v4778_v5  ;;  %832 = vmatpush.bf16.msra.mxu2 %v4784_v9 }
  0x1a   :  { %7986 = vst [vmem:[#allocation26_spill] sm:$0xff] %v4784_v9  ;;  %v4188_v11 = vld [vmem:[%s7696_s1 + $0x5c] sm:$0xf0]  ;;  %v3596_v19 = vld [vmem:[%s7696_s1 + $0x60] sm:$0xf0] }
  0x1b   :  { %7985 = vst [vmem:[#allocation25_spill] sm:$0xff] %v4782_v6  ;;  %v3850_v13 = vld [vmem:[%s7696_s1 + $0x240] sm:$0xf]  ;;  %v4248_v20 = vld [vmem:[%s7696_s1 + $0x244] sm:$0xf]  ;;  %v4814_v23 = vor.u32 %v4188_v11, %v3594_v10  ;;  %819 = vmatpush.bf16.msra.mxu1 %v4782_v6  ;;  %v4826_v28 = vor.u32 %v4184_v18, %v3596_v19  ;;  %845 = vmatpush.bf16.msra.mxu3 %v4796_v14 }
  0x1c   :  { %7987 = vst [vmem:[#allocation27_spill] sm:$0xff] %v4796_v14  ;;  %v4252_v15 = vld [vmem:[%s7696_s1 + $0x25c] sm:$0xf0]  ;;  %v3852_v22 = vld [vmem:[%s7696_s1 + $0x260] sm:$0xf0] }
  0x1d   :  { %7988 = vst [vmem:[#allocation28_spill] sm:$0xff] %v4814_v23  ;;  %v3562_v24 = vld [vmem:[%s7696_s1] sm:$0xf]  ;;  %v4824_v27 = vor.u32 %v4252_v15, %v3850_v13  ;;  %v4176_v32 = vld [vmem:[%s7696_s1 + $0x4] sm:$0xf]  ;;  %v4838_v35 = vor.u32 %v4248_v20, %v3852_v22  ;;  %807 = vmatpush.bf16.msra.mxu0 %v4814_v23  ;;  %833 = vmatpush.bf16.msra.mxu2 %v4826_v28 }
  0x1e   :  { %v4180_v26 = vld [vmem:[%s7696_s1 + $0x1c] sm:$0xf0]  ;;  %7990 = vst [vmem:[#allocation30_spill] sm:$0xff] %v4826_v28  ;;  %v3564_v36 = vld [vmem:[%s7696_s1 + $0x20] sm:$0xf0] }
  0x1f   :  { %7989 = vst [vmem:[#allocation29_spill] sm:$0xff] %v4824_v27  ;;  %v3818_v30 = vld [vmem:[%s7696_s1 + $0x200] sm:$0xf]  ;;  %v4240_v37 = vld [vmem:[%s7696_s1 + $0x204] sm:$0xf]  ;;  %v4859_v43 = vor.u32 %v4180_v26, %v3562_v24  ;;  %820 = vmatpush.bf16.msra.mxu1 %v4824_v27  ;;  %v4874_v52 = vor.u32 %v4176_v32, %v3564_v36  ;;  %846 = vmatpush.bf16.msra.mxu3 %v4838_v35 }
  0x20   :  { %v4244_v31 = vld [vmem:[%s7696_s1 + $0x21c] sm:$0xf0]  ;;  %7991 = vst [vmem:[#allocation31_spill] sm:$0xff] %v4838_v35  ;;  %v3820_v39 = vld [vmem:[%s7696_s1 + $0x220] sm:$0xf0] }
  0x21   :  { %v3794_v40 = vld [vmem:[%s7696_s1 + $0x1c8] sm:$0xf]  ;;  %7992 = vst [vmem:[#allocation32_spill] sm:$0xff] %v4859_v43  ;;  %v4233_v48 = vld [vmem:[%s7696_s1 + $0x1cc] sm:$0xf]  ;;  %v4872_v51 = vor.u32 %v4244_v31, %v3818_v30  ;;  %v4883_v55 = vor.u32 %v4240_v37, %v3820_v39  ;;  %808 = vmatpush.bf16.msra.mxu0 %v4859_v43  ;;  %834 = vmatpush.bf16.msra.mxu2 %v4874_v52  ;;  %v7699_v37 = vmov 0.0|0.0  }
  0x22   :  { %v4237_v41 = vld [vmem:[%s7696_s1 + $0x1e4] sm:$0xf0]  ;;  %v3796_v49 = vld [vmem:[%s7696_s1 + $0x1e8] sm:$0xf0]  ;;  %7994 = vst [vmem:[#allocation34_spill] sm:$0xff] %v4874_v52 }
  0x23   :  { %v4050_v42 = vld [vmem:[%s7696_s1 + $0x3c8] sm:$0xf]  ;;  %7993 = vst [vmem:[#allocation33_spill] sm:$0xff] %v4872_v51  ;;  %v4297_v53 = vld [vmem:[%s7696_s1 + $0x3cc] sm:$0xf]  ;;  %v4885_v59 = vor.u32 %v4237_v41, %v3794_v40  ;;  %v4889_v61 = vor.u32 %v4233_v48, %v3796_v49  ;;  %821 = vmatpush.bf16.msra.mxu1 %v4872_v51  ;;  %847 = vmatpush.bf16.msra.mxu3 %v4883_v55 }
  0x24   :  { %v4301_v47 = vld [vmem:[%s7696_s1 + $0x3e4] sm:$0xf0]  ;;  %v4052_v54 = vld [vmem:[%s7696_s1 + $0x3e8] sm:$0xf0]  ;;  %7995 = vst [vmem:[#allocation35_spill] sm:$0xff] %v4883_v55  ;;  %835 = vmatmul.bf16.vlgmr.msra.gmra.mxu2 %v7699_v37  ;;  %809 = vmatmul.bf16.vlgmr.msra.gmra.mxu0 %v7699_v37 }
  0x25   :  { %7996 = vst [vmem:[#allocation36_spill] sm:$0xff] %v4885_v59  ;;  %v4887_v60 = vor.u32 %v4301_v47, %v4050_v42  ;;  %v3762_v63 = vld [vmem:[%s7696_s1 + $0x188] sm:$0xf]  ;;  %v4901_v2 = vor.u32 %v4297_v53, %v4052_v54  ;;  %v4225_v10 = vld [vmem:[%s7696_s1 + $0x18c] sm:$0xf]  ;;  %853 = vmatpush.bf16.msrb.mxu0 %v4885_v59  ;;  %879 = vmatpush.bf16.msrb.mxu2 %v4889_v61 }
  0x26   :  { %7998 = vst [vmem:[#allocation38_spill] sm:$0xff] %v4889_v61  ;;  %v4229_v0 = vld [vmem:[%s7696_s1 + $0x1a4] sm:$0xf0]  ;;  %v3764_v11 = vld [vmem:[%s7696_s1 + $0x1a8] sm:$0xf0]  ;;  %848 = vmatmul.bf16.vlgmr.msra.gmra.mxu3 %v7699_v37  ;;  %822 = vmatmul.bf16.vlgmr.msra.gmra.mxu1 %v7699_v37 }
  0x27   :  { %7997 = vst [vmem:[#allocation37_spill] sm:$0xff] %v4887_v60  ;;  %v4018_v1 = vld [vmem:[%s7696_s1 + $0x388] sm:$0xf]  ;;  %v4289_v13 = vld [vmem:[%s7696_s1 + $0x38c] sm:$0xf]  ;;  %v4922_v18 = vor.u32 %v4229_v0, %v3762_v63  ;;  %866 = vmatpush.bf16.msrb.mxu1 %v4887_v60  ;;  %v4928_v20 = vor.u32 %v4225_v10, %v3764_v11  ;;  %892 = vmatpush.bf16.msrb.mxu3 %v4901_v2 }
  0x28   :  { %7999 = vst [vmem:[#allocation39_spill] sm:$0xff] %v4901_v2  ;;  %v4293_v4 = vld [vmem:[%s7696_s1 + $0x3a4] sm:$0xf0]  ;;  %v4020_v15 = vld [vmem:[%s7696_s1 + $0x3a8] sm:$0xf0] }
  0x29   :  { %8000 = vst [vmem:[#allocation40_spill] sm:$0xff] %v4922_v18  ;;  %v4926_v19 = vor.u32 %v4293_v4, %v4018_v1  ;;  %v3730_v22 = vld [vmem:[%s7696_s1 + $0x148] sm:$0xf]  ;;  %v4940_v30 = vor.u32 %v4289_v13, %v4020_v15  ;;  %v4217_v32 = vld [vmem:[%s7696_s1 + $0x14c] sm:$0xf]  ;;  %854 = vmatpush.bf16.msrb.mxu0 %v4922_v18  ;;  %880 = vmatpush.bf16.msrb.mxu2 %v4928_v20 }
  0x2a   :  { %8002 = vst [vmem:[#allocation42_spill] sm:$0xff] %v4928_v20  ;;  %v4221_v24 = vld [vmem:[%s7696_s1 + $0x164] sm:$0xf0]  ;;  %v3732_v36 = vld [vmem:[%s7696_s1 + $0x168] sm:$0xf0] }
  0x2b   :  { %8001 = vst [vmem:[#allocation41_spill] sm:$0xff] %v4926_v19  ;;  %v3986_v26 = vld [vmem:[%s7696_s1 + $0x348] sm:$0xf]  ;;  %v4281_v39 = vld [vmem:[%s7696_s1 + $0x34c] sm:$0xf]  ;;  %v4961_v41 = vor.u32 %v4221_v24, %v3730_v22  ;;  %867 = vmatpush.bf16.msrb.mxu1 %v4926_v19  ;;  %v4968_v47 = vor.u32 %v4217_v32, %v3732_v36  ;;  %893 = vmatpush.bf16.msrb.mxu3 %v4940_v30 }
  0x2c   :  { %8003 = vst [vmem:[#allocation43_spill] sm:$0xff] %v4940_v30  ;;  %v4285_v31 = vld [vmem:[%s7696_s1 + $0x364] sm:$0xf0]  ;;  %v3988_v40 = vld [vmem:[%s7696_s1 + $0x368] sm:$0xf0] }
  0x2d   :  { %8004 = vst [vmem:[#allocation44_spill] sm:$0xff] %v4961_v41  ;;  %v4966_v42 = vor.u32 %v4285_v31, %v3986_v26  ;;  %v3698_v48 = vld [vmem:[%s7696_s1 + $0x108] sm:$0xf]  ;;  %v4980_v54 = vor.u32 %v4281_v39, %v3988_v40  ;;  %v4209_v0 = vld [vmem:[%s7696_s1 + $0x10c] sm:$0xf]  ;;  %855 = vmatpush.bf16.msrb.mxu0 %v4961_v41  ;;  %881 = vmatpush.bf16.msrb.mxu2 %v4968_v47 }
  0x2e   :  { %8006 = vst [vmem:[#allocation46_spill] sm:$0xff] %v4968_v47  ;;  %v4213_v49 = vld [vmem:[%s7696_s1 + $0x124] sm:$0xf0]  ;;  %v3700_v1 = vld [vmem:[%s7696_s1 + $0x128] sm:$0xf0] }
  0x2f   :  { %8005 = vst [vmem:[#allocation45_spill] sm:$0xff] %v4966_v42  ;;  %v3954_v53 = vld [vmem:[%s7696_s1 + $0x308] sm:$0xf]  ;;  %v4273_v4 = vld [vmem:[%s7696_s1 + $0x30c] sm:$0xf]  ;;  %v4998_v11 = vor.u32 %v4213_v49, %v3698_v48  ;;  %868 = vmatpush.bf16.msrb.mxu1 %v4966_v42  ;;  %v5004_v15 = vor.u32 %v4209_v0, %v3700_v1  ;;  %894 = vmatpush.bf16.msrb.mxu3 %v4980_v54 }
  0x30   :  { %8007 = vst [vmem:[#allocation47_spill] sm:$0xff] %v4980_v54  ;;  %v4277_v63 = vld [vmem:[%s7696_s1 + $0x324] sm:$0xf0]  ;;  %v3956_v10 = vld [vmem:[%s7696_s1 + $0x328] sm:$0xf0] }
  0x31   :  { %8008 = vst [vmem:[#allocation48_spill] sm:$0xff] %v4998_v11  ;;  %v5002_v13 = vor.u32 %v4277_v63, %v3954_v53  ;;  %v3666_v22 = vld [vmem:[%s7696_s1 + $0xc8] sm:$0xf]  ;;  %v5016_v31 = vor.u32 %v4273_v4, %v3956_v10  ;;  %v4201_v36 = vld [vmem:[%s7696_s1 + $0xcc] sm:$0xf]  ;;  %856 = vmatpush.bf16.msrb.mxu0 %v4998_v11  ;;  %882 = vmatpush.bf16.msrb.mxu2 %v5004_v15 }
  0x32   :  { %8010 = vst [vmem:[#allocation50_spill] sm:$0xff] %v5004_v15  ;;  %v4205_v24 = vld [vmem:[%s7696_s1 + $0xe4] sm:$0xf0]  ;;  %v3668_v39 = vld [vmem:[%s7696_s1 + $0xe8] sm:$0xf0] }
  0x33   :  { %8009 = vst [vmem:[#allocation49_spill] sm:$0xff] %v5002_v13  ;;  %v3922_v26 = vld [vmem:[%s7696_s1 + $0x2c8] sm:$0xf]  ;;  %v4265_v40 = vld [vmem:[%s7696_s1 + $0x2cc] sm:$0xf]  ;;  %v5034_v49 = vor.u32 %v4205_v24, %v3666_v22  ;;  %869 = vmatpush.bf16.msrb.mxu1 %v5002_v13  ;;  %v5040_v63 = vor.u32 %v4201_v36, %v3668_v39  ;;  %895 = vmatpush.bf16.msrb.mxu3 %v5016_v31 }
  0x34   :  { %8011 = vst [vmem:[#allocation51_spill] sm:$0xff] %v5016_v31  ;;  %v4269_v32 = vld [vmem:[%s7696_s1 + $0x2e4] sm:$0xf0]  ;;  %v3924_v48 = vld [vmem:[%s7696_s1 + $0x2e8] sm:$0xf0] }
  0x35   :  { %8012 = vst [vmem:[#allocation52_spill] sm:$0xff] %v5034_v49  ;;  %v5038_v53 = vor.u32 %v4269_v32, %v3922_v26  ;;  %v3634_v0 = vld [vmem:[%s7696_s1 + $0x88] sm:$0xf]  ;;  %v5052_v10 = vor.u32 %v4265_v40, %v3924_v48  ;;  %v4193_v24 = vld [vmem:[%s7696_s1 + $0x8c] sm:$0xf]  ;;  %857 = vmatpush.bf16.msrb.mxu0 %v5034_v49  ;;  %883 = vmatpush.bf16.msrb.mxu2 %v5040_v63 }
  0x36   :  { %8014 = vst [vmem:[#allocation54_spill] sm:$0xff] %v5040_v63  ;;  %v4197_v1 = vld [vmem:[%s7696_s1 + $0xa4] sm:$0xf0]  ;;  %v3636_v26 = vld [vmem:[%s7696_s1 + $0xa8] sm:$0xf0] }
  0x37   :  { %8013 = vst [vmem:[#allocation53_spill] sm:$0xff] %v5038_v53  ;;  %v3890_v4 = vld [vmem:[%s7696_s1 + $0x288] sm:$0xf]  ;;  %v4257_v32 = vld [vmem:[%s7696_s1 + $0x28c] sm:$0xf]  ;;  %v5070_v39 = vor.u32 %v4197_v1, %v3634_v0  ;;  %870 = vmatpush.bf16.msrb.mxu1 %v5038_v53  ;;  %v5076_v48 = vor.u32 %v4193_v24, %v3636_v26  ;;  %896 = vmatpush.bf16.msrb.mxu3 %v5052_v10 }
  0x38   :  { %8015 = vst [vmem:[#allocation55_spill] sm:$0xff] %v5052_v10  ;;  %v4261_v22 = vld [vmem:[%s7696_s1 + $0x2a4] sm:$0xf0]  ;;  %v3892_v36 = vld [vmem:[%s7696_s1 + $0x2a8] sm:$0xf0] }
  0x39   :  { %8016 = vst [vmem:[#allocation56_spill] sm:$0xff] %v5070_v39  ;;  %v5074_v40 = vor.u32 %v4261_v22, %v3890_v4  ;;  %v3602_v37 = vld [vmem:[%s7696_s1 + $0x48] sm:$0xf]  ;;  %v5088_v1 = vor.u32 %v4257_v32, %v3892_v36  ;;  %v4185_v22 = vld [vmem:[%s7696_s1 + $0x4c] sm:$0xf]  ;;  %858 = vmatpush.bf16.msrb.mxu0 %v5070_v39  ;;  %884 = vmatpush.bf16.msrb.mxu2 %v5076_v48 }
  0x3a   :  { %8018 = vst [vmem:[#allocation58_spill] sm:$0xff] %v5076_v48  ;;  %v4189_v31 = vld [vmem:[%s7696_s1 + $0x64] sm:$0xf0]  ;;  %v3604_v24 = vld [vmem:[%s7696_s1 + $0x68] sm:$0xf0] }
  0x3b   :  { %8017 = vst [vmem:[#allocation57_spill] sm:$0xff] %v5074_v40  ;;  %v3858_v0 = vld [vmem:[%s7696_s1 + $0x248] sm:$0xf]  ;;  %v4249_v26 = vld [vmem:[%s7696_s1 + $0x24c] sm:$0xf]  ;;  %v5106_v36 = vor.u32 %v4189_v31, %v3602_v37  ;;  %871 = vmatpush.bf16.msrb.mxu1 %v5074_v40  ;;  %v5118_v49 = vor.u32 %v4185_v22, %v3604_v24  ;;  %897 = vmatpush.bf16.msrb.mxu3 %v5088_v1 }
  0x3c   :  { %8019 = vst [vmem:[#allocation59_spill] sm:$0xff] %v5088_v1  ;;  %v4253_v4 = vld [vmem:[%s7696_s1 + $0x264] sm:$0xf0]  ;;  %v3860_v32 = vld [vmem:[%s7696_s1 + $0x268] sm:$0xf0] }
  0x3d   :  { %8020 = vst [vmem:[#allocation60_spill] sm:$0xff] %v5106_v36  ;;  %v3570_v10 = vld [vmem:[%s7696_s1 + $0x8] sm:$0xf]  ;;  %v5116_v63 = vor.u32 %v4253_v4, %v3858_v0  ;;  %v4177_v39 = vld [vmem:[%s7696_s1 + $0xc] sm:$0xf]  ;;  %v5130_v40 = vor.u32 %v4249_v26, %v3860_v32  ;;  %859 = vmatpush.bf16.msrb.mxu0 %v5106_v36  ;;  %885 = vmatpush.bf16.msrb.mxu2 %v5118_v49 }
  0x3e   :  { %v4181_v53 = vld [vmem:[%s7696_s1 + $0x24] sm:$0xf0]  ;;  %8022 = vst [vmem:[#allocation62_spill] sm:$0xff] %v5118_v49  ;;  %v3572_v0 = vld [vmem:[%s7696_s1 + $0x28] sm:$0xf0] }
  0x3f   :  { %8021 = vst [vmem:[#allocation61_spill] sm:$0xff] %v5116_v63  ;;  %v3826_v37 = vld [vmem:[%s7696_s1 + $0x208] sm:$0xf]  ;;  %v4241_v4 = vld [vmem:[%s7696_s1 + $0x20c] sm:$0xf]  ;;  %v5151_v1 = vor.u32 %v4181_v53, %v3570_v10  ;;  %872 = vmatpush.bf16.msrb.mxu1 %v5116_v63  ;;  %v5166_v53 = vor.u32 %v4177_v39, %v3572_v0  ;;  %898 = vmatpush.bf16.msrb.mxu3 %v5130_v40 }
  0x40   :  { %v4245_v31 = vld [vmem:[%s7696_s1 + $0x224] sm:$0xf0]  ;;  %8023 = vst [vmem:[#allocation63_spill] sm:$0xff] %v5130_v40  ;;  %v3828_v22 = vld [vmem:[%s7696_s1 + $0x228] sm:$0xf0] }
  0x41   :  { %v3802_v24 = vld [vmem:[%s7696_s1 + $0x1d0] sm:$0xf]  ;;  %8024 = vst [vmem:[#allocation64_spill] sm:$0xff] %v5151_v1  ;;  %v4234_v13 = vld [vmem:[%s7696_s1 + $0x1d4] sm:$0xf]  ;;  %v5164_v54 = vor.u32 %v4245_v31, %v3826_v37  ;;  %v5175_v11 = vor.u32 %v4241_v4, %v3828_v22  ;;  %860 = vmatpush.bf16.msrb.mxu0 %v5151_v1  ;;  %886 = vmatpush.bf16.msrb.mxu2 %v5166_v53 }
  0x42   :  { %v4238_v26 = vld [vmem:[%s7696_s1 + $0x1ec] sm:$0xf0]  ;;  %v3804_v15 = vld [vmem:[%s7696_s1 + $0x1f0] sm:$0xf0]  ;;  %8026 = vst [vmem:[#allocation66_spill] sm:$0xff] %v5166_v53 }
  0x43   :  { %v4058_v32 = vld [vmem:[%s7696_s1 + $0x3d0] sm:$0xf]  ;;  %8025 = vst [vmem:[#allocation65_spill] sm:$0xff] %v5164_v54  ;;  %v4298_v10 = vld [vmem:[%s7696_s1 + $0x3d4] sm:$0xf]  ;;  %v5177_v42 = vor.u32 %v4238_v26, %v3802_v24  ;;  %v5181_v37 = vor.u32 %v4234_v13, %v3804_v15  ;;  %873 = vmatpush.bf16.msrb.mxu1 %v5164_v54  ;;  %899 = vmatpush.bf16.msrb.mxu3 %v5175_v11 }
  0x44   :  { %v4302_v48 = vld [vmem:[%s7696_s1 + $0x3ec] sm:$0xf0]  ;;  %v4060_v36 = vld [vmem:[%s7696_s1 + $0x3f0] sm:$0xf0]  ;;  %8027 = vst [vmem:[#allocation67_spill] sm:$0xff] %v5175_v11 }
  0x45   :  { %8028 = vst [vmem:[#allocation68_spill] sm:$0xff] %v5177_v42  ;;  %v5179_v63 = vor.u32 %v4302_v48, %v4058_v32  ;;  %v3770_v39 = vld [vmem:[%s7696_s1 + $0x190] sm:$0xf]  ;;  %v5193_v4 = vor.u32 %v4298_v10, %v4060_v36  ;;  %v4226_v15 = vld [vmem:[%s7696_s1 + $0x194] sm:$0xf]  ;;  %905 = vmatpush.bf16.msra.mxu0 %v5177_v42  ;;  %931 = vmatpush.bf16.msra.mxu2 %v5181_v37 }
  0x46   :  { %8030 = vst [vmem:[#allocation70_spill] sm:$0xff] %v5181_v37  ;;  %v4230_v31 = vld [vmem:[%s7696_s1 + $0x1ac] sm:$0xf0]  ;;  %v3772_v48 = vld [vmem:[%s7696_s1 + $0x1b0] sm:$0xf0] }
  0x47   :  { %8029 = vst [vmem:[#allocation69_spill] sm:$0xff] %v5179_v63  ;;  %v4026_v0 = vld [vmem:[%s7696_s1 + $0x390] sm:$0xf]  ;;  %v4290_v36 = vld [vmem:[%s7696_s1 + $0x394] sm:$0xf]  ;;  %v5214_v24 = vor.u32 %v4230_v31, %v3770_v39  ;;  %918 = vmatpush.bf16.msra.mxu1 %v5179_v63  ;;  %v5220_v32 = vor.u32 %v4226_v15, %v3772_v48  ;;  %944 = vmatpush.bf16.msra.mxu3 %v5193_v4  ;;  %v8036_v48 = vmov 0.0|0.0  }
  0x48   :  { %8031 = vst [vmem:[#allocation71_spill] sm:$0xff] %v5193_v4  ;;  %v4294_v13 = vld [vmem:[%s7696_s1 + $0x3ac] sm:$0xf0]  ;;  %v4028_v22 = vld [vmem:[%s7696_s1 + $0x3b0] sm:$0xf0]  ;;  %861 = vmatmul.bf16.vlgmr.msrb.gmra.mxu0 %v8036_v48  ;;  %887 = vmatmul.bf16.vlgmr.msrb.gmra.mxu2 %v8036_v48 }
  0x49   :  { %8032 = vst [vmem:[#allocation72_spill] sm:$0xff] %v5214_v24  ;;  %v5218_v26 = vor.u32 %v4294_v13, %v4026_v0  ;;  %v3738_v10 = vld [vmem:[%s7696_s1 + $0x150] sm:$0xf]  ;;  %v5232_v31 = vor.u32 %v4290_v36, %v4028_v22  ;;  %v4218_v13 = vld [vmem:[%s7696_s1 + $0x154] sm:$0xf]  ;;  %874 = vmatmul.bf16.vlgmr.msrb.gmra.mxu1 %v8036_v48  ;;  %906 = vmatpush.bf16.msra.mxu0 %v5214_v24 }
  0x4a   :  { %8034 = vst [vmem:[#allocation74_spill] sm:$0xff] %v5220_v32  ;;  %v4222_v11 = vld [vmem:[%s7696_s1 + $0x16c] sm:$0xf0]  ;;  %v3740_v15 = vld [vmem:[%s7696_s1 + $0x170] sm:$0xf0]  ;;  %900 = vmatmul.bf16.vlgmr.msrb.gmra.mxu3 %v8036_v48  ;;  %932 = vmatpush.bf16.msra.mxu2 %v5220_v32 }
  0x4b   :  { %8033 = vst [vmem:[#allocation73_spill] sm:$0xff] %v5218_v26  ;;  %v3994_v39 = vld [vmem:[%s7696_s1 + $0x350] sm:$0xf]  ;;  %v4282_v4 = vld [vmem:[%s7696_s1 + $0x354] sm:$0xf]  ;;  %v5253_v22 = vor.u32 %v4222_v11, %v3738_v10  ;;  %919 = vmatpush.bf16.msra.mxu1 %v5218_v26  ;;  %v5260_v37 = vor.u32 %v4218_v13, %v3740_v15  ;;  %945 = vmatpush.bf16.msra.mxu3 %v5232_v31 }
  0x4c   :  { %8035 = vst [vmem:[#allocation75_spill] sm:$0xff] %v5232_v31  ;;  %v4286_v0 = vld [vmem:[%s7696_s1 + $0x36c] sm:$0xf0]  ;;  %v3996_v36 = vld [vmem:[%s7696_s1 + $0x370] sm:$0xf0] }
  0x4d   :  { %8037 = vst [vmem:[#allocation76_spill] sm:$0xff] %v5253_v22  ;;  %v5258_v63 = vor.u32 %v4286_v0, %v3994_v39  ;;  %v3706_v42 = vld [vmem:[%s7696_s1 + $0x110] sm:$0xf]  ;;  %v5272_v10 = vor.u32 %v4282_v4, %v3996_v36  ;;  %v4210_v0 = vld [vmem:[%s7696_s1 + $0x114] sm:$0xf]  ;;  %907 = vmatpush.bf16.msra.mxu0 %v5253_v22 }
  0x4e   :  { %8039 = vst [vmem:[#allocation78_spill] sm:$0xff] %v5260_v37  ;;  %v4214_v24 = vld [vmem:[%s7696_s1 + $0x12c] sm:$0xf0]  ;;  %v3708_v13 = vld [vmem:[%s7696_s1 + $0x130] sm:$0xf0]  ;;  %933 = vmatpush.bf16.msra.mxu2 %v5260_v37 }
  0x4f   :  { %8038 = vst [vmem:[#allocation77_spill] sm:$0xff] %v5258_v63  ;;  %v3962_v11 = vld [vmem:[%s7696_s1 + $0x310] sm:$0xf]  ;;  %v4274_v15 = vld [vmem:[%s7696_s1 + $0x314] sm:$0xf]  ;;  %v5290_v36 = vor.u32 %v4214_v24, %v3706_v42  ;;  %920 = vmatpush.bf16.msra.mxu1 %v5258_v63  ;;  %v5296_v26 = vor.u32 %v4210_v0, %v3708_v13  ;;  %946 = vmatpush.bf16.msra.mxu3 %v5272_v10 }
  0x50   :  { %8040 = vst [vmem:[#allocation79_spill] sm:$0xff] %v5272_v10  ;;  %v4278_v39 = vld [vmem:[%s7696_s1 + $0x32c] sm:$0xf0]  ;;  %v3964_v4 = vld [vmem:[%s7696_s1 + $0x330] sm:$0xf0] }
  0x51   :  { %8041 = vst [vmem:[#allocation80_spill] sm:$0xff] %v5290_v36  ;;  %v5294_v31 = vor.u32 %v4278_v39, %v3962_v11  ;;  %v3674_v32 = vld [vmem:[%s7696_s1 + $0xd0] sm:$0xf]  ;;  %v5308_v24 = vor.u32 %v4274_v15, %v3964_v4  ;;  %v4202_v39 = vld [vmem:[%s7696_s1 + $0xd4] sm:$0xf]  ;;  %908 = vmatpush.bf16.msra.mxu0 %v5290_v36 }
  0x52   :  { %8043 = vst [vmem:[#allocation82_spill] sm:$0xff] %v5296_v26  ;;  %v4206_v54 = vld [vmem:[%s7696_s1 + $0xec] sm:$0xf0]  ;;  %v3676_v0 = vld [vmem:[%s7696_s1 + $0xf0] sm:$0xf0]  ;;  %934 = vmatpush.bf16.msra.mxu2 %v5296_v26 }
  0x53   :  { %8042 = vst [vmem:[#allocation81_spill] sm:$0xff] %v5294_v31  ;;  %v3930_v42 = vld [vmem:[%s7696_s1 + $0x2d0] sm:$0xf]  ;;  %v4266_v13 = vld [vmem:[%s7696_s1 + $0x2d4] sm:$0xf]  ;;  %v5326_v4 = vor.u32 %v4206_v54, %v3674_v32  ;;  %921 = vmatpush.bf16.msra.mxu1 %v5294_v31  ;;  %v5332_v63 = vor.u32 %v4202_v39, %v3676_v0  ;;  %947 = vmatpush.bf16.msra.mxu3 %v5308_v24 }
  0x54   :  { %8044 = vst [vmem:[#allocation83_spill] sm:$0xff] %v5308_v24  ;;  %v4270_v11 = vld [vmem:[%s7696_s1 + $0x2ec] sm:$0xf0]  ;;  %v3932_v15 = vld [vmem:[%s7696_s1 + $0x2f0] sm:$0xf0] }
  0x55   :  { %8045 = vst [vmem:[#allocation84_spill] sm:$0xff] %v5326_v4  ;;  %v5330_v10 = vor.u32 %v4270_v11, %v3930_v42  ;;  %v3642_v37 = vld [vmem:[%s7696_s1 + $0x90] sm:$0xf]  ;;  %v5344_v32 = vor.u32 %v4266_v13, %v3932_v15  ;;  %v4194_v11 = vld [vmem:[%s7696_s1 + $0x94] sm:$0xf]  ;;  %909 = vmatpush.bf16.msra.mxu0 %v5326_v4 }
  0x56   :  { %8047 = vst [vmem:[#allocation86_spill] sm:$0xff] %v5332_v63  ;;  %v4198_v22 = vld [vmem:[%s7696_s1 + $0xac] sm:$0xf0]  ;;  %v3644_v39 = vld [vmem:[%s7696_s1 + $0xb0] sm:$0xf0]  ;;  %935 = vmatpush.bf16.msra.mxu2 %v5332_v63 }
  0x57   :  { %8046 = vst [vmem:[#allocation85_spill] sm:$0xff] %v5330_v10  ;;  %v3898_v54 = vld [vmem:[%s7696_s1 + $0x290] sm:$0xf]  ;;  %v4258_v0 = vld [vmem:[%s7696_s1 + $0x294] sm:$0xf]  ;;  %v5362_v15 = vor.u32 %v4198_v22, %v3642_v37  ;;  %922 = vmatpush.bf16.msra.mxu1 %v5330_v10  ;;  %v5368_v31 = vor.u32 %v4194_v11, %v3644_v39  ;;  %948 = vmatpush.bf16.msra.mxu3 %v5344_v32 }
  0x58   :  { %8048 = vst [vmem:[#allocation87_spill] sm:$0xff] %v5344_v32  ;;  %v4262_v42 = vld [vmem:[%s7696_s1 + $0x2ac] sm:$0xf0]  ;;  %v3900_v13 = vld [vmem:[%s7696_s1 + $0x2b0] sm:$0xf0] }
  0x59   :  { %8049 = vst [vmem:[#allocation88_spill] sm:$0xff] %v5362_v15  ;;  %v5366_v24 = vor.u32 %v4262_v42, %v3898_v54  ;;  %v3610_v26 = vld [vmem:[%s7696_s1 + $0x50] sm:$0xf]  ;;  %v5380_v22 = vor.u32 %v4258_v0, %v3900_v13  ;;  %v4186_v42 = vld [vmem:[%s7696_s1 + $0x54] sm:$0xf]  ;;  %910 = vmatpush.bf16.msra.mxu0 %v5362_v15 }
  0x5a   :  { %8051 = vst [vmem:[#allocation90_spill] sm:$0xff] %v5368_v31  ;;  %v4190_v36 = vld [vmem:[%s7696_s1 + $0x6c] sm:$0xf0]  ;;  %v3612_v11 = vld [vmem:[%s7696_s1 + $0x70] sm:$0xf0]  ;;  %936 = vmatpush.bf16.msra.mxu2 %v5368_v31 }
  0x5b   :  { %8050 = vst [vmem:[#allocation89_spill] sm:$0xff] %v5366_v24  ;;  %v3866_v37 = vld [vmem:[%s7696_s1 + $0x250] sm:$0xf]  ;;  %v4250_v39 = vld [vmem:[%s7696_s1 + $0x254] sm:$0xf]  ;;  %v5398_v13 = vor.u32 %v4190_v36, %v3610_v26  ;;  %923 = vmatpush.bf16.msra.mxu1 %v5366_v24  ;;  %v5410_v4 = vor.u32 %v4186_v42, %v3612_v11  ;;  %949 = vmatpush.bf16.msra.mxu3 %v5380_v22 }
  0x5c   :  { %8052 = vst [vmem:[#allocation91_spill] sm:$0xff] %v5380_v22  ;;  %v4254_v54 = vld [vmem:[%s7696_s1 + $0x26c] sm:$0xf0]  ;;  %v3868_v0 = vld [vmem:[%s7696_s1 + $0x270] sm:$0xf0] }
  0x5d   :  { %8053 = vst [vmem:[#allocation92_spill] sm:$0xff] %v5398_v13  ;;  %v3578_v32 = vld [vmem:[%s7696_s1 + $0x10] sm:$0xf]  ;;  %v5408_v63 = vor.u32 %v4254_v54, %v3866_v37  ;;  %v4178_v15 = vld [vmem:[%s7696_s1 + $0x14] sm:$0xf]  ;;  %v5422_v24 = vor.u32 %v4250_v39, %v3868_v0  ;;  %911 = vmatpush.bf16.msra.mxu0 %v5398_v13 }
  0x5e   :  { %v4182_v10 = vld [vmem:[%s7696_s1 + $0x2c] sm:$0xf0]  ;;  %8055 = vst [vmem:[#allocation94_spill] sm:$0xff] %v5410_v4  ;;  %v3580_v37 = vld [vmem:[%s7696_s1 + $0x30] sm:$0xf0]  ;;  %937 = vmatpush.bf16.msra.mxu2 %v5410_v4 }
  0x5f   :  { %8054 = vst [vmem:[#allocation93_spill] sm:$0xff] %v5408_v63  ;;  %v3834_v26 = vld [vmem:[%s7696_s1 + $0x210] sm:$0xf]  ;;  %v4242_v54 = vld [vmem:[%s7696_s1 + $0x214] sm:$0xf]  ;;  %v5443_v22 = vor.u32 %v4182_v10, %v3578_v32  ;;  %924 = vmatpush.bf16.msra.mxu1 %v5408_v63  ;;  %v5458_v10 = vor.u32 %v4178_v15, %v3580_v37  ;;  %950 = vmatpush.bf16.msra.mxu3 %v5422_v24 }
  0x60   :  { %v4246_v36 = vld [vmem:[%s7696_s1 + $0x22c] sm:$0xf0]  ;;  %8056 = vst [vmem:[#allocation95_spill] sm:$0xff] %v5422_v24  ;;  %v3836_v42 = vld [vmem:[%s7696_s1 + $0x230] sm:$0xf0] }
  0x61   :  { %v3810_v11 = vld [vmem:[%s7696_s1 + $0x1d8] sm:$0xf]  ;;  %8057 = vst [vmem:[#allocation96_spill] sm:$0xff] %v5443_v22  ;;  %v4235_v53 = vld [vmem:[%s7696_s1 + $0x1dc] sm:$0xf]  ;;  %v5456_v1 = vor.u32 %v4246_v36, %v3834_v26  ;;  %v5467_v49 = vor.u32 %v4242_v54, %v3836_v42  ;;  %912 = vmatpush.bf16.msra.mxu0 %v5443_v22 }
  0x62   :  { %v4239_v39 = vld [vmem:[%s7696_s1 + $0x1f4] sm:$0xf0]  ;;  %v3812_v40 = vld [vmem:[%s7696_s1 + $0x1f8] sm:$0xf0]  ;;  %8059 = vst [vmem:[#allocation98_spill] sm:$0xff] %v5458_v10  ;;  %938 = vmatpush.bf16.msra.mxu2 %v5458_v10 }
  0x63   :  { %v4066_v0 = vld [vmem:[%s7696_s1 + $0x3d8] sm:$0xf]  ;;  %8058 = vst [vmem:[#allocation97_spill] sm:$0xff] %v5456_v1  ;;  %v4299_v32 = vld [vmem:[%s7696_s1 + $0x3dc] sm:$0xf]  ;;  %v5469_v47 = vor.u32 %v4239_v39, %v3810_v11  ;;  %v5473_v26 = vor.u32 %v4235_v53, %v3812_v40  ;;  %925 = vmatpush.bf16.msra.mxu1 %v5456_v1  ;;  %951 = vmatpush.bf16.msra.mxu3 %v5467_v49 }
  0x64   :  { %v4303_v31 = vld [vmem:[%s7696_s1 + $0x3f4] sm:$0xf0]  ;;  %v4068_v13 = vld [vmem:[%s7696_s1 + $0x3f8] sm:$0xf0]  ;;  %8060 = vst [vmem:[#allocation99_spill] sm:$0xff] %v5467_v49  ;;  %913 = vmatmul.bf16.vlgmr.msra.gmra.mxu0 %v8036_v48 }
  0x65   :  { %8061 = vst [vmem:[#allocation100_spill] sm:$0xff] %v5469_v47  ;;  %v5471_v63 = vor.u32 %v4303_v31, %v4066_v0  ;;  %v3778_v15 = vld [vmem:[%s7696_s1 + $0x198] sm:$0xf]  ;;  %v5485_v54 = vor.u32 %v4299_v32, %v4068_v13  ;;  %v4227_v53 = vld [vmem:[%s7696_s1 + $0x19c] sm:$0xf]  ;;  %957 = vmatpush.bf16.msrb.mxu0 %v5469_v47  ;;  %939 = vmatmul.bf16.vlgmr.msra.gmra.mxu2 %v8036_v48 }
  0x66   :  { %8063 = vst [vmem:[#allocation102_spill] sm:$0xff] %v5473_v26  ;;  %v4231_v36 = vld [vmem:[%s7696_s1 + $0x1b4] sm:$0xf0]  ;;  %v3780_v31 = vld [vmem:[%s7696_s1 + $0x1b8] sm:$0xf0]  ;;  %983 = vmatpush.bf16.msrb.mxu2 %v5473_v26  ;;  %926 = vmatmul.bf16.vlgmr.msra.gmra.mxu1 %v8036_v48 }
  0x67   :  { %8062 = vst [vmem:[#allocation101_spill] sm:$0xff] %v5471_v63  ;;  %v4034_v37 = vld [vmem:[%s7696_s1 + $0x398] sm:$0xf]  ;;  %v4291_v13 = vld [vmem:[%s7696_s1 + $0x39c] sm:$0xf]  ;;  %v5506_v11 = vor.u32 %v4231_v36, %v3778_v15  ;;  %970 = vmatpush.bf16.msrb.mxu1 %v5471_v63  ;;  %v5512_v0 = vor.u32 %v4227_v53, %v3780_v31  ;;  %996 = vmatpush.bf16.msrb.mxu3 %v5485_v54 }
  0x68   :  { %8064 = vst [vmem:[#allocation103_spill] sm:$0xff] %v5485_v54  ;;  %v4295_v40 = vld [vmem:[%s7696_s1 + $0x3b4] sm:$0xf0]  ;;  %v4036_v42 = vld [vmem:[%s7696_s1 + $0x3b8] sm:$0xf0]  ;;  %952 = vmatmul.bf16.vlgmr.msra.gmra.mxu3 %v8036_v48 }
  0x69   :  { %8065 = vst [vmem:[#allocation104_spill] sm:$0xff] %v5506_v11  ;;  %v5510_v39 = vor.u32 %v4295_v40, %v4034_v37  ;;  %v3746_v32 = vld [vmem:[%s7696_s1 + $0x158] sm:$0xf]  ;;  %v5525_v36 = vor.u32 %v4291_v13, %v4036_v42  ;;  %v4219_v40 = vld [vmem:[%s7696_s1 + $0x15c] sm:$0xf]  ;;  %958 = vmatpush.bf16.msrb.mxu0 %v5506_v11 }
  0x6a   :  { %8067 = vst [vmem:[#allocation106_spill] sm:$0xff] %v5512_v0  ;;  %v4223_v49 = vld [vmem:[%s7696_s1 + $0x174] sm:$0xf0]  ;;  %v3748_v53 = vld [vmem:[%s7696_s1 + $0x178] sm:$0xf0]  ;;  %984 = vmatpush.bf16.msrb.mxu2 %v5512_v0 }
  0x6b   :  { %8066 = vst [vmem:[#allocation105_spill] sm:$0xff] %v5510_v39  ;;  %v4002_v15 = vld [vmem:[%s7696_s1 + $0x358] sm:$0xf]  ;;  %v4283_v31 = vld [vmem:[%s7696_s1 + $0x35c] sm:$0xf]  ;;  %v5546_v42 = vor.u32 %v4223_v49, %v3746_v32  ;;  %971 = vmatpush.bf16.msrb.mxu1 %v5510_v39  ;;  %v5552_v63 = vor.u32 %v4219_v40, %v3748_v53  ;;  %997 = vmatpush.bf16.msrb.mxu3 %v5525_v36 }
  0x6c   :  { %8068 = vst [vmem:[#allocation107_spill] sm:$0xff] %v5525_v36  ;;  %v4287_v37 = vld [vmem:[%s7696_s1 + $0x374] sm:$0xf0]  ;;  %v4004_v13 = vld [vmem:[%s7696_s1 + $0x378] sm:$0xf0] }
  0x6d   :  { %8069 = vst [vmem:[#allocation108_spill] sm:$0xff] %v5546_v42  ;;  %v5550_v54 = vor.u32 %v4287_v37, %v4002_v15  ;;  %v3714_v1 = vld [vmem:[%s7696_s1 + $0x118] sm:$0xf]  ;;  %v5564_v32 = vor.u32 %v4283_v31, %v4004_v13  ;;  %v4211_v37 = vld [vmem:[%s7696_s1 + $0x11c] sm:$0xf]  ;;  %959 = vmatpush.bf16.msrb.mxu0 %v5546_v42 }
  0x6e   :  { %8071 = vst [vmem:[#allocation110_spill] sm:$0xff] %v5552_v63  ;;  %v4215_v24 = vld [vmem:[%s7696_s1 + $0x134] sm:$0xf0]  ;;  %v3716_v40 = vld [vmem:[%s7696_s1 + $0x138] sm:$0xf0]  ;;  %985 = vmatpush.bf16.msrb.mxu2 %v5552_v63 }
  0x6f   :  { %8070 = vst [vmem:[#allocation109_spill] sm:$0xff] %v5550_v54  ;;  %v3970_v49 = vld [vmem:[%s7696_s1 + $0x318] sm:$0xf]  ;;  %v4275_v53 = vld [vmem:[%s7696_s1 + $0x31c] sm:$0xf]  ;;  %v5582_v13 = vor.u32 %v4215_v24, %v3714_v1  ;;  %972 = vmatpush.bf16.msrb.mxu1 %v5550_v54  ;;  %v5588_v39 = vor.u32 %v4211_v37, %v3716_v40  ;;  %998 = vmatpush.bf16.msrb.mxu3 %v5564_v32 }
  0x70   :  { %8072 = vst [vmem:[#allocation111_spill] sm:$0xff] %v5564_v32  ;;  %v4279_v15 = vld [vmem:[%s7696_s1 + $0x334] sm:$0xf0]  ;;  %v3972_v31 = vld [vmem:[%s7696_s1 + $0x338] sm:$0xf0] }
  0x71   :  { %8073 = vst [vmem:[#allocation112_spill] sm:$0xff] %v5582_v13  ;;  %v5586_v36 = vor.u32 %v4279_v15, %v3970_v49  ;;  %v3682_v0 = vld [vmem:[%s7696_s1 + $0xd8] sm:$0xf]  ;;  %v5600_v24 = vor.u32 %v4275_v53, %v3972_v31  ;;  %v4203_v15 = vld [vmem:[%s7696_s1 + $0xdc] sm:$0xf]  ;;  %960 = vmatpush.bf16.msrb.mxu0 %v5582_v13 }
  0x72   :  { %8075 = vst [vmem:[#allocation114_spill] sm:$0xff] %v5588_v39  ;;  %v4207_v11 = vld [vmem:[%s7696_s1 + $0xf4] sm:$0xf0]  ;;  %v3684_v37 = vld [vmem:[%s7696_s1 + $0xf8] sm:$0xf0]  ;;  %986 = vmatpush.bf16.msrb.mxu2 %v5588_v39 }
  0x73   :  { %8074 = vst [vmem:[#allocation113_spill] sm:$0xff] %v5586_v36  ;;  %v3938_v1 = vld [vmem:[%s7696_s1 + $0x2d8] sm:$0xf]  ;;  %v4267_v40 = vld [vmem:[%s7696_s1 + $0x2dc] sm:$0xf]  ;;  %v5618_v31 = vor.u32 %v4207_v11, %v3682_v0  ;;  %973 = vmatpush.bf16.msrb.mxu1 %v5586_v36  ;;  %v5624_v54 = vor.u32 %v4203_v15, %v3684_v37  ;;  %999 = vmatpush.bf16.msrb.mxu3 %v5600_v24 }
  0x74   :  { %8076 = vst [vmem:[#allocation115_spill] sm:$0xff] %v5600_v24  ;;  %v4271_v49 = vld [vmem:[%s7696_s1 + $0x2f4] sm:$0xf0]  ;;  %v3940_v53 = vld [vmem:[%s7696_s1 + $0x2f8] sm:$0xf0] }
  0x75   :  { %8077 = vst [vmem:[#allocation116_spill] sm:$0xff] %v5618_v31  ;;  %v5622_v32 = vor.u32 %v4271_v49, %v3938_v1  ;;  %v3650_v63 = vld [vmem:[%s7696_s1 + $0x98] sm:$0xf]  ;;  %v5636_v0 = vor.u32 %v4267_v40, %v3940_v53  ;;  %v4195_v49 = vld [vmem:[%s7696_s1 + $0x9c] sm:$0xf]  ;;  %961 = vmatpush.bf16.msrb.mxu0 %v5618_v31 }
  0x76   :  { %8079 = vst [vmem:[#allocation118_spill] sm:$0xff] %v5624_v54  ;;  %v4199_v42 = vld [vmem:[%s7696_s1 + $0xb4] sm:$0xf0]  ;;  %v3652_v15 = vld [vmem:[%s7696_s1 + $0xb8] sm:$0xf0]  ;;  %987 = vmatpush.bf16.msrb.mxu2 %v5624_v54 }
  0x77   :  { %8078 = vst [vmem:[#allocation117_spill] sm:$0xff] %v5622_v32  ;;  %v3906_v11 = vld [vmem:[%s7696_s1 + $0x298] sm:$0xf]  ;;  %v4259_v37 = vld [vmem:[%s7696_s1 + $0x29c] sm:$0xf]  ;;  %v5654_v53 = vor.u32 %v4199_v42, %v3650_v63  ;;  %974 = vmatpush.bf16.msrb.mxu1 %v5622_v32  ;;  %v5660_v36 = vor.u32 %v4195_v49, %v3652_v15  ;;  %1000 = vmatpush.bf16.msrb.mxu3 %v5636_v0 }
  0x78   :  { %8080 = vst [vmem:[#allocation119_spill] sm:$0xff] %v5636_v0  ;;  %v4263_v1 = vld [vmem:[%s7696_s1 + $0x2b4] sm:$0xf0]  ;;  %v3908_v40 = vld [vmem:[%s7696_s1 + $0x2b8] sm:$0xf0] }
  0x79   :  { %8081 = vst [vmem:[#allocation120_spill] sm:$0xff] %v5654_v53  ;;  %v5658_v24 = vor.u32 %v4263_v1, %v3906_v11  ;;  %v3618_v39 = vld [vmem:[%s7696_s1 + $0x58] sm:$0xf]  ;;  %v5672_v42 = vor.u32 %v4259_v37, %v3908_v40  ;;  %v4187_v1 = vld [vmem:[%s7696_s1 + $0x5c] sm:$0xf]  ;;  %962 = vmatpush.bf16.msrb.mxu0 %v5654_v53 }
  0x7a   :  { %8083 = vst [vmem:[#allocation122_spill] sm:$0xff] %v5660_v36  ;;  %v4191_v13 = vld [vmem:[%s7696_s1 + $0x74] sm:$0xf0]  ;;  %v3620_v49 = vld [vmem:[%s7696_s1 + $0x78] sm:$0xf0]  ;;  %988 = vmatpush.bf16.msrb.mxu2 %v5660_v36 }
  0x7b   :  { %8082 = vst [vmem:[#allocation121_spill] sm:$0xff] %v5658_v24  ;;  %v3874_v63 = vld [vmem:[%s7696_s1 + $0x258] sm:$0xf]  ;;  %v4251_v15 = vld [vmem:[%s7696_s1 + $0x25c] sm:$0xf]  ;;  %v5690_v40 = vor.u32 %v4191_v13, %v3618_v39  ;;  %975 = vmatpush.bf16.msrb.mxu1 %v5658_v24  ;;  %v5696_v32 = vor.u32 %v4187_v1, %v3620_v49  ;;  %1001 = vmatpush.bf16.msrb.mxu3 %v5672_v42 }
  0x7c   :  { %8084 = vst [vmem:[#allocation123_spill] sm:$0xff] %v5672_v42  ;;  %v4255_v11 = vld [vmem:[%s7696_s1 + $0x274] sm:$0xf0]  ;;  %v3876_v37 = vld [vmem:[%s7696_s1 + $0x278] sm:$0xf0] }
  0x7d   :  { %8085 = vst [vmem:[#allocation124_spill] sm:$0xff] %v5690_v40  ;;  %v5694_v0 = vor.u32 %v4255_v11, %v3874_v63  ;;  %v3586_v54 = vld [vmem:[%s7696_s1 + $0x18] sm:$0xf]  ;;  %v5708_v13 = vor.u32 %v4251_v15, %v3876_v37  ;;  %v4179_v11 = vld [vmem:[%s7696_s1 + $0x1c] sm:$0xf]  ;;  %963 = vmatpush.bf16.msrb.mxu0 %v5690_v40 }
  0x7e   :  { %8087 = vst [vmem:[#allocation126_spill] sm:$0xff] %v5696_v32  ;;  %v4183_v31 = vld [vmem:[%s7696_s1 + $0x34] sm:$0xf0]  ;;  %v3588_v1 = vld [vmem:[%s7696_s1 + $0x38] sm:$0xf0]  ;;  %989 = vmatpush.bf16.msrb.mxu2 %v5696_v32 }
  0x7f   :  { %8086 = vst [vmem:[#allocation125_spill] sm:$0xff] %v5694_v0  ;;  %v3842_v39 = vld [vmem:[%s7696_s1 + $0x218] sm:$0xf]  ;;  %v4243_v49 = vld [vmem:[%s7696_s1 + $0x21c] sm:$0xf]  ;;  %v5726_v37 = vor.u32 %v4183_v31, %v3586_v54  ;;  %976 = vmatpush.bf16.msrb.mxu1 %v5694_v0  ;;  %v5732_v24 = vor.u32 %v4179_v11, %v3588_v1  ;;  %1002 = vmatpush.bf16.msrb.mxu3 %v5708_v13  ;;  %v8093_v31 = vld [vmem:[#allocation46_spill] sm:$0xff] }
  0x80   :  { %8088 = vst [vmem:[#allocation127_spill] sm:$0xff] %v5708_v13  ;;  %v4247_v63 = vld [vmem:[%s7696_s1 + $0x234] sm:$0xf0]  ;;  %v3844_v15 = vld [vmem:[%s7696_s1 + $0x238] sm:$0xf0]  ;;  %v8094_v11 = vld [vmem:[#allocation45_spill] sm:$0xff] }
  0x81   :  { %8089 = vst [vmem:[#allocation128_spill] sm:$0xff] %v5726_v37  ;;  %v5730_v42 = vor.u32 %v4247_v63, %v3842_v39  ;;  %v5735_v36 = vor.u32 %v4243_v49, %v3844_v15  ;;  %964 = vmatpush.bf16.msrb.mxu0 %v5726_v37  ;;  %v154_v49 = vld [vmem:[%s7697_s0 + $0x8] sm:$0xff]  ;;  %v8095_v15 = vld [vmem:[#allocation48_spill] sm:$0xff] }
  0x82   :  { %8091 = vst [vmem:[#allocation130_spill] sm:$0xff] %v5732_v24  ;;  %990 = vmatpush.bf16.msrb.mxu2 %v5732_v24 }
  0x83   :  { %8090 = vst [vmem:[#allocation129_spill] sm:$0xff] %v5730_v42  ;;  %977 = vmatpush.bf16.msrb.mxu1 %v5730_v42  ;;  %1003 = vmatpush.bf16.msrb.mxu3 %v5735_v36 }
  0x84   :  { %8092 = vst [vmem:[#allocation131_spill] sm:$0xff] %v5735_v36  ;;  %965 = vmatmul.bf16.vlgmr.msrb.gmra.mxu0 %v8036_v48 }
  0x85   :  { %1146 = vmatpush.bf16.msra.mxu0 %v4586_v3  ;;  %991 = vmatmul.bf16.vlgmr.msrb.gmra.mxu2 %v8036_v48 }
  0x86   :  { %1172 = vmatpush.bf16.msra.mxu2 %v4599_v8  ;;  %978 = vmatmul.bf16.vlgmr.msrb.gmra.mxu1 %v8036_v48 }
  0x87   :  { %1004 = vmatmul.bf16.vlgmr.msrb.gmra.mxu3 %v8036_v48  ;;  %1159 = vmatpush.bf16.msra.mxu1 %v4597_v7  ;;  %v153_v48 = vld [vmem:[%s7697_s0] sm:$0xff] }
  0x88   :  { %1185 = vmatpush.bf16.msra.mxu3 %v4611_v12 }
  0x89   :  { %1147 = vmatpush.bf16.msra.mxu0 %v4624_v16 }
  0x8a   :  { %1173 = vmatpush.bf16.msra.mxu2 %v4638_v21 }
  0x8b   :  { %1160 = vmatpush.bf16.msra.mxu1 %v4626_v17 }
  0x8c   :  { %1186 = vmatpush.bf16.msra.mxu3 %v4649_v25 }
  0x8d   :  { %1148 = vmatpush.bf16.msra.mxu0 %v4661_v29 }
  0x8e   :  { %1174 = vmatpush.bf16.msra.mxu2 %v4676_v34 }
  0x8f   :  { %1161 = vmatpush.bf16.msra.mxu1 %v4674_v33 }
  0x90   :  { %1187 = vmatpush.bf16.msra.mxu3 %v4688_v38 }
  0x91   :  { %1149 = vmatpush.bf16.msra.mxu0 %v4706_v44 }
  0x92   :  { %1175 = vmatpush.bf16.msra.mxu2 %v4712_v46 }
  0x93   :  { %1162 = vmatpush.bf16.msra.mxu1 %v4710_v45 }
  0x94   :  { %1188 = vmatpush.bf16.msra.mxu3 %v4724_v50 }
  0x95   :  { %1150 = vmatpush.bf16.msra.mxu0 %v4742_v56 }
  0x96   :  { %1176 = vmatpush.bf16.msra.mxu2 %v4748_v58 }
  0x97   :  { %1163 = vmatpush.bf16.msra.mxu1 %v4746_v57 }
  0x98   :  { %1189 = vmatpush.bf16.msra.mxu3 %v4760_v62 }
  0x99   :  { %1151 = vmatpush.bf16.msra.mxu0 %v4778_v5 }
  0x9a   :  { %1177 = vmatpush.bf16.msra.mxu2 %v4784_v9 }
  0x9b   :  { %1164 = vmatpush.bf16.msra.mxu1 %v4782_v6 }
  0x9c   :  { %1190 = vmatpush.bf16.msra.mxu3 %v4796_v14 }
  0x9d   :  { %1152 = vmatpush.bf16.msra.mxu0 %v4814_v23 }
  0x9e   :  { %1178 = vmatpush.bf16.msra.mxu2 %v4826_v28  ;;  %v158_v28 = vld [vmem:[%s7697_s0 + $0x28] sm:$0xff] }
  0x9f   :  { %1165 = vmatpush.bf16.msra.mxu1 %v4824_v27 }
  0xa0   :  { %1191 = vmatpush.bf16.msra.mxu3 %v4838_v35 }
  0xa1   :  { %1153 = vmatpush.bf16.msra.mxu0 %v4859_v43  ;;  %v810_v54 = vpop.f32.mrf.mxu0 }
  0xa2   :  { %1179 = vmatpush.bf16.msra.mxu2 %v4874_v52  ;;  %v811_v39 = vadd.f32 %v810_v54, %v153_v48  ;;  %v8099_v48 = vld [vmem:[#allocation52_spill] sm:$0xff]  ;;  %v8100_v54 = vld [vmem:[#allocation51_spill] sm:$0xff] }
  0xa3   :  { %1166 = vmatpush.bf16.msra.mxu1 %v4872_v51  ;;  %v823_v63 = vpop.f32.mrf.mxu1  ;;  %v8102_v51 = vld [vmem:[#allocation53_spill] sm:$0xff] }
  0xa4   :  { %1192 = vmatpush.bf16.msra.mxu3 %v4883_v55  ;;  %v824_v1 = vadd.f32 %v823_v63, %v811_v39  ;;  %v8098_v55 = vld [vmem:[#allocation49_spill] sm:$0xff] }
  0xa5   :  { %1198 = vmatpush.bf16.msrb.mxu0 %v4885_v59 }
  0xa6   :  { %1224 = vmatpush.bf16.msrb.mxu2 %v4889_v61 }
  0xa7   :  { %1211 = vmatpush.bf16.msrb.mxu1 %v4887_v60 }
  0xa8   :  { %1237 = vmatpush.bf16.msrb.mxu3 %v4901_v2  ;;  %v8096_v2 = vld [vmem:[#allocation47_spill] sm:$0xff] }
  0xa9   :  { %1199 = vmatpush.bf16.msrb.mxu0 %v4922_v18  ;;  %v849_v60 = vpop.f32.mrf.mxu3  ;;  %v812_v63 = vpop.f32.mrf.mxu0  ;;  %v4072_v18 = vmul.f32 -1.442695, %v824_v1 }
  0xaa   :  { %1225 = vmatpush.bf16.msrb.mxu2 %v4928_v20  ;;  %v8112_v63 = vld [vmem:[#allocation63_spill] sm:$0xff] }
  0xab   :  { %1212 = vmatpush.bf16.msrb.mxu1 %v4926_v19  ;;  %v8097_v19 = vld [vmem:[#allocation50_spill] sm:$0xff] }
  0xac   :  { %1238 = vmatpush.bf16.msrb.mxu3 %v4940_v30 }
  0xad   :  { %1200 = vmatpush.bf16.msrb.mxu0 %v4961_v41  ;;  %v836_v41 = vpop.f32.mrf.mxu2 }
  0xae   :  { %1226 = vmatpush.bf16.msrb.mxu2 %v8093_v31  ;;  %v837_v30 = vadd.f32 %v836_v41, %v154_v49  ;;  %v825_v31 = vpop.f32.mrf.mxu1 }
  0xaf   :  { %1213 = vmatpush.bf16.msrb.mxu1 %v8094_v11  ;;  %v8101_v11 = vld [vmem:[#allocation54_spill] sm:$0xff]  ;;  %v8111_v31 = vld [vmem:[#allocation64_spill] sm:$0xff] }
  0xb0   :  { %1239 = vmatpush.bf16.msrb.mxu3 %v8096_v2  ;;  %v850_v39 = vadd.f32 %v849_v60, %v837_v30  ;;  %v8104_v2 = vld [vmem:[#allocation55_spill] sm:$0xff]  ;;  %v8109_v60 = vld [vmem:[#allocation62_spill] sm:$0xff]  ;;  %v8110_v30 = vld [vmem:[#allocation61_spill] sm:$0xff] }
  0xb1   :  { %1201 = vmatpush.bf16.msrb.mxu0 %v8095_v15  ;;  %v8103_v15 = vld [vmem:[#allocation56_spill] sm:$0xff]  ;;  %v851_v49 = vpop.f32.mrf.mxu3 }
  0xb2   :  { %1227 = vmatpush.bf16.msrb.mxu2 %v8097_v19  ;;  %v8105_v19 = vld [vmem:[#allocation58_spill] sm:$0xff] }
  0xb3   :  { %1214 = vmatpush.bf16.msrb.mxu1 %v8098_v55  ;;  %v8106_v55 = vld [vmem:[#allocation57_spill] sm:$0xff] }
  0xb4   :  { %1240 = vmatpush.bf16.msrb.mxu3 %v8100_v54  ;;  %v8108_v54 = vld [vmem:[#allocation59_spill] sm:$0xff] }
  0xb5   :  { %1202 = vmatpush.bf16.msrb.mxu0 %v8099_v48  ;;  %v838_v41 = vpop.f32.mrf.mxu2  ;;  %v8107_v48 = vld [vmem:[#allocation60_spill] sm:$0xff] }
  0xb6   :  { %1228 = vmatpush.bf16.msrb.mxu2 %v8101_v11  ;;  %v8115_v41 = vld [vmem:[#allocation67_spill] sm:$0xff] }
  0xb7   :  { %1215 = vmatpush.bf16.msrb.mxu1 %v8102_v51  ;;  %v8113_v51 = vld [vmem:[#allocation66_spill] sm:$0xff] }
  0xb8   :  { %1241 = vmatpush.bf16.msrb.mxu3 %v8104_v2  ;;  %v8114_v2 = vld [vmem:[#allocation65_spill] sm:$0xff] }
  0xb9   :  { %1203 = vmatpush.bf16.msrb.mxu0 %v8103_v15 }
  0xba   :  { %1229 = vmatpush.bf16.msrb.mxu2 %v8105_v19 }
  0xbb   :  { %1216 = vmatpush.bf16.msrb.mxu1 %v8106_v55 }
  0xbc   :  { %1242 = vmatpush.bf16.msrb.mxu3 %v8108_v54 }
  0xbd   :  { %1204 = vmatpush.bf16.msrb.mxu0 %v8107_v48 }
  0xbe   :  { %1230 = vmatpush.bf16.msrb.mxu2 %v8109_v60 }
  0xbf   :  { %1217 = vmatpush.bf16.msrb.mxu1 %v8110_v30  ;;  %v155_v30 = vld [vmem:[%s7697_s0 + $0x10] sm:$0xff] }
  0xc0   :  { %1243 = vmatpush.bf16.msrb.mxu3 %v8112_v63 }
  0xc1   :  { %1205 = vmatpush.bf16.msrb.mxu0 %v8111_v31 }
  0xc2   :  { %1231 = vmatpush.bf16.msrb.mxu2 %v8113_v51 }
  0xc3   :  { %1218 = vmatpush.bf16.msrb.mxu1 %v8114_v2  ;;  %v156_v2 = vld [vmem:[%s7697_s0 + $0x18] sm:$0xff] }
  0xc4   :  { %1244 = vmatpush.bf16.msrb.mxu3 %v8115_v41 }
  0xc5   :  { %v862_v49 = vpop.f32.mrf.mxu0 }
  0xc6   :  { %v875_v55 = vpop.f32.mrf.mxu1  ;;  %v863_v31 = vadd.f32 %v862_v49, %v155_v30 }
  0xc8   :  { %v876_v63 = vadd.f32 %v875_v55, %v863_v31 }
  0xca   :  { %v4074_v41 = vmul.f32 -1.442695, %v876_v63 }
  0xcb   :  { %v888_v19 = vpop.f32.mrf.mxu2 }
  0xcc   :  { %v889_v51 = vadd.f32 %v888_v19, %v156_v2  ;;  %4305 = vpow2.f32 %v4074_v41 }
  0xcd   :  { %v901_v48 = vpop.f32.mrf.mxu3  ;;  %v864_v15 = vpop.f32.mrf.mxu0  ;;  %4307 = vpow2.f32 %v4072_v18 }
  0xce   :  { %v877_v54 = vpop.f32.mrf.mxu1  ;;  %v902_v27 = vadd.f32 %v901_v48, %v889_v51 }
  0xcf   :  { %v4073_v54 = vmul.f32 -1.442695, %v850_v39 }
  0xd2   :  { %v4306_v30 = vpop.eup %4305 }
  0xd3   :  { %v890_v11 = vpop.f32.mrf.mxu2  ;;  %v4308_v31 = vpop.eup %4307  ;;  %v5823_v49 = vadd.f32 1.0, %v4306_v30 }
  0xd4   :  { %v4075_v11 = vmul.f32 -1.442695, %v902_v27  ;;  %v1015_v2 = vadd.f32 1.0, %v4308_v31 }
  0xd5   :  { %v903_v60 = vpop.f32.mrf.mxu3  ;;  %vm1060_vm1 = vweird.f32 %v5823_v49 }
  0xd6   :  { %4309 = vpow2.f32 %v4075_v11  ;;  %v157_v11 = vld [vmem:[%s7697_s0 + $0x20] sm:$0xff]  ;;  %v1028_v6 = vand.u32 2147483648, %v1015_v2  ;;  %vm1022_vm0 = vweird.f32 %v1015_v2 }
  0xd7   :  { %4311 = vpow2.f32 %v4073_v54  ;;  %v159_v54 = vld [vmem:[%s7697_s0 + $0x30] sm:$0xff] }
  0xd8   :  { %4313 = vrcp.f32 %v5823_v49 }
  0xd9   :  { %4315 = vrcp.f32 %v1015_v2 }
  0xdc   :  { %v4310_v1 = vpop.eup %4309 }
  0xdd   :  { %v4312_v18 = vpop.eup %4311  ;;  %v5826_v27 = vadd.f32 1.0, %v4310_v1 }
  0xde   :  { %v5828_v48 = vadd.f32 1.0, %v4312_v18 }
  0xdf   :  { %4317 = vrcp.f32 %v5826_v27  ;;  %vm1075_vm9 = vweird.f32 %v5826_v27 }
  0xe0   :  { %4319 = vrcp.f32 %v5828_v48  ;;  %vm1037_vm8 = vweird.f32 %v5828_v48 }
  0xe1   :  { %v914_v20 = vpop.f32.mrf.mxu0 }
  0xe3   :  { %v927_v35 = vpop.f32.mrf.mxu1 }
  0xe8   :  { %v940_v15 = vpop.f32.mrf.mxu2 }
  0xe9   :  { %v916_v61 = vpop.f32.mrf.mxu0 }
  0xea   :  { %v5830_v61 = vpop.eup %4313 }
  0xeb   :  { %v5821_v60 = vpop.f32.mrf.mxu3  ;;  %v929_v55 = vpop.f32.mrf.mxu1  ;;  %v1056_v63 = vmul.f32 %v5830_v61, %v5823_v49  ;;  %vm1061_vm2 = vweird.f32 %v5830_v61 }
  0xec   :  { %v5833_v39 = vpop.eup %4315  ;;  %vm5869_vm4 = vmor %vm1060_vm1, %vm1061_vm2 }
  0xed   :  { %v1018_v41 = vmul.f32 %v5833_v39, %v1015_v2  ;;  %v5845_v30 = vpop.eup %4317  ;;  %v1057_v55 = vsub.f32 1.0, %v1056_v63  ;;  %vm1023_vm3 = vweird.f32 %v5833_v39 }
  0xee   :  { %v5847_v18 = vpop.eup %4319  ;;  %v1071_v52 = vmul.f32 %v5845_v30, %v5826_v27  ;;  %vm5878_vm5 = vmor %vm1022_vm0, %vm1023_vm3  ;;  %vm1076_vm11 = vweird.f32 %v5845_v30 }
  0xef   :  { %v1019_v59 = vsub.f32 1.0, %v1018_v41  ;;  %v1058_v14 = vmul.f32 %v5830_v61, %v1057_v55  ;;  %v1033_v63 = vmul.f32 %v5847_v18, %v5828_v48  ;;  %v160_v41 = vld [vmem:[%s7697_s0 + $0x38] sm:$0xff]  ;;  %v1026_v55 = vand.u32 2147483647, %v1015_v2  ;;  %vm5904_vm12 = vmor %vm1075_vm9, %vm1076_vm11 }
  0xf0   :  { %v942_v19 = vpop.f32.mrf.mxu2  ;;  %vm1038_vm10 = vweird.f32 %v5847_v18 }
  0xf1   :  { %v915_v19 = vadd.f32 %v914_v20, %v157_v11  ;;  %v1034_v9 = vsub.f32 1.0, %v1033_v63  ;;  %vm5882_vm6 = vcmp.eq.f32.partialorder %v1026_v55, 8.507059e+37  ;;  %vm1039_vm13 = vmor %vm1037_vm8, %vm1038_vm10 }
  0xf3   :  { %v955_v51 = vpop.f32.mrf.mxu3  ;;  %v928_v20 = vadd.f32 %v927_v35, %v915_v19  ;;  %v1059_v35 = vadd.f32 %v5830_v61, %v1058_v14  ;;  %v1035_v2 = vmul.f32 %v5847_v18, %v1034_v9 }
 0x101   :  { %v966_v31 = vpop.f32.mrf.mxu0 }
 0x102   :  { %v967_v1 = vadd.f32 %v966_v31, %v159_v54  ;;  %v1020_v54 = vmul.f32 %v5833_v39, %v1019_v59  ;;  %v1066_v31 = vand.u32 2147483648, %v5823_v49 }
 0x103   :  { %v979_v51 = vpop.f32.mrf.mxu1 }
 0x104   :  { %v980_v43 = vadd.f32 %v979_v51, %v967_v1  ;;  %v1072_v1 = vsub.f32 1.0, %v1071_v52  ;;  %v941_v51 = vadd.f32 %v940_v15, %v158_v28  ;;  %v1021_v52 = vadd.f32 %v5833_v39, %v1020_v54 }
 0x105   :  { %v1029_v15 = vor.u32 1.1754944e-38, %v1028_v6  ;;  %v1067_v5 = vor.u32 1.1754944e-38, %v1066_v31  ;;  %v1079_v31 = vand.u32 2147483647, %v5826_v27 }
 0x106   :  { %v4076_v11 = vmul.f32 -1.442695, %v980_v43  ;;  %v1064_v43 = vand.u32 2147483647, %v5823_v49  ;;  %v1073_v14 = vmul.f32 %v5845_v30, %v1072_v1  ;;  %v954_v49 = vadd.f32 %v5821_v60, %v941_v51 }
 0x107   :  { %v1025_v60 = vsel %vm5878_vm5, %v5833_v39, %v1021_v52  ;;  %v1043_v1 = vand.u32 2147483648, %v5828_v48  ;;  %vm1080_vm14 = vcmp.eq.f32.partialorder %v1079_v31, 8.507059e+37 }
 0x108   :  { %4321 = vpow2.f32 %v4076_v11  ;;  %v992_v23 = vpop.f32.mrf.mxu2  ;;  %vm1065_vm7 = vcmp.eq.f32.partialorder %v1064_v43, 8.507059e+37  ;;  %v1074_v55 = vadd.f32 %v5845_v30, %v1073_v14  ;;  %v1041_v43 = vand.u32 2147483647, %v5828_v48 }
 0x109   :  { %v993_v19 = vadd.f32 %v992_v23, %v160_v41  ;;  %v968_v57 = vpop.f32.mrf.mxu0  ;;  %4323 = vtanh.f32 %v928_v20  ;;  %v1081_v20 = vand.u32 2147483648, %v5826_v27 }
 0x10a   :  { %v1005_v62 = vpop.f32.mrf.mxu3  ;;  %v1078_v27 = vsel %vm5904_vm12, %v5845_v30, %v1074_v55  ;;  %vm1042_vm15 = vcmp.eq.f32.partialorder %v1041_v43, 8.507059e+37 }
 0x10b   :  { %v981_v28 = vpop.f32.mrf.mxu1  ;;  %v1006_v11 = vadd.f32 %v1005_v62, %v993_v19  ;;  %v1063_v62 = vsel %vm5869_vm4, %v5830_v61, %v1059_v35  ;;  %v1030_v35 = vsel %vm5882_vm6, %v1029_v15, %v1025_v60  ;;  %v1082_v19 = vor.u32 1.1754944e-38, %v1081_v20 }
 0x10c   :  { %v1068_v54 = vsel %vm1065_vm7, %v1067_v5, %v1063_v62  ;;  %v1036_v5 = vadd.f32 %v5847_v18, %v1035_v2 }
 0x10d   :  { %v4077_v6 = vmul.f32 -1.442695, %v1006_v11  ;;  %v1125_v59 = vmul.f32 0.0, %v1068_v54  ;;  %v1044_v11 = vor.u32 1.1754944e-38, %v1043_v1  ;;  %v1083_v62 = vsel %vm1080_vm14, %v1082_v19, %v1078_v27 }
 0x10e   :  { %v4322_v63 = vpop.eup %4321  ;;  %v1040_v14 = vsel %vm1039_vm13, %v5847_v18, %v1036_v5 }
 0x10f   :  { %v1093_v61 = vadd.f32 1.0, %v4322_v63  ;;  %4325 = vpow2.f32 %v4077_v6  ;;  %v4324_v41 = vpop.eup %4323  ;;  %v1045_v48 = vsel %vm1042_vm15, %v1044_v11, %v1040_v14  ;;  %v1126_v63 = vmul.f32 0.0, %v1083_v62  ;;  %v8124_v11 = vld [vmem:[#allocation68_spill] sm:$0xff] }
 0x110   :  { %4327 = vtanh.f32 %v954_v49  ;;  %v994_v9 = vpop.f32.mrf.mxu2  ;;  %v1127_v28 = vmul.f32 %v4324_v41, %v1030_v35 }
 0x111   :  { %4329 = vrcp.f32 %v1093_v61  ;;  %v1106_v30 = vand.u32 2147483648, %v1093_v61  ;;  %v1104_v41 = vand.u32 2147483647, %v1093_v61  ;;  %vm1100_vm1 = vweird.f32 %v1093_v61 }
 0x112   :  { %v1007_v39 = vpop.f32.mrf.mxu3  ;;  %v5920_v49 = vadd.f32 %v1127_v28, %v1125_v59 }
 0x113   :  { %v1107_v31 = vor.u32 1.1754944e-38, %v1106_v30  ;;  %vm1105_vm3 = vcmp.eq.f32.partialorder %v1104_v41, 8.507059e+37  ;;  %v8131_v30 = vld [vmem:[#allocation78_spill] sm:$0xff]  ;;  %v8133_v41 = vld [vmem:[#allocation75_spill] sm:$0xff] }
 0x115   :  { %v4326_v52 = vpop.eup %4325 }
 0x116   :  { %v4328_v15 = vpop.eup %4327  ;;  %v1094_v57 = vadd.f32 1.0, %v4326_v52 }
 0x117   :  { %v4330_v23 = vpop.eup %4329  ;;  %v1128_v2 = vmul.f32 %v4328_v15, %v1045_v48  ;;  %v8125_v15 = vld [vmem:[#allocation70_spill] sm:$0xff]  ;;  %v8126_v48 = vld [vmem:[#allocation72_spill] sm:$0xff] }
 0x118   :  { %v1096_v6 = vmul.f32 %v4330_v23, %v1093_v61  ;;  %4331 = vrcp.f32 %v1094_v57  ;;  %vm1101_vm0 = vweird.f32 %v4330_v23  ;;  %v1121_v43 = vand.u32 2147483648, %v1094_v57 }
 0x119   :  { %4333 = vtanh.f32 %v5920_v49  ;;  %v5923_v18 = vadd.f32 %v1128_v2, %v1126_v63  ;;  %vm1102_vm2 = vmor %vm1100_vm1, %vm1101_vm0  ;;  %v1119_v59 = vand.u32 2147483647, %v1094_v57  ;;  %vm1115_vm5 = vweird.f32 %v1094_v57  ;;  %v8128_v63 = vld [vmem:[#allocation69_spill] sm:$0xff]  ;;  %v8129_v2 = vld [vmem:[#allocation71_spill] sm:$0xff] }
 0x11a   :  { %v1097_v20 = vsub.f32 1.0, %v1096_v6  ;;  %v1122_v61 = vor.u32 1.1754944e-38, %v1121_v43  ;;  %v8143_v43 = vld [vmem:[#allocation90_spill] sm:$0xff] }
 0x11b   :  { %4335 = vtanh.f32 %v5923_v18  ;;  %vm1120_vm7 = vcmp.eq.f32.partialorder %v1119_v59, 8.507059e+37  ;;  %v8145_v59 = vld [vmem:[#allocation87_spill] sm:$0xff] }
 0x11c   :  { %v1098_v60 = vmul.f32 %v4330_v23, %v1097_v20  ;;  %v8130_v20 = vld [vmem:[#allocation76_spill] sm:$0xff] }
 0x11e   :  { %v4332_v54 = vpop.eup %4331  ;;  %v1099_v55 = vadd.f32 %v4330_v23, %v1098_v60  ;;  %v8132_v60 = vld [vmem:[#allocation73_spill] sm:$0xff] }
 0x11f   :  { %v1111_v9 = vmul.f32 %v4332_v54, %v1094_v57  ;;  %v4334_v51 = vpop.eup %4333  ;;  %vm1116_vm4 = vweird.f32 %v4332_v54  ;;  %v8127_v57 = vld [vmem:[#allocation74_spill] sm:$0xff] }
 0x120   :  { %v1103_v1 = vsel %vm1102_vm2, %v4330_v23, %v1099_v55  ;;  %vm1117_vm6 = vmor %vm1115_vm5, %vm1116_vm4  ;;  %v8135_v55 = vld [vmem:[#allocation82_spill] sm:$0xff] }
 0x121   :  { %v1108_v39 = vsel %vm1105_vm3, %v1107_v31, %v1103_v1  ;;  %v1112_v35 = vsub.f32 1.0, %v1111_v9  ;;  %v4336_v14 = vpop.eup %4335  ;;  %v8136_v31 = vld [vmem:[#allocation77_spill] sm:$0xff]  ;;  %v8137_v9 = vld [vmem:[#allocation79_spill] sm:$0xff]  ;;  %v8138_v1 = vld [vmem:[#allocation84_spill] sm:$0xff] }
 0x122   :  { %v1133_v5 = vmul.f32 %v4334_v51, %v1108_v39  ;;  %v8139_v51 = vld [vmem:[#allocation86_spill] sm:$0xff]  ;;  %v8140_v39 = vld [vmem:[#allocation81_spill] sm:$0xff] }
 0x123   :  { %v1113_v19 = vmul.f32 %v4332_v54, %v1112_v35  ;;  %v8141_v35 = vld [vmem:[#allocation83_spill] sm:$0xff] }
 0x124   :  { %v5926_v28 = vpack.c.bf16 %v1133_v5, %v1133_v5  ;;  %v8142_v5 = vld [vmem:[#allocation88_spill] sm:$0xff] }
 0x125   :  { %v1114_v27 = vadd.f32 %v4332_v54, %v1113_v19  ;;  %v8144_v19 = vld [vmem:[#allocation85_spill] sm:$0xff] }
 0x126   :  { %1154 = vmatmul.bf16.vlgmr.msra.gmra.mxu0 %v5926_v28  ;;  %1180 = vmatmul.bf16.vlgmr.msra.gmra.mxu2 %v5926_v28 }
 0x127   :  { %v1118_v52 = vsel %vm1117_vm6, %v4332_v54, %v1114_v27  ;;  %1250 = vmatpush.bf16.msra.mxu0 %v8124_v11  ;;  %1276 = vmatpush.bf16.msra.mxu2 %v8125_v15  ;;  %v8134_v54 = vld [vmem:[#allocation80_spill] sm:$0xff] }
 0x128   :  { %v1123_v23 = vsel %vm1120_vm7, %v1122_v61, %v1118_v52  ;;  %v8146_v27 = vld [vmem:[#allocation92_spill] sm:$0xff]  ;;  %v8147_v61 = vld [vmem:[#allocation89_spill] sm:$0xff]  ;;  %v8148_v52 = vld [vmem:[#allocation91_spill] sm:$0xff] }
 0x129   :  { %v1134_v62 = vmul.f32 %v4336_v14, %v1123_v23  ;;  %v8149_v14 = vld [vmem:[#allocation93_spill] sm:$0xff]  ;;  %v8150_v23 = vld [vmem:[#allocation95_spill] sm:$0xff] }
 0x12b   :  { %v5932_v6 = vpack.c.bf16 %v1134_v62, %v1134_v62  ;;  %1251 = vmatpush.bf16.msra.mxu0 %v8126_v48  ;;  %1277 = vmatpush.bf16.msra.mxu2 %v8127_v57  ;;  %v8151_v62 = vld [vmem:[#allocation104_spill] sm:$0xff] }
 0x12d   :  { %1167 = vmatmul.bf16.vlgmr.msra.gmra.mxu1 %v5932_v6  ;;  %1193 = vmatmul.bf16.vlgmr.msra.gmra.mxu3 %v5932_v6 }
 0x12e   :  { %1263 = vmatpush.bf16.msra.mxu1 %v8128_v63  ;;  %1289 = vmatpush.bf16.msra.mxu3 %v8129_v2 }
 0x12f   :  { %1252 = vmatpush.bf16.msra.mxu0 %v8130_v20  ;;  %1278 = vmatpush.bf16.msra.mxu2 %v8131_v30 }
 0x132   :  { %1264 = vmatpush.bf16.msra.mxu1 %v8132_v60  ;;  %1290 = vmatpush.bf16.msra.mxu3 %v8133_v41 }
 0x133   :  { %1253 = vmatpush.bf16.msra.mxu0 %v8134_v54  ;;  %1279 = vmatpush.bf16.msra.mxu2 %v8135_v55 }
 0x136   :  { %1265 = vmatpush.bf16.msra.mxu1 %v8136_v31  ;;  %1291 = vmatpush.bf16.msra.mxu3 %v8137_v9 }
 0x137   :  { %1206 = vmatmul.bf16.vlgmr.msrb.gmra.mxu0 %v5926_v28  ;;  %1232 = vmatmul.bf16.vlgmr.msrb.gmra.mxu2 %v5926_v28 }
 0x138   :  { %1254 = vmatpush.bf16.msra.mxu0 %v8138_v1  ;;  %1280 = vmatpush.bf16.msra.mxu2 %v8139_v51 }
 0x13a   :  { %1266 = vmatpush.bf16.msra.mxu1 %v8140_v39  ;;  %1292 = vmatpush.bf16.msra.mxu3 %v8141_v35 }
 0x13c   :  { %1255 = vmatpush.bf16.msra.mxu0 %v8142_v5  ;;  %1281 = vmatpush.bf16.msra.mxu2 %v8143_v43 }
 0x13d   :  { %1219 = vmatmul.bf16.vlgmr.msrb.gmra.mxu1 %v5932_v6  ;;  %1245 = vmatmul.bf16.vlgmr.msrb.gmra.mxu3 %v5932_v6 }
 0x13e   :  { %1267 = vmatpush.bf16.msra.mxu1 %v8144_v19  ;;  %1293 = vmatpush.bf16.msra.mxu3 %v8145_v59 }
 0x140   :  { %1256 = vmatpush.bf16.msra.mxu0 %v8146_v27  ;;  %1282 = vmatpush.bf16.msra.mxu2 %v5410_v4  ;;  %v8168_v4 = vld [vmem:[#allocation115_spill] sm:$0xff] }
 0x142   :  { %1268 = vmatpush.bf16.msra.mxu1 %v8147_v61  ;;  %1294 = vmatpush.bf16.msra.mxu3 %v8148_v52  ;;  %v8152_v61 = vld [vmem:[#allocation106_spill] sm:$0xff]  ;;  %v8153_v52 = vld [vmem:[#allocation97_spill] sm:$0xff] }
 0x144   :  { %1257 = vmatpush.bf16.msra.mxu0 %v5443_v22  ;;  %1283 = vmatpush.bf16.msra.mxu2 %v5458_v10  ;;  %v8154_v22 = vld [vmem:[#allocation99_spill] sm:$0xff]  ;;  %v8155_v10 = vld [vmem:[#allocation101_spill] sm:$0xff] }
 0x146   :  { %1269 = vmatpush.bf16.msra.mxu1 %v8149_v14  ;;  %1295 = vmatpush.bf16.msra.mxu3 %v8150_v23  ;;  %v8158_v14 = vld [vmem:[#allocation110_spill] sm:$0xff]  ;;  %v8159_v23 = vld [vmem:[#allocation105_spill] sm:$0xff] }
 0x147   :  { %1258 = vmatmul.bf16.vlgmr.msra.gmra.mxu0 %v5926_v28  ;;  %1284 = vmatmul.bf16.vlgmr.msra.gmra.mxu2 %v5926_v28 }
 0x148   :  { %1302 = vmatpush.bf16.msrb.mxu0 %v5469_v47  ;;  %1328 = vmatpush.bf16.msrb.mxu2 %v5473_v26  ;;  %v8156_v47 = vld [vmem:[#allocation103_spill] sm:$0xff]  ;;  %v8157_v26 = vld [vmem:[#allocation108_spill] sm:$0xff] }
 0x14a   :  { %1270 = vmatpush.bf16.msra.mxu1 %v8153_v52  ;;  %1296 = vmatpush.bf16.msra.mxu3 %v8154_v22  ;;  %v8162_v52 = vld [vmem:[#allocation114_spill] sm:$0xff]  ;;  %v8163_v22 = vld [vmem:[#allocation109_spill] sm:$0xff] }
 0x14c   :  { %1303 = vmatpush.bf16.msrb.mxu0 %v8151_v62  ;;  %1329 = vmatpush.bf16.msrb.mxu2 %v8152_v61  ;;  %v8160_v62 = vld [vmem:[#allocation107_spill] sm:$0xff]  ;;  %v8161_v61 = vld [vmem:[#allocation112_spill] sm:$0xff] }
 0x14d   :  { %1271 = vmatmul.bf16.vlgmr.msra.gmra.mxu1 %v5932_v6  ;;  %1297 = vmatmul.bf16.vlgmr.msra.gmra.mxu3 %v5932_v6 }
 0x14e   :  { %1315 = vmatpush.bf16.msrb.mxu1 %v8155_v10  ;;  %1341 = vmatpush.bf16.msrb.mxu3 %v8156_v47  ;;  %v8164_v10 = vld [vmem:[#allocation111_spill] sm:$0xff]  ;;  %v8165_v47 = vld [vmem:[#allocation116_spill] sm:$0xff] }
 0x150   :  { %1304 = vmatpush.bf16.msrb.mxu0 %v8157_v26  ;;  %1330 = vmatpush.bf16.msrb.mxu2 %v8158_v14  ;;  %v8166_v26 = vld [vmem:[#allocation118_spill] sm:$0xff]  ;;  %v8167_v14 = vld [vmem:[#allocation113_spill] sm:$0xff] }
 0x152   :  { %1316 = vmatpush.bf16.msrb.mxu1 %v8159_v23  ;;  %1342 = vmatpush.bf16.msrb.mxu3 %v8160_v62  ;;  %v8169_v23 = vld [vmem:[#allocation122_spill] sm:$0xff]  ;;  %v8170_v62 = vld [vmem:[#allocation117_spill] sm:$0xff] }
 0x154   :  { %1305 = vmatpush.bf16.msrb.mxu0 %v8161_v61  ;;  %1331 = vmatpush.bf16.msrb.mxu2 %v8162_v52  ;;  %v8171_v61 = vld [vmem:[#allocation119_spill] sm:$0xff] }
 0x156   :  { %1317 = vmatpush.bf16.msrb.mxu1 %v8163_v22  ;;  %1343 = vmatpush.bf16.msrb.mxu3 %v8164_v10  ;;  %v8172_v10 = vld [vmem:[#allocation121_spill] sm:$0xff] }
 0x158   :  { %1306 = vmatpush.bf16.msrb.mxu0 %v8165_v47  ;;  %1332 = vmatpush.bf16.msrb.mxu2 %v8166_v26  ;;  %v8173_v47 = vld [vmem:[#allocation123_spill] sm:$0xff] }
 0x15a   :  { %1318 = vmatpush.bf16.msrb.mxu1 %v8167_v14  ;;  %1344 = vmatpush.bf16.msrb.mxu3 %v8168_v4 }
 0x15c   :  { %1307 = vmatpush.bf16.msrb.mxu0 %v5654_v53  ;;  %1333 = vmatpush.bf16.msrb.mxu2 %v8169_v23 }
 0x15e   :  { %1319 = vmatpush.bf16.msrb.mxu1 %v8170_v62  ;;  %1345 = vmatpush.bf16.msrb.mxu3 %v8171_v61 }
 0x160   :  { %1308 = vmatpush.bf16.msrb.mxu0 %v5690_v40  ;;  %1334 = vmatpush.bf16.msrb.mxu2 %v5696_v32 }
 0x162   :  { %1320 = vmatpush.bf16.msrb.mxu1 %v8172_v10  ;;  %1346 = vmatpush.bf16.msrb.mxu3 %v8173_v47 }
 0x164   :  { %1309 = vmatpush.bf16.msrb.mxu0 %v5726_v37  ;;  %1335 = vmatpush.bf16.msrb.mxu2 %v5732_v24 }
 0x166   :  { %1321 = vmatpush.bf16.msrb.mxu1 %v5694_v0  ;;  %1347 = vmatpush.bf16.msrb.mxu3 %v5708_v13 }
 0x167   :  { %1310 = vmatmul.bf16.vlgmr.msrb.gmra.mxu0 %v5926_v28  ;;  %1336 = vmatmul.bf16.vlgmr.msrb.gmra.mxu2 %v5926_v28  ;;  %v8174_v28 = vld [vmem:[#allocation24_spill] sm:$0xff] }
 0x168   :  { %1491 = vmatpush.bf16.msra.mxu0 %v4586_v3  ;;  %1517 = vmatpush.bf16.msra.mxu2 %v4599_v8 }
 0x16a   :  { %1322 = vmatpush.bf16.msrb.mxu1 %v5730_v42  ;;  %1348 = vmatpush.bf16.msrb.mxu3 %v5735_v36 }
 0x16c   :  { %1492 = vmatpush.bf16.msra.mxu0 %v4624_v16  ;;  %1518 = vmatpush.bf16.msra.mxu2 %v4638_v21  ;;  %v4079_v21 = vld [vmem:[%s7697_s0 + $0x48] sm:$0xff] }
 0x16d   :  { %1323 = vmatmul.bf16.vlgmr.msrb.gmra.mxu1 %v5932_v6  ;;  %1349 = vmatmul.bf16.vlgmr.msrb.gmra.mxu3 %v5932_v6  ;;  %v8175_v6 = vld [vmem:[#allocation26_spill] sm:$0xff] }
 0x16e   :  { %1504 = vmatpush.bf16.msra.mxu1 %v4597_v7  ;;  %1530 = vmatpush.bf16.msra.mxu3 %v4611_v12 }
 0x170   :  { %1493 = vmatpush.bf16.msra.mxu0 %v4661_v29  ;;  %1519 = vmatpush.bf16.msra.mxu2 %v4676_v34 }
 0x172   :  { %1505 = vmatpush.bf16.msra.mxu1 %v4626_v17  ;;  %1531 = vmatpush.bf16.msra.mxu3 %v4649_v25  ;;  %v8176_v25 = vld [vmem:[#allocation21_spill] sm:$0xff] }
 0x174   :  { %1494 = vmatpush.bf16.msra.mxu0 %v4706_v44  ;;  %1520 = vmatpush.bf16.msra.mxu2 %v4712_v46  ;;  %v8177_v44 = vld [vmem:[#allocation23_spill] sm:$0xff]  ;;  %v8178_v46 = vld [vmem:[#allocation28_spill] sm:$0xff] }
 0x176   :  { %1506 = vmatpush.bf16.msra.mxu1 %v4674_v33  ;;  %1532 = vmatpush.bf16.msra.mxu3 %v4688_v38  ;;  %v8179_v33 = vld [vmem:[#allocation30_spill] sm:$0xff]  ;;  %v8180_v38 = vld [vmem:[#allocation25_spill] sm:$0xff] }
 0x178   :  { %1495 = vmatpush.bf16.msra.mxu0 %v4742_v56  ;;  %1521 = vmatpush.bf16.msra.mxu2 %v4748_v58  ;;  %v8181_v56 = vld [vmem:[#allocation27_spill] sm:$0xff]  ;;  %v8182_v58 = vld [vmem:[#allocation32_spill] sm:$0xff] }
 0x17a   :  { %1507 = vmatpush.bf16.msra.mxu1 %v4710_v45  ;;  %1533 = vmatpush.bf16.msra.mxu3 %v4724_v50  ;;  %v8183_v45 = vld [vmem:[#allocation34_spill] sm:$0xff]  ;;  %v8184_v50 = vld [vmem:[#allocation36_spill] sm:$0xff] }
 0x17c   :  { %1496 = vmatpush.bf16.msra.mxu0 %v8174_v28  ;;  %1522 = vmatpush.bf16.msra.mxu2 %v8175_v6  ;;  %v8185_v28 = vld [vmem:[#allocation38_spill] sm:$0xff]  ;;  %v8186_v6 = vld [vmem:[#allocation29_spill] sm:$0xff] }
 0x17e   :  { %1508 = vmatpush.bf16.msra.mxu1 %v8176_v25  ;;  %1534 = vmatpush.bf16.msra.mxu3 %v8177_v44  ;;  %v8187_v25 = vld [vmem:[#allocation31_spill] sm:$0xff]  ;;  %v8188_v44 = vld [vmem:[#allocation40_spill] sm:$0xff] }
 0x180   :  { %1497 = vmatpush.bf16.msra.mxu0 %v8178_v46  ;;  %1523 = vmatpush.bf16.msra.mxu2 %v8179_v33  ;;  %v8189_v46 = vld [vmem:[#allocation42_spill] sm:$0xff]  ;;  %v8190_v33 = vld [vmem:[#allocation33_spill] sm:$0xff] }
 0x182   :  { %1509 = vmatpush.bf16.msra.mxu1 %v8180_v38  ;;  %1535 = vmatpush.bf16.msra.mxu3 %v8181_v56  ;;  %v8191_v38 = vld [vmem:[#allocation35_spill] sm:$0xff]  ;;  %v8192_v56 = vld [vmem:[#allocation37_spill] sm:$0xff] }
 0x184   :  { %1498 = vmatpush.bf16.msra.mxu0 %v8182_v58  ;;  %1524 = vmatpush.bf16.msra.mxu2 %v8183_v45  ;;  %v8193_v58 = vld [vmem:[#allocation39_spill] sm:$0xff]  ;;  %v8194_v45 = vld [vmem:[#allocation44_spill] sm:$0xff] }
 0x186   :  { %1510 = vmatpush.bf16.msra.mxu1 %v8186_v6  ;;  %1536 = vmatpush.bf16.msra.mxu3 %v8187_v25  ;;  %v8197_v6 = vld [vmem:[#allocation43_spill] sm:$0xff]  ;;  %v8198_v25 = vld [vmem:[#allocation48_spill] sm:$0xff] }
 0x188   :  { %1543 = vmatpush.bf16.msrb.mxu0 %v8184_v50  ;;  %1569 = vmatpush.bf16.msrb.mxu2 %v8185_v28  ;;  %v8195_v50 = vld [vmem:[#allocation46_spill] sm:$0xff]  ;;  %v8196_v28 = vld [vmem:[#allocation41_spill] sm:$0xff] }
 0x18a   :  { %1511 = vmatpush.bf16.msra.mxu1 %v8190_v33  ;;  %1537 = vmatpush.bf16.msra.mxu3 %v8191_v38  ;;  %v8201_v33 = vld [vmem:[#allocation47_spill] sm:$0xff]  ;;  %v8202_v38 = vld [vmem:[#allocation52_spill] sm:$0xff] }
 0x18c   :  { %1544 = vmatpush.bf16.msrb.mxu0 %v8188_v44  ;;  %1570 = vmatpush.bf16.msrb.mxu2 %v8189_v46  ;;  %v8199_v44 = vld [vmem:[#allocation50_spill] sm:$0xff]  ;;  %v8200_v46 = vld [vmem:[#allocation45_spill] sm:$0xff] }
 0x18e   :  { %1556 = vmatpush.bf16.msrb.mxu1 %v8192_v56  ;;  %1582 = vmatpush.bf16.msrb.mxu3 %v8193_v58  ;;  %v8203_v56 = vld [vmem:[#allocation54_spill] sm:$0xff]  ;;  %v8204_v58 = vld [vmem:[#allocation49_spill] sm:$0xff] }
 0x190   :  { %1545 = vmatpush.bf16.msrb.mxu0 %v8194_v45  ;;  %1571 = vmatpush.bf16.msrb.mxu2 %v8195_v50  ;;  %v8205_v45 = vld [vmem:[#allocation51_spill] sm:$0xff]  ;;  %v8206_v50 = vld [vmem:[#allocation56_spill] sm:$0xff] }
 0x192   :  { %1557 = vmatpush.bf16.msrb.mxu1 %v8196_v28  ;;  %1583 = vmatpush.bf16.msrb.mxu3 %v8197_v6  ;;  %v8207_v28 = vld [vmem:[#allocation58_spill] sm:$0xff]  ;;  %v8208_v6 = vld [vmem:[#allocation53_spill] sm:$0xff] }
 0x194   :  { %1546 = vmatpush.bf16.msrb.mxu0 %v8198_v25  ;;  %1572 = vmatpush.bf16.msrb.mxu2 %v8199_v44  ;;  %v8209_v25 = vld [vmem:[#allocation55_spill] sm:$0xff]  ;;  %v8210_v44 = vld [vmem:[#allocation60_spill] sm:$0xff] }
 0x196   :  { %1558 = vmatpush.bf16.msrb.mxu1 %v8200_v46  ;;  %1584 = vmatpush.bf16.msrb.mxu3 %v8201_v33  ;;  %v8211_v46 = vld [vmem:[#allocation62_spill] sm:$0xff]  ;;  %v8212_v33 = vld [vmem:[#allocation57_spill] sm:$0xff] }
 0x198   :  { %1547 = vmatpush.bf16.msrb.mxu0 %v8202_v38  ;;  %1573 = vmatpush.bf16.msrb.mxu2 %v8203_v56  ;;  %v8213_v38 = vld [vmem:[#allocation59_spill] sm:$0xff]  ;;  %v8214_v56 = vld [vmem:[#allocation64_spill] sm:$0xff] }
 0x19a   :  { %1559 = vmatpush.bf16.msrb.mxu1 %v8204_v58  ;;  %1585 = vmatpush.bf16.msrb.mxu3 %v8205_v45  ;;  %v8215_v58 = vld [vmem:[#allocation66_spill] sm:$0xff]  ;;  %v8216_v45 = vld [vmem:[#allocation61_spill] sm:$0xff] }
 0x19c   :  { %1548 = vmatpush.bf16.msrb.mxu0 %v8206_v50  ;;  %1574 = vmatpush.bf16.msrb.mxu2 %v8207_v28  ;;  %v8217_v50 = vld [vmem:[#allocation63_spill] sm:$0xff]  ;;  %v8218_v28 = vld [vmem:[#allocation65_spill] sm:$0xff] }
 0x19e   :  { %1560 = vmatpush.bf16.msrb.mxu1 %v8208_v6  ;;  %1586 = vmatpush.bf16.msrb.mxu3 %v8209_v25  ;;  %v8219_v6 = vld [vmem:[#allocation67_spill] sm:$0xff] }
 0x1a0   :  { %1549 = vmatpush.bf16.msrb.mxu0 %v8210_v44  ;;  %1575 = vmatpush.bf16.msrb.mxu2 %v8211_v46 }
 0x1a2   :  { %1561 = vmatpush.bf16.msrb.mxu1 %v8212_v33  ;;  %1587 = vmatpush.bf16.msrb.mxu3 %v8213_v38 }
 0x1a3   :  { %v1155_v25 = vpop.f32.mrf.mxu0 }
 0x1a4   :  { %1550 = vmatpush.bf16.msrb.mxu0 %v8214_v56  ;;  %1576 = vmatpush.bf16.msrb.mxu2 %v8215_v58 }
 0x1a6   :  { %1562 = vmatpush.bf16.msrb.mxu1 %v8216_v45  ;;  %1588 = vmatpush.bf16.msrb.mxu3 %v8217_v50  ;;  %v4080_v50 = vld [vmem:[%s7697_s0 + $0x50] sm:$0xff] }
 0x1a9   :  { %v1181_v44 = vpop.f32.mrf.mxu2 }
 0x1aa   :  { %1563 = vmatpush.bf16.msrb.mxu1 %v8218_v28  ;;  %1589 = vmatpush.bf16.msrb.mxu3 %v8219_v6  ;;  %v1168_v17 = vpop.f32.mrf.mxu1  ;;  %v4078_v6 = vld [vmem:[%s7697_s0 + $0x40] sm:$0xff]  ;;  %v1182_v0 = vadd.f32 %v4079_v21, %v1181_v44 }
 0x1ab   :  { %v1157_v46 = vpop.f32.mrf.mxu0 }
 0x1b0   :  { %v1194_v34 = vpop.f32.mrf.mxu3 }
 0x1b1   :  { %v1183_v33 = vpop.f32.mrf.mxu2 }
 0x1b2   :  { %v1170_v29 = vpop.f32.mrf.mxu1  ;;  %v1156_v33 = vadd.f32 %v4078_v6, %v1155_v25 }
 0x1b4   :  { %v1207_v38 = vpop.f32.mrf.mxu0 }
 0x1b5   :  { %v1208_v28 = vadd.f32 %v4080_v50, %v1207_v38 }
 0x1b8   :  { %v1196_v12 = vpop.f32.mrf.mxu3 }
 0x1b9   :  { %v4081_v12 = vld [vmem:[%s7697_s0 + $0x58] sm:$0xff] }
 0x1ba   :  { %v1220_v56 = vpop.f32.mrf.mxu1  ;;  %v1233_v7 = vpop.f32.mrf.mxu2 }
 0x1bb   :  { %v1221_v42 = vadd.f32 %v1220_v56, %v1208_v28  ;;  %v1234_v38 = vadd.f32 %v4081_v12, %v1233_v7  ;;  %v1195_v28 = vadd.f32 %v1194_v34, %v1182_v0 }
 0x1bc   :  { %v1209_v58 = vpop.f32.mrf.mxu0 }
 0x1bd   :  { %v1169_v58 = vadd.f32 %v1168_v17, %v1156_v33  ;;  %v4088_v16 = vmul.f32 -1.442695, %v1221_v42  ;;  %v4087_v25 = vmul.f32 -1.442695, %v1195_v28 }
 0x1bf   :  { %4337 = vpow2.f32 %v4088_v16 }
 0x1c0   :  { %v1246_v45 = vpop.f32.mrf.mxu3 }
 0x1c1   :  { %v1247_v13 = vadd.f32 %v1246_v45, %v1234_v38 }
 0x1c2   :  { %v1222_v36 = vpop.f32.mrf.mxu1  ;;  %v1235_v46 = vpop.f32.mrf.mxu2 }
 0x1c3   :  { %v4086_v36 = vmul.f32 -1.442695, %v1169_v58  ;;  %v4089_v3 = vmul.f32 -1.442695, %v1247_v13 }
 0x1c4   :  { %v1259_v29 = vpop.f32.mrf.mxu0 }
 0x1c5   :  { %4339 = vpow2.f32 %v4086_v36  ;;  %v4338_v17 = vpop.eup %4337 }
 0x1c6   :  { %4341 = vpow2.f32 %v4089_v3  ;;  %v6090_v7 = vadd.f32 1.0, %v4338_v17 }
 0x1c7   :  { %4343 = vpow2.f32 %v4087_v25 }
 0x1c8   :  { %v1248_v50 = vpop.f32.mrf.mxu3  ;;  %4345 = vrcp.f32 %v6090_v7  ;;  %v1411_v61 = vand.u32 2147483648, %v6090_v7  ;;  %vm1405_vm9 = vweird.f32 %v6090_v7 }
 0x1c9   :  { %v4084_v50 = vld [vmem:[%s7697_s0 + $0x70] sm:$0xff] }
 0x1ca   :  { %v6086_v8 = vpop.f32.mrf.mxu2  ;;  %v1272_v56 = vpop.f32.mrf.mxu1 }
 0x1cb   :  { %v4340_v21 = vpop.eup %4339 }
 0x1cc   :  { %v1261_v46 = vpop.f32.mrf.mxu0  ;;  %v4342_v44 = vpop.eup %4341  ;;  %v6092_v45 = vadd.f32 1.0, %v4340_v21 }
 0x1cd   :  { %v4344_v34 = vpop.eup %4343  ;;  %v6095_v0 = vadd.f32 1.0, %v4342_v44 }
 0x1ce   :  { %4347 = vrcp.f32 %v6092_v45  ;;  %v6098_v3 = vadd.f32 1.0, %v4344_v34  ;;  %v6100_v13 = vpop.eup %4345  ;;  %vm1367_vm10 = vweird.f32 %v6092_v45 }
 0x1cf   :  { %4349 = vrcp.f32 %v6095_v0  ;;  %v1401_v12 = vmul.f32 %v6100_v13, %v6090_v7  ;;  %vm1406_vm8 = vweird.f32 %v6100_v13  ;;  %vm1420_vm0 = vweird.f32 %v6095_v0 }
 0x1d0   :  { %v6088_v6 = vpop.f32.mrf.mxu3  ;;  %4351 = vrcp.f32 %v6098_v3  ;;  %vm6139_vm11 = vmor %vm1405_vm9, %vm1406_vm8  ;;  %vm1382_vm4 = vweird.f32 %v6098_v3 }
 0x1d1   :  { %v1402_v46 = vsub.f32 1.0, %v1401_v12  ;;  %v4085_v12 = vld [vmem:[%s7697_s0 + $0x78] sm:$0xff] }
 0x1d2   :  { %v1287_v33 = vpop.f32.mrf.mxu2  ;;  %v1274_v42 = vpop.f32.mrf.mxu1 }
 0x1d3   :  { %v4082_v42 = vld [vmem:[%s7697_s0 + $0x60] sm:$0xff]  ;;  %v1403_v24 = vmul.f32 %v6100_v13, %v1402_v46 }
 0x1d4   :  { %v6106_v38 = vpop.eup %4347  ;;  %v1260_v37 = vadd.f32 %v4082_v42, %v1259_v29  ;;  %v1371_v42 = vand.u32 2147483647, %v6092_v45 }
 0x1d5   :  { %v6111_v36 = vpop.eup %4349  ;;  %v1363_v28 = vmul.f32 %v6106_v38, %v6092_v45  ;;  %v1404_v46 = vadd.f32 %v6100_v13, %v1403_v24  ;;  %vm1368_vm12 = vweird.f32 %v6106_v38  ;;  %v1388_v24 = vand.u32 2147483648, %v6098_v3 }
 0x1d6   :  { %v6115_v17 = vpop.eup %4351  ;;  %v1416_v33 = vmul.f32 %v6111_v36, %v6095_v0  ;;  %v1273_v32 = vadd.f32 %v1272_v56, %v1260_v37  ;;  %v1409_v37 = vand.u32 2147483647, %v6090_v7  ;;  %vm1421_vm13 = vweird.f32 %v6111_v36  ;;  %vm6158_vm15 = vmor %vm1367_vm10, %vm1368_vm12 }
 0x1d7   :  { %v1364_v34 = vsub.f32 1.0, %v1363_v28  ;;  %v1408_v7 = vsel %vm6139_vm11, %v6100_v13, %v1404_v46  ;;  %v1424_v13 = vand.u32 2147483647, %v6095_v0  ;;  %vm6167_vm1 = vmor %vm1420_vm0, %vm1421_vm13  ;;  %vm1372_vm2 = vcmp.eq.f32.partialorder %v1371_v42, 8.507059e+37 }
 0x1d8   :  { %v1300_v16 = vpop.f32.mrf.mxu3  ;;  %v1417_v10 = vsub.f32 1.0, %v1416_v33  ;;  %vm1410_vm14 = vcmp.eq.f32.partialorder %v1409_v37, 8.507059e+37  ;;  %vm1383_vm3 = vweird.f32 %v6115_v17 }
 0x1d9   :  { %v1365_v28 = vmul.f32 %v6106_v38, %v1364_v34  ;;  %vm1425_vm5 = vcmp.eq.f32.partialorder %v1424_v13, 8.507059e+37  ;;  %vm1384_vm6 = vmor %vm1382_vm4, %vm1383_vm3 }
 0x1e4   :  { %v1311_v58 = vpop.f32.mrf.mxu0 }
 0x1e5   :  { %v1312_v25 = vadd.f32 %v4084_v50, %v1311_v58  ;;  %v1378_v50 = vmul.f32 %v6115_v17, %v6098_v3 }
 0x1ea   :  { %v1324_v21 = vpop.f32.mrf.mxu1  ;;  %v1337_v44 = vpop.f32.mrf.mxu2 }
 0x1eb   :  { %v1325_v16 = vadd.f32 %v1324_v21, %v1312_v25  ;;  %v1338_v40 = vadd.f32 %v4085_v12, %v1337_v44  ;;  %v4083_v25 = vld [vmem:[%s7697_s0 + $0x68] sm:$0xff]  ;;  %v1412_v12 = vor.u32 1.1754944e-38, %v1411_v61 }
 0x1ec   :  { %v1313_v58 = vpop.f32.mrf.mxu0  ;;  %v1286_v44 = vadd.f32 %v4083_v25, %v6086_v8 }
 0x1ed   :  { %v4090_v47 = vmul.f32 -1.442695, %v1325_v16  ;;  %v1379_v58 = vsub.f32 1.0, %v1378_v50  ;;  %v1366_v16 = vadd.f32 %v6106_v38, %v1365_v28  ;;  %v1426_v28 = vand.u32 2147483648, %v6095_v0 }
 0x1ee   :  { %v1299_v50 = vadd.f32 %v6088_v6, %v1286_v44  ;;  %v1413_v61 = vsel %vm1410_vm14, %v1412_v12, %v1408_v7  ;;  %v1386_v44 = vand.u32 2147483647, %v6098_v3 }
 0x1ef   :  { %4353 = vpow2.f32 %v4090_v47  ;;  %v1418_v47 = vmul.f32 %v6111_v36, %v1417_v10  ;;  %v1373_v10 = vand.u32 2147483648, %v6092_v45  ;;  %v1370_v6 = vsel %vm6158_vm15, %v6106_v38, %v1366_v16 }
 0x1f0   :  { %v1350_v21 = vpop.f32.mrf.mxu3  ;;  %4355 = vtanh.f32 %v1273_v32  ;;  %vm1387_vm7 = vcmp.eq.f32.partialorder %v1386_v44, 8.507059e+37 }
 0x1f1   :  { %v1351_v29 = vadd.f32 %v1350_v21, %v1338_v40  ;;  %v1380_v21 = vmul.f32 %v6115_v17, %v1379_v58  ;;  %v1419_v8 = vadd.f32 %v6111_v36, %v1418_v47  ;;  %v1374_v45 = vor.u32 1.1754944e-38, %v1373_v10 }
 0x1f2   :  { %v1326_v56 = vpop.f32.mrf.mxu1  ;;  %v1339_v33 = vpop.f32.mrf.mxu2  ;;  %v1470_v47 = vmul.f32 %v1413_v61, %v5920_v49 }
 0x1f3   :  { %v4091_v40 = vmul.f32 -1.442695, %v1351_v29  ;;  %v1381_v37 = vadd.f32 %v6115_v17, %v1380_v21  ;;  %v1423_v0 = vsel %vm6167_vm1, %v6111_v36, %v1419_v8  ;;  %v1427_v56 = vor.u32 1.1754944e-38, %v1426_v28 }
 0x1f4   :  { %v1375_v33 = vsel %vm1372_vm2, %v1374_v45, %v1370_v6 }
 0x1f5   :  { %v4354_v34 = vpop.eup %4353  ;;  %4357 = vpow2.f32 %v4091_v40  ;;  %v1428_v40 = vsel %vm1425_vm5, %v1427_v56, %v1423_v0  ;;  %v1385_v7 = vsel %vm1384_vm6, %v6115_v17, %v1381_v37 }
 0x1f6   :  { %v1438_v32 = vadd.f32 1.0, %v4354_v34  ;;  %v4356_v58 = vpop.eup %4355  ;;  %v1389_v34 = vor.u32 1.1754944e-38, %v1388_v24 }
 0x1f7   :  { %v1472_v42 = vmul.f32 %v4356_v58, %v1375_v33 }
 0x1f8   :  { %4359 = vrcp.f32 %v1438_v32  ;;  %v1352_v46 = vpop.f32.mrf.mxu3  ;;  %v1390_v21 = vsel %vm1387_vm7, %v1389_v34, %v1385_v7  ;;  %v1451_v28 = vand.u32 2147483648, %v1438_v32  ;;  %v1449_v61 = vand.u32 2147483647, %v1438_v32  ;;  %v8228_v34 = vld [vmem:[#allocation91_spill] sm:$0xff] }
 0x1f9   :  { %4361 = vtanh.f32 %v1299_v50  ;;  %v6180_v10 = vadd.f32 %v1472_v42, %v1470_v47  ;;  %v1471_v50 = vmul.f32 %v1428_v40, %v5923_v18  ;;  %vm1445_vm9 = vweird.f32 %v1438_v32 }
 0x1fa   :  { %v1452_v58 = vor.u32 1.1754944e-38, %v1451_v28  ;;  %vm1450_vm11 = vcmp.eq.f32.partialorder %v1449_v61, 8.507059e+37  ;;  %v8234_v28 = vld [vmem:[#allocation95_spill] sm:$0xff]  ;;  %v8236_v61 = vld [vmem:[#allocation106_spill] sm:$0xff] }
 0x1fb   :  { %v4358_v38 = vpop.eup %4357 }
 0x1fc   :  { %v1439_v49 = vadd.f32 1.0, %v4358_v38 }
 0x1fe   :  { %v4360_v16 = vpop.eup %4359  ;;  %4363 = vrcp.f32 %v1439_v49  ;;  %v1466_v37 = vand.u32 2147483648, %v1439_v49  ;;  %v1464_v56 = vand.u32 2147483647, %v1439_v49  ;;  %vm1460_vm13 = vweird.f32 %v1439_v49 }
 0x1ff   :  { %v4362_v36 = vpop.eup %4361  ;;  %v1441_v12 = vmul.f32 %v4360_v16, %v1438_v32  ;;  %4365 = vtanh.f32 %v6180_v10  ;;  %vm1446_vm8 = vweird.f32 %v4360_v16 }
 0x200   :  { %v1473_v3 = vmul.f32 %v4362_v36, %v1390_v21  ;;  %vm1447_vm10 = vmor %vm1445_vm9, %vm1446_vm8  ;;  %v1467_v32 = vor.u32 1.1754944e-38, %v1466_v37  ;;  %vm1465_vm15 = vcmp.eq.f32.partialorder %v1464_v56, 8.507059e+37  ;;  %v8227_v36 = vld [vmem:[#allocation89_spill] sm:$0xff]  ;;  %v8231_v21 = vld [vmem:[#allocation100_spill] sm:$0xff] }
 0x201   :  { %v1442_v8 = vsub.f32 1.0, %v1441_v12  ;;  %v8229_v12 = vld [vmem:[#allocation96_spill] sm:$0xff]  ;;  %v8248_v56 = vld [vmem:[#allocation119_spill] sm:$0xff] }
 0x202   :  { %v6185_v13 = vadd.f32 %v1473_v3, %v1471_v50  ;;  %v8230_v50 = vld [vmem:[#allocation98_spill] sm:$0xff]  ;;  %v8233_v3 = vld [vmem:[#allocation93_spill] sm:$0xff]  ;;  %v8245_v37 = vld [vmem:[#allocation112_spill] sm:$0xff] }
 0x203   :  { %v1443_v25 = vmul.f32 %v4360_v16, %v1442_v8  ;;  %v8232_v8 = vld [vmem:[#allocation102_spill] sm:$0xff] }
 0x204   :  { %v4364_v6 = vpop.eup %4363  ;;  %4367 = vtanh.f32 %v6185_v13 }
 0x205   :  { %v1444_v17 = vadd.f32 %v4360_v16, %v1443_v25  ;;  %v1456_v46 = vmul.f32 %v4364_v6, %v1439_v49  ;;  %v4366_v45 = vpop.eup %4365  ;;  %vm1461_vm12 = vweird.f32 %v4364_v6  ;;  %v8226_v49 = vld [vmem:[#allocation94_spill] sm:$0xff]  ;;  %v8235_v25 = vld [vmem:[#allocation104_spill] sm:$0xff] }
 0x206   :  { %vm1462_vm14 = vmor %vm1460_vm13, %vm1461_vm12 }
 0x207   :  { %v1448_v29 = vsel %vm1447_vm10, %v4360_v16, %v1444_v17  ;;  %v1457_v18 = vsub.f32 1.0, %v1456_v46  ;;  %v8238_v17 = vld [vmem:[#allocation99_spill] sm:$0xff]  ;;  %v8239_v46 = vld [vmem:[#allocation101_spill] sm:$0xff] }
 0x208   :  { %v1453_v47 = vsel %vm1450_vm11, %v1452_v58, %v1448_v29  ;;  %v8240_v58 = vld [vmem:[#allocation103_spill] sm:$0xff]  ;;  %v8241_v29 = vld [vmem:[#allocation108_spill] sm:$0xff] }
 0x209   :  { %v1478_v0 = vmul.f32 %v4366_v45, %v1453_v47  ;;  %v1458_v38 = vmul.f32 %v4364_v6, %v1457_v18  ;;  %v8242_v18 = vld [vmem:[#allocation110_spill] sm:$0xff]  ;;  %v8243_v45 = vld [vmem:[#allocation105_spill] sm:$0xff]  ;;  %v8244_v47 = vld [vmem:[#allocation107_spill] sm:$0xff] }
 0x20a   :  { %v4368_v44 = vpop.eup %4367 }
 0x20b   :  { %v6188_v33 = vpack.c.bf16 %v1478_v0, %v1478_v0  ;;  %v1459_v24 = vadd.f32 %v4364_v6, %v1458_v38  ;;  %v8246_v0 = vld [vmem:[#allocation111_spill] sm:$0xff]  ;;  %v8247_v38 = vld [vmem:[#allocation116_spill] sm:$0xff] }
 0x20d   :  { %v1463_v42 = vsel %vm1462_vm14, %v4364_v6, %v1459_v24  ;;  %1499 = vmatmul.bf16.vlgmr.msra.gmra.mxu0 %v6188_v33  ;;  %1525 = vmatmul.bf16.vlgmr.msra.gmra.mxu2 %v6188_v33  ;;  %v8237_v6 = vld [vmem:[#allocation97_spill] sm:$0xff]  ;;  %v8249_v24 = vld [vmem:[#allocation124_spill] sm:$0xff] }
 0x20e   :  { %v1468_v40 = vsel %vm1465_vm15, %v1467_v32, %v1463_v42  ;;  %1595 = vmatpush.bf16.msra.mxu0 %v8124_v11  ;;  %1621 = vmatpush.bf16.msra.mxu2 %v8125_v15  ;;  %v8250_v32 = vld [vmem:[#allocation126_spill] sm:$0xff]  ;;  %v8251_v42 = vld [vmem:[#allocation121_spill] sm:$0xff] }
 0x20f   :  { %v1479_v16 = vmul.f32 %v4368_v44, %v1468_v40  ;;  %v8252_v44 = vld [vmem:[#allocation123_spill] sm:$0xff]  ;;  %v8253_v40 = vld [vmem:[#allocation128_spill] sm:$0xff] }
 0x211   :  { %v6194_v7 = vpack.c.bf16 %v1479_v16, %v1479_v16  ;;  %v8254_v16 = vld [vmem:[#allocation130_spill] sm:$0xff] }
 0x212   :  { %1596 = vmatpush.bf16.msra.mxu0 %v8126_v48  ;;  %1622 = vmatpush.bf16.msra.mxu2 %v8127_v57 }
 0x213   :  { %1512 = vmatmul.bf16.vlgmr.msra.gmra.mxu1 %v6194_v7  ;;  %1538 = vmatmul.bf16.vlgmr.msra.gmra.mxu3 %v6194_v7 }
 0x214   :  { %1608 = vmatpush.bf16.msra.mxu1 %v8128_v63  ;;  %1634 = vmatpush.bf16.msra.mxu3 %v8129_v2 }
 0x216   :  { %1597 = vmatpush.bf16.msra.mxu0 %v8130_v20  ;;  %1623 = vmatpush.bf16.msra.mxu2 %v8131_v30 }
 0x218   :  { %1609 = vmatpush.bf16.msra.mxu1 %v8132_v60  ;;  %1635 = vmatpush.bf16.msra.mxu3 %v8133_v41 }
 0x21a   :  { %1598 = vmatpush.bf16.msra.mxu0 %v8134_v54  ;;  %1624 = vmatpush.bf16.msra.mxu2 %v8135_v55 }
 0x21c   :  { %1610 = vmatpush.bf16.msra.mxu1 %v8136_v31  ;;  %1636 = vmatpush.bf16.msra.mxu3 %v8137_v9 }
 0x21d   :  { %1551 = vmatmul.bf16.vlgmr.msrb.gmra.mxu0 %v6188_v33  ;;  %1577 = vmatmul.bf16.vlgmr.msrb.gmra.mxu2 %v6188_v33 }
 0x21e   :  { %1599 = vmatpush.bf16.msra.mxu0 %v8138_v1  ;;  %1625 = vmatpush.bf16.msra.mxu2 %v8139_v51 }
 0x220   :  { %1611 = vmatpush.bf16.msra.mxu1 %v8140_v39  ;;  %1637 = vmatpush.bf16.msra.mxu3 %v8141_v35 }
 0x222   :  { %1600 = vmatpush.bf16.msra.mxu0 %v8142_v5  ;;  %1626 = vmatpush.bf16.msra.mxu2 %v8143_v43 }
 0x223   :  { %1564 = vmatmul.bf16.vlgmr.msrb.gmra.mxu1 %v6194_v7  ;;  %1590 = vmatmul.bf16.vlgmr.msrb.gmra.mxu3 %v6194_v7 }
 0x224   :  { %1612 = vmatpush.bf16.msra.mxu1 %v8144_v19  ;;  %1638 = vmatpush.bf16.msra.mxu3 %v8145_v59 }
 0x226   :  { %1601 = vmatpush.bf16.msra.mxu0 %v8146_v27  ;;  %1627 = vmatpush.bf16.msra.mxu2 %v8226_v49 }
 0x228   :  { %1613 = vmatpush.bf16.msra.mxu1 %v8227_v36  ;;  %1639 = vmatpush.bf16.msra.mxu3 %v8228_v34 }
 0x22a   :  { %1602 = vmatpush.bf16.msra.mxu0 %v8229_v12  ;;  %1628 = vmatpush.bf16.msra.mxu2 %v8230_v50 }
 0x22c   :  { %1614 = vmatpush.bf16.msra.mxu1 %v8233_v3  ;;  %1640 = vmatpush.bf16.msra.mxu3 %v8234_v28 }
 0x22d   :  { %1603 = vmatmul.bf16.vlgmr.msra.gmra.mxu0 %v6188_v33  ;;  %1629 = vmatmul.bf16.vlgmr.msra.gmra.mxu2 %v6188_v33 }
 0x22e   :  { %1647 = vmatpush.bf16.msrb.mxu0 %v8231_v21  ;;  %1673 = vmatpush.bf16.msrb.mxu2 %v8232_v8 }
 0x230   :  { %1615 = vmatpush.bf16.msra.mxu1 %v8237_v6  ;;  %1641 = vmatpush.bf16.msra.mxu3 %v8238_v17 }
 0x232   :  { %1648 = vmatpush.bf16.msrb.mxu0 %v8235_v25  ;;  %1674 = vmatpush.bf16.msrb.mxu2 %v8236_v61 }
 0x233   :  { %1616 = vmatmul.bf16.vlgmr.msra.gmra.mxu1 %v6194_v7  ;;  %1642 = vmatmul.bf16.vlgmr.msra.gmra.mxu3 %v6194_v7 }
 0x234   :  { %1660 = vmatpush.bf16.msrb.mxu1 %v8239_v46  ;;  %1686 = vmatpush.bf16.msrb.mxu3 %v8240_v58 }
 0x236   :  { %1649 = vmatpush.bf16.msrb.mxu0 %v8241_v29  ;;  %1675 = vmatpush.bf16.msrb.mxu2 %v8242_v18 }
 0x238   :  { %1661 = vmatpush.bf16.msrb.mxu1 %v8243_v45  ;;  %1687 = vmatpush.bf16.msrb.mxu3 %v8244_v47 }
 0x23a   :  { %1650 = vmatpush.bf16.msrb.mxu0 %v8245_v37  ;;  %1676 = vmatpush.bf16.msrb.mxu2 %v8162_v52  ;;  %v4093_v52 = vld [vmem:[%s7697_s0 + $0x88] sm:$0xff] }
 0x23c   :  { %1662 = vmatpush.bf16.msrb.mxu1 %v8163_v22  ;;  %1688 = vmatpush.bf16.msrb.mxu3 %v8246_v0 }
 0x23e   :  { %1651 = vmatpush.bf16.msrb.mxu0 %v8247_v38  ;;  %1677 = vmatpush.bf16.msrb.mxu2 %v8166_v26 }
 0x240   :  { %1663 = vmatpush.bf16.msrb.mxu1 %v8167_v14  ;;  %1689 = vmatpush.bf16.msrb.mxu3 %v8168_v4  ;;  %v8255_v4 = vld [vmem:[#allocation4_spill] sm:$0xff] }
 0x242   :  { %1652 = vmatpush.bf16.msrb.mxu0 %v5654_v53  ;;  %1678 = vmatpush.bf16.msrb.mxu2 %v8169_v23  ;;  %v8256_v53 = vld [vmem:[#allocation6_spill] sm:$0xff]  ;;  %v8257_v23 = vld [vmem:[#allocation125_spill] sm:$0xff] }
 0x244   :  { %1664 = vmatpush.bf16.msrb.mxu1 %v8170_v62  ;;  %1690 = vmatpush.bf16.msrb.mxu3 %v8248_v56  ;;  %v8258_v62 = vld [vmem:[#allocation127_spill] sm:$0xff] }
 0x246   :  { %1653 = vmatpush.bf16.msrb.mxu0 %v8249_v24  ;;  %1679 = vmatpush.bf16.msrb.mxu2 %v8250_v32  ;;  %v8259_v32 = vld [vmem:[#allocation8_spill] sm:$0xff] }
 0x248   :  { %1665 = vmatpush.bf16.msrb.mxu1 %v8251_v42  ;;  %1691 = vmatpush.bf16.msrb.mxu3 %v8252_v44  ;;  %v8260_v42 = vld [vmem:[#allocation10_spill] sm:$0xff]  ;;  %v8261_v44 = vld [vmem:[#allocation129_spill] sm:$0xff] }
 0x24a   :  { %1654 = vmatpush.bf16.msrb.mxu0 %v8253_v40  ;;  %1680 = vmatpush.bf16.msrb.mxu2 %v8254_v16  ;;  %v8262_v40 = vld [vmem:[#allocation131_spill] sm:$0xff]  ;;  %v8263_v16 = vld [vmem:[#allocation5_spill] sm:$0xff] }
 0x24c   :  { %1666 = vmatpush.bf16.msrb.mxu1 %v8257_v23  ;;  %1692 = vmatpush.bf16.msrb.mxu3 %v8258_v62  ;;  %v8265_v62 = vld [vmem:[#allocation12_spill] sm:$0xff]  ;;  %v8266_v23 = vld [vmem:[#allocation14_spill] sm:$0xff] }
 0x24d   :  { %1655 = vmatmul.bf16.vlgmr.msrb.gmra.mxu0 %v6188_v33  ;;  %1681 = vmatmul.bf16.vlgmr.msrb.gmra.mxu2 %v6188_v33  ;;  %v8267_v33 = vld [vmem:[#allocation9_spill] sm:$0xff] }
 0x24e   :  { %1836 = vmatpush.bf16.msra.mxu0 %v8255_v4  ;;  %1862 = vmatpush.bf16.msra.mxu2 %v8256_v53  ;;  %v8264_v4 = vld [vmem:[#allocation7_spill] sm:$0xff]  ;;  %v8274_v53 = vld [vmem:[#allocation22_spill] sm:$0xff] }
 0x250   :  { %1667 = vmatpush.bf16.msrb.mxu1 %v8261_v44  ;;  %1693 = vmatpush.bf16.msrb.mxu3 %v8262_v40  ;;  %v8270_v44 = vld [vmem:[#allocation18_spill] sm:$0xff]  ;;  %v8271_v40 = vld [vmem:[#allocation13_spill] sm:$0xff] }
 0x252   :  { %1837 = vmatpush.bf16.msra.mxu0 %v8259_v32  ;;  %1863 = vmatpush.bf16.msra.mxu2 %v8260_v42  ;;  %v8268_v32 = vld [vmem:[#allocation11_spill] sm:$0xff]  ;;  %v8269_v42 = vld [vmem:[#allocation16_spill] sm:$0xff] }
 0x253   :  { %1668 = vmatmul.bf16.vlgmr.msrb.gmra.mxu1 %v6194_v7  ;;  %1694 = vmatmul.bf16.vlgmr.msrb.gmra.mxu3 %v6194_v7  ;;  %v8275_v7 = vld [vmem:[#allocation17_spill] sm:$0xff] }
 0x254   :  { %1849 = vmatpush.bf16.msra.mxu1 %v8263_v16  ;;  %1875 = vmatpush.bf16.msra.mxu3 %v8264_v4  ;;  %v8272_v16 = vld [vmem:[#allocation15_spill] sm:$0xff]  ;;  %v8273_v4 = vld [vmem:[#allocation20_spill] sm:$0xff] }
 0x256   :  { %1838 = vmatpush.bf16.msra.mxu0 %v8265_v62  ;;  %1864 = vmatpush.bf16.msra.mxu2 %v8266_v23  ;;  %v8276_v62 = vld [vmem:[#allocation19_spill] sm:$0xff]  ;;  %v8277_v23 = vld [vmem:[#allocation24_spill] sm:$0xff] }
 0x258   :  { %1850 = vmatpush.bf16.msra.mxu1 %v8267_v33  ;;  %1876 = vmatpush.bf16.msra.mxu3 %v8268_v32  ;;  %v8278_v33 = vld [vmem:[#allocation26_spill] sm:$0xff]  ;;  %v8279_v32 = vld [vmem:[#allocation21_spill] sm:$0xff] }
 0x25a   :  { %1839 = vmatpush.bf16.msra.mxu0 %v8269_v42  ;;  %1865 = vmatpush.bf16.msra.mxu2 %v8270_v44  ;;  %v8280_v42 = vld [vmem:[#allocation23_spill] sm:$0xff]  ;;  %v8281_v44 = vld [vmem:[#allocation28_spill] sm:$0xff] }
 0x25c   :  { %1851 = vmatpush.bf16.msra.mxu1 %v8271_v40  ;;  %1877 = vmatpush.bf16.msra.mxu3 %v8272_v16  ;;  %v8282_v40 = vld [vmem:[#allocation30_spill] sm:$0xff]  ;;  %v8283_v16 = vld [vmem:[#allocation25_spill] sm:$0xff] }
 0x25e   :  { %1840 = vmatpush.bf16.msra.mxu0 %v8273_v4  ;;  %1866 = vmatpush.bf16.msra.mxu2 %v8274_v53  ;;  %v8284_v4 = vld [vmem:[#allocation27_spill] sm:$0xff]  ;;  %v8285_v53 = vld [vmem:[#allocation32_spill] sm:$0xff] }
 0x260   :  { %1852 = vmatpush.bf16.msra.mxu1 %v8275_v7  ;;  %1878 = vmatpush.bf16.msra.mxu3 %v8276_v62  ;;  %v8286_v7 = vld [vmem:[#allocation34_spill] sm:$0xff]  ;;  %v8287_v62 = vld [vmem:[#allocation36_spill] sm:$0xff] }
 0x262   :  { %1841 = vmatpush.bf16.msra.mxu0 %v8277_v23  ;;  %1867 = vmatpush.bf16.msra.mxu2 %v8278_v33  ;;  %v8288_v23 = vld [vmem:[#allocation38_spill] sm:$0xff]  ;;  %v8289_v33 = vld [vmem:[#allocation29_spill] sm:$0xff] }
 0x264   :  { %1853 = vmatpush.bf16.msra.mxu1 %v8279_v32  ;;  %1879 = vmatpush.bf16.msra.mxu3 %v8280_v42  ;;  %v8290_v32 = vld [vmem:[#allocation31_spill] sm:$0xff]  ;;  %v8291_v42 = vld [vmem:[#allocation40_spill] sm:$0xff] }
 0x266   :  { %1842 = vmatpush.bf16.msra.mxu0 %v8281_v44  ;;  %1868 = vmatpush.bf16.msra.mxu2 %v8282_v40  ;;  %v8292_v44 = vld [vmem:[#allocation42_spill] sm:$0xff]  ;;  %v8293_v40 = vld [vmem:[#allocation33_spill] sm:$0xff] }
 0x268   :  { %1854 = vmatpush.bf16.msra.mxu1 %v8283_v16  ;;  %1880 = vmatpush.bf16.msra.mxu3 %v8284_v4  ;;  %v8294_v16 = vld [vmem:[#allocation35_spill] sm:$0xff]  ;;  %v8295_v4 = vld [vmem:[#allocation37_spill] sm:$0xff] }
 0x26a   :  { %1843 = vmatpush.bf16.msra.mxu0 %v8285_v53  ;;  %1869 = vmatpush.bf16.msra.mxu2 %v8286_v7  ;;  %v8296_v53 = vld [vmem:[#allocation39_spill] sm:$0xff]  ;;  %v8297_v7 = vld [vmem:[#allocation44_spill] sm:$0xff] }
 0x26c   :  { %1855 = vmatpush.bf16.msra.mxu1 %v8289_v33  ;;  %1881 = vmatpush.bf16.msra.mxu3 %v8290_v32  ;;  %v8300_v33 = vld [vmem:[#allocation43_spill] sm:$0xff]  ;;  %v8301_v32 = vld [vmem:[#allocation48_spill] sm:$0xff] }
 0x26e   :  { %1888 = vmatpush.bf16.msrb.mxu0 %v8287_v62  ;;  %1914 = vmatpush.bf16.msrb.mxu2 %v8288_v23  ;;  %v8298_v62 = vld [vmem:[#allocation46_spill] sm:$0xff]  ;;  %v8299_v23 = vld [vmem:[#allocation41_spill] sm:$0xff] }
 0x270   :  { %1856 = vmatpush.bf16.msra.mxu1 %v8293_v40  ;;  %1882 = vmatpush.bf16.msra.mxu3 %v8294_v16  ;;  %v8304_v40 = vld [vmem:[#allocation47_spill] sm:$0xff]  ;;  %v8305_v16 = vld [vmem:[#allocation52_spill] sm:$0xff] }
 0x272   :  { %1889 = vmatpush.bf16.msrb.mxu0 %v8291_v42  ;;  %1915 = vmatpush.bf16.msrb.mxu2 %v8292_v44  ;;  %v8302_v42 = vld [vmem:[#allocation50_spill] sm:$0xff]  ;;  %v8303_v44 = vld [vmem:[#allocation45_spill] sm:$0xff] }
 0x274   :  { %1901 = vmatpush.bf16.msrb.mxu1 %v8295_v4  ;;  %1927 = vmatpush.bf16.msrb.mxu3 %v8296_v53  ;;  %v8306_v4 = vld [vmem:[#allocation54_spill] sm:$0xff]  ;;  %v8307_v53 = vld [vmem:[#allocation49_spill] sm:$0xff] }
 0x276   :  { %1890 = vmatpush.bf16.msrb.mxu0 %v8297_v7  ;;  %1916 = vmatpush.bf16.msrb.mxu2 %v8298_v62  ;;  %v8308_v7 = vld [vmem:[#allocation51_spill] sm:$0xff]  ;;  %v8309_v62 = vld [vmem:[#allocation56_spill] sm:$0xff] }
 0x278   :  { %1902 = vmatpush.bf16.msrb.mxu1 %v8299_v23  ;;  %1928 = vmatpush.bf16.msrb.mxu3 %v8300_v33  ;;  %v8310_v23 = vld [vmem:[#allocation58_spill] sm:$0xff]  ;;  %v8311_v33 = vld [vmem:[#allocation53_spill] sm:$0xff] }
 0x27a   :  { %1891 = vmatpush.bf16.msrb.mxu0 %v8301_v32  ;;  %1917 = vmatpush.bf16.msrb.mxu2 %v8302_v42  ;;  %v8312_v32 = vld [vmem:[#allocation55_spill] sm:$0xff]  ;;  %v8313_v42 = vld [vmem:[#allocation60_spill] sm:$0xff] }
 0x27c   :  { %1903 = vmatpush.bf16.msrb.mxu1 %v8303_v44  ;;  %1929 = vmatpush.bf16.msrb.mxu3 %v8304_v40  ;;  %v8314_v44 = vld [vmem:[#allocation62_spill] sm:$0xff]  ;;  %v8315_v40 = vld [vmem:[#allocation57_spill] sm:$0xff] }
 0x27e   :  { %1892 = vmatpush.bf16.msrb.mxu0 %v8305_v16  ;;  %1918 = vmatpush.bf16.msrb.mxu2 %v8306_v4  ;;  %v8316_v16 = vld [vmem:[#allocation59_spill] sm:$0xff]  ;;  %v8317_v4 = vld [vmem:[#allocation64_spill] sm:$0xff] }
 0x280   :  { %1904 = vmatpush.bf16.msrb.mxu1 %v8307_v53  ;;  %1930 = vmatpush.bf16.msrb.mxu3 %v8308_v7  ;;  %v8318_v53 = vld [vmem:[#allocation66_spill] sm:$0xff]  ;;  %v8319_v7 = vld [vmem:[#allocation61_spill] sm:$0xff] }
 0x282   :  { %1893 = vmatpush.bf16.msrb.mxu0 %v8309_v62  ;;  %1919 = vmatpush.bf16.msrb.mxu2 %v8310_v23  ;;  %v8320_v62 = vld [vmem:[#allocation63_spill] sm:$0xff]  ;;  %v8321_v23 = vld [vmem:[#allocation65_spill] sm:$0xff] }
 0x284   :  { %1905 = vmatpush.bf16.msrb.mxu1 %v8311_v33  ;;  %1931 = vmatpush.bf16.msrb.mxu3 %v8312_v32  ;;  %v8322_v33 = vld [vmem:[#allocation67_spill] sm:$0xff] }
 0x286   :  { %1894 = vmatpush.bf16.msrb.mxu0 %v8313_v42  ;;  %1920 = vmatpush.bf16.msrb.mxu2 %v8314_v44 }
 0x288   :  { %1906 = vmatpush.bf16.msrb.mxu1 %v8315_v40  ;;  %1932 = vmatpush.bf16.msrb.mxu3 %v8316_v16 }
 0x28a   :  { %1895 = vmatpush.bf16.msrb.mxu0 %v8317_v4  ;;  %1921 = vmatpush.bf16.msrb.mxu2 %v8318_v53  ;;  %v1500_v32 = vpop.f32.mrf.mxu0 }
 0x28c   :  { %1907 = vmatpush.bf16.msrb.mxu1 %v8319_v7  ;;  %1933 = vmatpush.bf16.msrb.mxu3 %v8320_v62  ;;  %v4094_v62 = vld [vmem:[%s7697_s0 + $0x90] sm:$0xff] }
 0x290   :  { %1908 = vmatpush.bf16.msrb.mxu1 %v8321_v23  ;;  %1934 = vmatpush.bf16.msrb.mxu3 %v8322_v33  ;;  %v1513_v42 = vpop.f32.mrf.mxu1  ;;  %v1526_v24 = vpop.f32.mrf.mxu2  ;;  %v4092_v33 = vld [vmem:[%s7697_s0 + $0x80] sm:$0xff] }
 0x291   :  { %v1527_v45 = vadd.f32 %v4093_v52, %v1526_v24 }
 0x292   :  { %v1502_v44 = vpop.f32.mrf.mxu0 }
 0x296   :  { %v1539_v56 = vpop.f32.mrf.mxu3 }
 0x298   :  { %v1515_v40 = vpop.f32.mrf.mxu1  ;;  %v1528_v14 = vpop.f32.mrf.mxu2 }
 0x299   :  { %v1501_v40 = vadd.f32 %v4092_v33, %v1500_v32 }
 0x29a   :  { %v1552_v16 = vpop.f32.mrf.mxu0 }
 0x29b   :  { %v1553_v23 = vadd.f32 %v4094_v62, %v1552_v16 }
 0x29e   :  { %v1541_v26 = vpop.f32.mrf.mxu3 }
 0x29f   :  { %v4095_v26 = vld [vmem:[%s7697_s0 + $0x98] sm:$0xff] }
 0x2a0   :  { %v1565_v4 = vpop.f32.mrf.mxu1  ;;  %v1578_v38 = vpop.f32.mrf.mxu2 }
 0x2a1   :  { %v1566_v22 = vadd.f32 %v1565_v4, %v1553_v23  ;;  %v1579_v62 = vadd.f32 %v4095_v26, %v1578_v38  ;;  %v1540_v23 = vadd.f32 %v1539_v56, %v1527_v45 }
 0x2a2   :  { %v1554_v53 = vpop.f32.mrf.mxu0 }
 0x2a3   :  { %v1514_v53 = vadd.f32 %v1513_v42, %v1501_v40  ;;  %v4102_v37 = vmul.f32 -1.442695, %v1566_v22  ;;  %v4101_v32 = vmul.f32 -1.442695, %v1540_v23 }
 0x2a5   :  { %4369 = vpow2.f32 %v4102_v37 }
 0x2a6   :  { %v1591_v7 = vpop.f32.mrf.mxu3 }
 0x2a7   :  { %v1592_v47 = vadd.f32 %v1591_v7, %v1579_v62 }
 0x2a8   :  { %v1567_v0 = vpop.f32.mrf.mxu1  ;;  %v1580_v44 = vpop.f32.mrf.mxu2 }
 0x2a9   :  { %v4100_v0 = vmul.f32 -1.442695, %v1514_v53  ;;  %v4103_v29 = vmul.f32 -1.442695, %v1592_v47 }
 0x2aa   :  { %v1604_v14 = vpop.f32.mrf.mxu0 }
 0x2ab   :  { %4371 = vpow2.f32 %v4100_v0  ;;  %v4370_v42 = vpop.eup %4369 }
 0x2ac   :  { %4373 = vpow2.f32 %v4103_v29  ;;  %v6352_v38 = vadd.f32 1.0, %v4370_v42 }
 0x2ad   :  { %4375 = vpow2.f32 %v4101_v32 }
 0x2ae   :  { %v1593_v16 = vpop.f32.mrf.mxu3  ;;  %4377 = vrcp.f32 %v6352_v38  ;;  %v1756_v28 = vand.u32 2147483648, %v6352_v38  ;;  %vm1750_vm1 = vweird.f32 %v6352_v38 }
 0x2af   :  { %v4098_v16 = vld [vmem:[%s7697_s0 + $0xb0] sm:$0xff] }
 0x2b0   :  { %v6348_v18 = vpop.f32.mrf.mxu2  ;;  %v1617_v4 = vpop.f32.mrf.mxu1 }
 0x2b1   :  { %v4372_v52 = vpop.eup %4371 }
 0x2b2   :  { %v1606_v44 = vpop.f32.mrf.mxu0  ;;  %v4374_v24 = vpop.eup %4373  ;;  %v6354_v7 = vadd.f32 1.0, %v4372_v52 }
 0x2b3   :  { %v4376_v37 = vpop.eup %4375  ;;  %v6357_v47 = vadd.f32 1.0, %v4374_v24 }
 0x2b4   :  { %4379 = vrcp.f32 %v6354_v7  ;;  %v6360_v29 = vadd.f32 1.0, %v4376_v37  ;;  %v6362_v56 = vpop.eup %4377  ;;  %vm1712_vm2 = vweird.f32 %v6354_v7 }
 0x2b5   :  { %4381 = vrcp.f32 %v6357_v47  ;;  %v1746_v26 = vmul.f32 %v6362_v56, %v6352_v38  ;;  %vm1751_vm0 = vweird.f32 %v6362_v56  ;;  %vm1765_vm8 = vweird.f32 %v6357_v47 }
 0x2b6   :  { %v6350_v33 = vpop.f32.mrf.mxu3  ;;  %4383 = vrcp.f32 %v6360_v29  ;;  %vm6401_vm3 = vmor %vm1750_vm1, %vm1751_vm0  ;;  %vm1727_vm12 = vweird.f32 %v6360_v29 }
 0x2b7   :  { %v1747_v44 = vsub.f32 1.0, %v1746_v26  ;;  %v4099_v26 = vld [vmem:[%s7697_s0 + $0xb8] sm:$0xff] }
 0x2b8   :  { %v1632_v40 = vpop.f32.mrf.mxu2  ;;  %v1619_v22 = vpop.f32.mrf.mxu1 }
 0x2b9   :  { %v4096_v22 = vld [vmem:[%s7697_s0 + $0xa0] sm:$0xff]  ;;  %v1748_v58 = vmul.f32 %v6362_v56, %v1747_v44 }
 0x2ba   :  { %v6368_v62 = vpop.eup %4379  ;;  %v1605_v46 = vadd.f32 %v4096_v22, %v1604_v14  ;;  %v1716_v22 = vand.u32 2147483647, %v6354_v7 }
 0x2bb   :  { %v6373_v0 = vpop.eup %4381  ;;  %v1708_v23 = vmul.f32 %v6368_v62, %v6354_v7  ;;  %v1749_v44 = vadd.f32 %v6362_v56, %v1748_v58  ;;  %vm1713_vm4 = vweird.f32 %v6368_v62  ;;  %v1733_v58 = vand.u32 2147483648, %v6360_v29 }
 0x2bc   :  { %v6377_v42 = vpop.eup %4383  ;;  %v1761_v40 = vmul.f32 %v6373_v0, %v6357_v47  ;;  %v1618_v61 = vadd.f32 %v1617_v4, %v1605_v46  ;;  %v1754_v46 = vand.u32 2147483647, %v6352_v38  ;;  %vm1766_vm5 = vweird.f32 %v6373_v0  ;;  %vm6420_vm7 = vmor %vm1712_vm2, %vm1713_vm4 }
 0x2bd   :  { %v1709_v37 = vsub.f32 1.0, %v1708_v23  ;;  %v1753_v38 = vsel %vm6401_vm3, %v6362_v56, %v1749_v44  ;;  %v1769_v56 = vand.u32 2147483647, %v6357_v47  ;;  %vm6429_vm9 = vmor %vm1765_vm8, %vm1766_vm5  ;;  %vm1717_vm10 = vcmp.eq.f32.partialorder %v1716_v22, 8.507059e+37 }
 0x2be   :  { %v1645_v45 = vpop.f32.mrf.mxu3  ;;  %v1762_v6 = vsub.f32 1.0, %v1761_v40  ;;  %vm1755_vm6 = vcmp.eq.f32.partialorder %v1754_v46, 8.507059e+37  ;;  %vm1728_vm11 = vweird.f32 %v6377_v42 }
 0x2bf   :  { %v1710_v23 = vmul.f32 %v6368_v62, %v1709_v37  ;;  %vm1770_vm13 = vcmp.eq.f32.partialorder %v1769_v56, 8.507059e+37  ;;  %vm1729_vm14 = vmor %vm1727_vm12, %vm1728_vm11 }
 0x2ca   :  { %v1656_v53 = vpop.f32.mrf.mxu0 }
 0x2cb   :  { %v1657_v32 = vadd.f32 %v4098_v16, %v1656_v53  ;;  %v1723_v16 = vmul.f32 %v6377_v42, %v6360_v29 }
 0x2d0   :  { %v1669_v52 = vpop.f32.mrf.mxu1  ;;  %v1682_v24 = vpop.f32.mrf.mxu2 }
 0x2d1   :  { %v1670_v45 = vadd.f32 %v1669_v52, %v1657_v32  ;;  %v1683_v25 = vadd.f32 %v4099_v26, %v1682_v24  ;;  %v4097_v32 = vld [vmem:[%s7697_s0 + $0xa8] sm:$0xff]  ;;  %v1757_v26 = vor.u32 1.1754944e-38, %v1756_v28 }
 0x2d2   :  { %v1658_v53 = vpop.f32.mrf.mxu0  ;;  %v1631_v24 = vadd.f32 %v4097_v32, %v6348_v18 }
 0x2d3   :  { %v4104_v17 = vmul.f32 -1.442695, %v1670_v45  ;;  %v1724_v53 = vsub.f32 1.0, %v1723_v16  ;;  %v1711_v45 = vadd.f32 %v6368_v62, %v1710_v23  ;;  %v1771_v23 = vand.u32 2147483648, %v6357_v47 }
 0x2d4   :  { %v1644_v16 = vadd.f32 %v6350_v33, %v1631_v24  ;;  %v1758_v28 = vsel %vm1755_vm6, %v1757_v26, %v1753_v38  ;;  %v1731_v24 = vand.u32 2147483647, %v6360_v29 }
 0x2d5   :  { %4385 = vpow2.f32 %v4104_v17  ;;  %v1763_v17 = vmul.f32 %v6373_v0, %v1762_v6  ;;  %v1718_v6 = vand.u32 2147483648, %v6354_v7  ;;  %v1715_v33 = vsel %vm6420_vm7, %v6368_v62, %v1711_v45 }
 0x2d6   :  { %v1695_v52 = vpop.f32.mrf.mxu3  ;;  %4387 = vtanh.f32 %v1618_v61  ;;  %vm1732_vm15 = vcmp.eq.f32.partialorder %v1731_v24, 8.507059e+37 }
 0x2d7   :  { %v1696_v14 = vadd.f32 %v1695_v52, %v1683_v25  ;;  %v1725_v52 = vmul.f32 %v6377_v42, %v1724_v53  ;;  %v1764_v61 = vadd.f32 %v6373_v0, %v1763_v17  ;;  %v1719_v7 = vor.u32 1.1754944e-38, %v1718_v6 }
 0x2d8   :  { %v1671_v4 = vpop.f32.mrf.mxu1  ;;  %v1684_v40 = vpop.f32.mrf.mxu2  ;;  %v1815_v17 = vmul.f32 %v1758_v28, %v6180_v10 }
 0x2d9   :  { %v4105_v25 = vmul.f32 -1.442695, %v1696_v14  ;;  %v1726_v46 = vadd.f32 %v6377_v42, %v1725_v52  ;;  %v1768_v47 = vsel %vm6429_vm9, %v6373_v0, %v1764_v61  ;;  %v1772_v4 = vor.u32 1.1754944e-38, %v1771_v23 }
 0x2da   :  { %v1720_v40 = vsel %vm1717_vm10, %v1719_v7, %v1715_v33 }
 0x2db   :  { %v4386_v37 = vpop.eup %4385  ;;  %4389 = vpow2.f32 %v4105_v25  ;;  %v1773_v25 = vsel %vm1770_vm13, %v1772_v4, %v1768_v47  ;;  %v1730_v38 = vsel %vm1729_vm14, %v6377_v42, %v1726_v46 }
 0x2dc   :  { %v1783_v18 = vadd.f32 1.0, %v4386_v37  ;;  %v4388_v53 = vpop.eup %4387  ;;  %v1734_v37 = vor.u32 1.1754944e-38, %v1733_v58 }
 0x2dd   :  { %v1817_v22 = vmul.f32 %v4388_v53, %v1720_v40 }
 0x2de   :  { %4391 = vrcp.f32 %v1783_v18  ;;  %v1697_v44 = vpop.f32.mrf.mxu3  ;;  %v1735_v52 = vsel %vm1732_vm15, %v1734_v37, %v1730_v38  ;;  %v1796_v23 = vand.u32 2147483648, %v1783_v18  ;;  %v1794_v28 = vand.u32 2147483647, %v1783_v18  ;;  %v8331_v37 = vld [vmem:[#allocation106_spill] sm:$0xff] }
 0x2df   :  { %4393 = vtanh.f32 %v1644_v16  ;;  %v6442_v6 = vadd.f32 %v1817_v22, %v1815_v17  ;;  %v1816_v16 = vmul.f32 %v1773_v25, %v6185_v13  ;;  %vm1790_vm1 = vweird.f32 %v1783_v18 }
 0x2e0   :  { %v1797_v53 = vor.u32 1.1754944e-38, %v1796_v23  ;;  %vm1795_vm3 = vcmp.eq.f32.partialorder %v1794_v28, 8.507059e+37  ;;  %v8337_v23 = vld [vmem:[#allocation110_spill] sm:$0xff]  ;;  %v8339_v28 = vld [vmem:[#allocation107_spill] sm:$0xff] }
 0x2e1   :  { %v4390_v62 = vpop.eup %4389 }
 0x2e2   :  { %v1784_v10 = vadd.f32 1.0, %v4390_v62 }
 0x2e4   :  { %v4392_v45 = vpop.eup %4391  ;;  %4395 = vrcp.f32 %v1784_v10  ;;  %v1811_v46 = vand.u32 2147483648, %v1784_v10  ;;  %v1809_v4 = vand.u32 2147483647, %v1784_v10  ;;  %vm1805_vm5 = vweird.f32 %v1784_v10 }
 0x2e5   :  { %v4394_v0 = vpop.eup %4393  ;;  %v1786_v26 = vmul.f32 %v4392_v45, %v1783_v18  ;;  %4397 = vtanh.f32 %v6442_v6  ;;  %vm1791_vm0 = vweird.f32 %v4392_v45 }
 0x2e6   :  { %v1818_v29 = vmul.f32 %v4394_v0, %v1735_v52  ;;  %vm1792_vm2 = vmor %vm1790_vm1, %vm1791_vm0  ;;  %v1812_v18 = vor.u32 1.1754944e-38, %v1811_v46  ;;  %vm1810_vm7 = vcmp.eq.f32.partialorder %v1809_v4, 8.507059e+37  ;;  %v8330_v0 = vld [vmem:[#allocation104_spill] sm:$0xff]  ;;  %v8334_v52 = vld [vmem:[#allocation101_spill] sm:$0xff] }
 0x2e7   :  { %v1787_v61 = vsub.f32 1.0, %v1786_v26  ;;  %v8332_v26 = vld [vmem:[#allocation97_spill] sm:$0xff]  ;;  %v8348_v46 = vld [vmem:[#allocation120_spill] sm:$0xff]  ;;  %v8351_v4 = vld [vmem:[#allocation119_spill] sm:$0xff] }
 0x2e8   :  { %v6447_v56 = vadd.f32 %v1818_v29, %v1816_v16  ;;  %v8333_v16 = vld [vmem:[#allocation99_spill] sm:$0xff]  ;;  %v8336_v29 = vld [vmem:[#allocation108_spill] sm:$0xff] }
 0x2e9   :  { %v1788_v32 = vmul.f32 %v4392_v45, %v1787_v61  ;;  %v8335_v61 = vld [vmem:[#allocation103_spill] sm:$0xff] }
 0x2ea   :  { %v4396_v33 = vpop.eup %4395  ;;  %4399 = vtanh.f32 %v6447_v56 }
 0x2eb   :  { %v1789_v42 = vadd.f32 %v4392_v45, %v1788_v32  ;;  %v1801_v44 = vmul.f32 %v4396_v33, %v1784_v10  ;;  %v4398_v7 = vpop.eup %4397  ;;  %vm1806_vm4 = vweird.f32 %v4396_v33  ;;  %v8329_v10 = vld [vmem:[#allocation95_spill] sm:$0xff]  ;;  %v8338_v32 = vld [vmem:[#allocation105_spill] sm:$0xff] }
 0x2ec   :  { %vm1807_vm6 = vmor %vm1805_vm5, %vm1806_vm4 }
 0x2ed   :  { %v1793_v14 = vsel %vm1792_vm2, %v4392_v45, %v1789_v42  ;;  %v1802_v13 = vsub.f32 1.0, %v1801_v44  ;;  %v8341_v42 = vld [vmem:[#allocation114_spill] sm:$0xff]  ;;  %v8342_v44 = vld [vmem:[#allocation109_spill] sm:$0xff] }
 0x2ee   :  { %v1798_v17 = vsel %vm1795_vm3, %v1797_v53, %v1793_v14  ;;  %v8343_v53 = vld [vmem:[#allocation111_spill] sm:$0xff]  ;;  %v8344_v14 = vld [vmem:[#allocation116_spill] sm:$0xff] }
 0x2ef   :  { %v1823_v47 = vmul.f32 %v4398_v7, %v1798_v17  ;;  %v1803_v62 = vmul.f32 %v4396_v33, %v1802_v13  ;;  %v8345_v13 = vld [vmem:[#allocation118_spill] sm:$0xff]  ;;  %v8346_v7 = vld [vmem:[#allocation113_spill] sm:$0xff]  ;;  %v8347_v17 = vld [vmem:[#allocation115_spill] sm:$0xff] }
 0x2f0   :  { %v4400_v24 = vpop.eup %4399 }
 0x2f1   :  { %v6450_v40 = vpack.c.bf16 %v1823_v47, %v1823_v47  ;;  %v1804_v58 = vadd.f32 %v4396_v33, %v1803_v62  ;;  %v8349_v47 = vld [vmem:[#allocation122_spill] sm:$0xff]  ;;  %v8350_v62 = vld [vmem:[#allocation117_spill] sm:$0xff] }
 0x2f3   :  { %v1808_v22 = vsel %vm1807_vm6, %v4396_v33, %v1804_v58  ;;  %1844 = vmatmul.bf16.vlgmr.msra.gmra.mxu0 %v6450_v40  ;;  %1870 = vmatmul.bf16.vlgmr.msra.gmra.mxu2 %v6450_v40  ;;  %v8340_v33 = vld [vmem:[#allocation112_spill] sm:$0xff] }
 0x2f4   :  { %v1813_v25 = vsel %vm1810_vm7, %v1812_v18, %v1808_v22  ;;  %1940 = vmatpush.bf16.msra.mxu0 %v8124_v11  ;;  %1966 = vmatpush.bf16.msra.mxu2 %v8125_v15  ;;  %v8352_v58 = vld [vmem:[#allocation124_spill] sm:$0xff]  ;;  %v8353_v18 = vld [vmem:[#allocation126_spill] sm:$0xff]  ;;  %v8354_v22 = vld [vmem:[#allocation121_spill] sm:$0xff] }
 0x2f5   :  { %v1824_v45 = vmul.f32 %v4400_v24, %v1813_v25  ;;  %v8355_v24 = vld [vmem:[#allocation123_spill] sm:$0xff]  ;;  %v8356_v25 = vld [vmem:[#allocation128_spill] sm:$0xff] }
 0x2f7   :  { %v6456_v38 = vpack.c.bf16 %v1824_v45, %v1824_v45  ;;  %v8357_v45 = vld [vmem:[#allocation130_spill] sm:$0xff] }
 0x2f8   :  { %1941 = vmatpush.bf16.msra.mxu0 %v8126_v48  ;;  %1967 = vmatpush.bf16.msra.mxu2 %v8127_v57 }
 0x2f9   :  { %1857 = vmatmul.bf16.vlgmr.msra.gmra.mxu1 %v6456_v38  ;;  %1883 = vmatmul.bf16.vlgmr.msra.gmra.mxu3 %v6456_v38 }
 0x2fa   :  { %1953 = vmatpush.bf16.msra.mxu1 %v8128_v63  ;;  %1979 = vmatpush.bf16.msra.mxu3 %v8129_v2 }
 0x2fc   :  { %1942 = vmatpush.bf16.msra.mxu0 %v8130_v20  ;;  %1968 = vmatpush.bf16.msra.mxu2 %v8131_v30 }
 0x2fe   :  { %1954 = vmatpush.bf16.msra.mxu1 %v8132_v60  ;;  %1980 = vmatpush.bf16.msra.mxu3 %v8133_v41 }
 0x300   :  { %1943 = vmatpush.bf16.msra.mxu0 %v8134_v54  ;;  %1969 = vmatpush.bf16.msra.mxu2 %v8135_v55 }
 0x302   :  { %1955 = vmatpush.bf16.msra.mxu1 %v8136_v31  ;;  %1981 = vmatpush.bf16.msra.mxu3 %v8137_v9 }
 0x303   :  { %1896 = vmatmul.bf16.vlgmr.msrb.gmra.mxu0 %v6450_v40  ;;  %1922 = vmatmul.bf16.vlgmr.msrb.gmra.mxu2 %v6450_v40 }
 0x304   :  { %1944 = vmatpush.bf16.msra.mxu0 %v8138_v1  ;;  %1970 = vmatpush.bf16.msra.mxu2 %v8139_v51 }
 0x306   :  { %1956 = vmatpush.bf16.msra.mxu1 %v8140_v39  ;;  %1982 = vmatpush.bf16.msra.mxu3 %v8141_v35 }
 0x308   :  { %1945 = vmatpush.bf16.msra.mxu0 %v8142_v5  ;;  %1971 = vmatpush.bf16.msra.mxu2 %v8143_v43 }
 0x309   :  { %1909 = vmatmul.bf16.vlgmr.msrb.gmra.mxu1 %v6456_v38  ;;  %1935 = vmatmul.bf16.vlgmr.msrb.gmra.mxu3 %v6456_v38 }
 0x30a   :  { %1957 = vmatpush.bf16.msra.mxu1 %v8144_v19  ;;  %1983 = vmatpush.bf16.msra.mxu3 %v8145_v59 }
 0x30c   :  { %1946 = vmatpush.bf16.msra.mxu0 %v8146_v27  ;;  %1972 = vmatpush.bf16.msra.mxu2 %v8226_v49 }
 0x30e   :  { %1958 = vmatpush.bf16.msra.mxu1 %v8227_v36  ;;  %1984 = vmatpush.bf16.msra.mxu3 %v8228_v34 }
 0x310   :  { %1947 = vmatpush.bf16.msra.mxu0 %v8229_v12  ;;  %1973 = vmatpush.bf16.msra.mxu2 %v8230_v50 }
 0x312   :  { %1959 = vmatpush.bf16.msra.mxu1 %v8233_v3  ;;  %1985 = vmatpush.bf16.msra.mxu3 %v8329_v10 }
 0x313   :  { %1948 = vmatmul.bf16.vlgmr.msra.gmra.mxu0 %v6450_v40  ;;  %1974 = vmatmul.bf16.vlgmr.msra.gmra.mxu2 %v6450_v40 }
 0x314   :  { %1992 = vmatpush.bf16.msrb.mxu0 %v8231_v21  ;;  %2018 = vmatpush.bf16.msrb.mxu2 %v8232_v8 }
 0x316   :  { %1960 = vmatpush.bf16.msra.mxu1 %v8332_v26  ;;  %1986 = vmatpush.bf16.msra.mxu3 %v8333_v16 }
 0x318   :  { %1993 = vmatpush.bf16.msrb.mxu0 %v8330_v0  ;;  %2019 = vmatpush.bf16.msrb.mxu2 %v8331_v37 }
 0x319   :  { %1961 = vmatmul.bf16.vlgmr.msra.gmra.mxu1 %v6456_v38  ;;  %1987 = vmatmul.bf16.vlgmr.msra.gmra.mxu3 %v6456_v38 }
 0x31a   :  { %2005 = vmatpush.bf16.msrb.mxu1 %v8334_v52  ;;  %2031 = vmatpush.bf16.msrb.mxu3 %v8335_v61 }
 0x31c   :  { %1994 = vmatpush.bf16.msrb.mxu0 %v8336_v29  ;;  %2020 = vmatpush.bf16.msrb.mxu2 %v8337_v23 }
 0x31e   :  { %2006 = vmatpush.bf16.msrb.mxu1 %v8338_v32  ;;  %2032 = vmatpush.bf16.msrb.mxu3 %v8339_v28 }
 0x320   :  { %1995 = vmatpush.bf16.msrb.mxu0 %v8340_v33  ;;  %2021 = vmatpush.bf16.msrb.mxu2 %v8341_v42  ;;  %v4107_v42 = vld [vmem:[%s7697_s0 + $0xc8] sm:$0xff] }
 0x322   :  { %2007 = vmatpush.bf16.msrb.mxu1 %v8342_v44  ;;  %2033 = vmatpush.bf16.msrb.mxu3 %v8343_v53 }
 0x324   :  { %1996 = vmatpush.bf16.msrb.mxu0 %v8344_v14  ;;  %2022 = vmatpush.bf16.msrb.mxu2 %v8345_v13 }
 0x326   :  { %2008 = vmatpush.bf16.msrb.mxu1 %v8346_v7  ;;  %2034 = vmatpush.bf16.msrb.mxu3 %v8347_v17  ;;  %v8358_v17 = vld [vmem:[#allocation4_spill] sm:$0xff] }
 0x328   :  { %1997 = vmatpush.bf16.msrb.mxu0 %v8348_v46  ;;  %2023 = vmatpush.bf16.msrb.mxu2 %v8349_v47  ;;  %v8359_v46 = vld [vmem:[#allocation6_spill] sm:$0xff]  ;;  %v8360_v47 = vld [vmem:[#allocation125_spill] sm:$0xff] }
 0x32a   :  { %2009 = vmatpush.bf16.msrb.mxu1 %v8350_v62  ;;  %2035 = vmatpush.bf16.msrb.mxu3 %v8351_v4  ;;  %v8361_v62 = vld [vmem:[#allocation127_spill] sm:$0xff] }
 0x32c   :  { %1998 = vmatpush.bf16.msrb.mxu0 %v8352_v58  ;;  %2024 = vmatpush.bf16.msrb.mxu2 %v8353_v18  ;;  %v8362_v18 = vld [vmem:[#allocation8_spill] sm:$0xff] }
 0x32e   :  { %2010 = vmatpush.bf16.msrb.mxu1 %v8354_v22  ;;  %2036 = vmatpush.bf16.msrb.mxu3 %v8355_v24  ;;  %v8363_v22 = vld [vmem:[#allocation10_spill] sm:$0xff]  ;;  %v8364_v24 = vld [vmem:[#allocation129_spill] sm:$0xff] }
 0x330   :  { %1999 = vmatpush.bf16.msrb.mxu0 %v8356_v25  ;;  %2025 = vmatpush.bf16.msrb.mxu2 %v8357_v45  ;;  %v8365_v25 = vld [vmem:[#allocation131_spill] sm:$0xff]  ;;  %v8366_v45 = vld [vmem:[#allocation5_spill] sm:$0xff] }
 0x332   :  { %2011 = vmatpush.bf16.msrb.mxu1 %v8360_v47  ;;  %2037 = vmatpush.bf16.msrb.mxu3 %v8361_v62  ;;  %v8368_v62 = vld [vmem:[#allocation12_spill] sm:$0xff]  ;;  %v8369_v47 = vld [vmem:[#allocation14_spill] sm:$0xff] }
 0x333   :  { %2000 = vmatmul.bf16.vlgmr.msrb.gmra.mxu0 %v6450_v40  ;;  %2026 = vmatmul.bf16.vlgmr.msrb.gmra.mxu2 %v6450_v40  ;;  %v8370_v40 = vld [vmem:[#allocation9_spill] sm:$0xff] }
 0x334   :  { %2181 = vmatpush.bf16.msra.mxu0 %v8358_v17  ;;  %2207 = vmatpush.bf16.msra.mxu2 %v8359_v46  ;;  %v8367_v17 = vld [vmem:[#allocation7_spill] sm:$0xff]  ;;  %v8377_v46 = vld [vmem:[#allocation22_spill] sm:$0xff] }
 0x336   :  { %2012 = vmatpush.bf16.msrb.mxu1 %v8364_v24  ;;  %2038 = vmatpush.bf16.msrb.mxu3 %v8365_v25  ;;  %v8373_v24 = vld [vmem:[#allocation18_spill] sm:$0xff]  ;;  %v8374_v25 = vld [vmem:[#allocation13_spill] sm:$0xff] }
 0x338   :  { %2182 = vmatpush.bf16.msra.mxu0 %v8362_v18  ;;  %2208 = vmatpush.bf16.msra.mxu2 %v8363_v22  ;;  %v8371_v18 = vld [vmem:[#allocation11_spill] sm:$0xff]  ;;  %v8372_v22 = vld [vmem:[#allocation16_spill] sm:$0xff] }
 0x339   :  { %2013 = vmatmul.bf16.vlgmr.msrb.gmra.mxu1 %v6456_v38  ;;  %2039 = vmatmul.bf16.vlgmr.msrb.gmra.mxu3 %v6456_v38  ;;  %v8378_v38 = vld [vmem:[#allocation17_spill] sm:$0xff] }
 0x33a   :  { %2194 = vmatpush.bf16.msra.mxu1 %v8366_v45  ;;  %2220 = vmatpush.bf16.msra.mxu3 %v8367_v17  ;;  %v8375_v45 = vld [vmem:[#allocation15_spill] sm:$0xff]  ;;  %v8376_v17 = vld [vmem:[#allocation20_spill] sm:$0xff] }
 0x33c   :  { %2183 = vmatpush.bf16.msra.mxu0 %v8368_v62  ;;  %2209 = vmatpush.bf16.msra.mxu2 %v8369_v47  ;;  %v8379_v62 = vld [vmem:[#allocation19_spill] sm:$0xff]  ;;  %v8380_v47 = vld [vmem:[#allocation24_spill] sm:$0xff] }
 0x33e   :  { %2195 = vmatpush.bf16.msra.mxu1 %v8370_v40  ;;  %2221 = vmatpush.bf16.msra.mxu3 %v8371_v18  ;;  %v8381_v40 = vld [vmem:[#allocation26_spill] sm:$0xff]  ;;  %v8382_v18 = vld [vmem:[#allocation21_spill] sm:$0xff] }
 0x340   :  { %2184 = vmatpush.bf16.msra.mxu0 %v8372_v22  ;;  %2210 = vmatpush.bf16.msra.mxu2 %v8373_v24  ;;  %v8383_v22 = vld [vmem:[#allocation23_spill] sm:$0xff]  ;;  %v8384_v24 = vld [vmem:[#allocation28_spill] sm:$0xff] }
 0x342   :  { %2196 = vmatpush.bf16.msra.mxu1 %v8374_v25  ;;  %2222 = vmatpush.bf16.msra.mxu3 %v8375_v45  ;;  %v8385_v25 = vld [vmem:[#allocation30_spill] sm:$0xff]  ;;  %v8386_v45 = vld [vmem:[#allocation25_spill] sm:$0xff] }
 0x344   :  { %2185 = vmatpush.bf16.msra.mxu0 %v8376_v17  ;;  %2211 = vmatpush.bf16.msra.mxu2 %v8377_v46  ;;  %v8387_v17 = vld [vmem:[#allocation27_spill] sm:$0xff]  ;;  %v8388_v46 = vld [vmem:[#allocation32_spill] sm:$0xff] }
 0x346   :  { %2197 = vmatpush.bf16.msra.mxu1 %v8378_v38  ;;  %2223 = vmatpush.bf16.msra.mxu3 %v8379_v62  ;;  %v8389_v38 = vld [vmem:[#allocation34_spill] sm:$0xff]  ;;  %v8390_v62 = vld [vmem:[#allocation36_spill] sm:$0xff] }
 0x348   :  { %2186 = vmatpush.bf16.msra.mxu0 %v8380_v47  ;;  %2212 = vmatpush.bf16.msra.mxu2 %v8381_v40  ;;  %v8391_v47 = vld [vmem:[#allocation38_spill] sm:$0xff]  ;;  %v8392_v40 = vld [vmem:[#allocation29_spill] sm:$0xff] }
 0x34a   :  { %2198 = vmatpush.bf16.msra.mxu1 %v8382_v18  ;;  %2224 = vmatpush.bf16.msra.mxu3 %v8383_v22  ;;  %v8393_v18 = vld [vmem:[#allocation31_spill] sm:$0xff]  ;;  %v8394_v22 = vld [vmem:[#allocation40_spill] sm:$0xff] }
 0x34c   :  { %2187 = vmatpush.bf16.msra.mxu0 %v8384_v24  ;;  %2213 = vmatpush.bf16.msra.mxu2 %v8385_v25  ;;  %v8395_v24 = vld [vmem:[#allocation42_spill] sm:$0xff]  ;;  %v8396_v25 = vld [vmem:[#allocation33_spill] sm:$0xff] }
 0x34e   :  { %2199 = vmatpush.bf16.msra.mxu1 %v8386_v45  ;;  %2225 = vmatpush.bf16.msra.mxu3 %v8387_v17  ;;  %v8397_v45 = vld [vmem:[#allocation35_spill] sm:$0xff]  ;;  %v8398_v17 = vld [vmem:[#allocation37_spill] sm:$0xff] }
 0x350   :  { %2188 = vmatpush.bf16.msra.mxu0 %v8388_v46  ;;  %2214 = vmatpush.bf16.msra.mxu2 %v8389_v38  ;;  %v8399_v46 = vld [vmem:[#allocation39_spill] sm:$0xff]  ;;  %v8400_v38 = vld [vmem:[#allocation44_spill] sm:$0xff] }
 0x352   :  { %2200 = vmatpush.bf16.msra.mxu1 %v8392_v40  ;;  %2226 = vmatpush.bf16.msra.mxu3 %v8393_v18  ;;  %v8403_v40 = vld [vmem:[#allocation43_spill] sm:$0xff]  ;;  %v8404_v18 = vld [vmem:[#allocation48_spill] sm:$0xff] }
 0x354   :  { %2233 = vmatpush.bf16.msrb.mxu0 %v8390_v62  ;;  %2259 = vmatpush.bf16.msrb.mxu2 %v8391_v47  ;;  %v8401_v62 = vld [vmem:[#allocation46_spill] sm:$0xff]  ;;  %v8402_v47 = vld [vmem:[#allocation41_spill] sm:$0xff] }
 0x356   :  { %2201 = vmatpush.bf16.msra.mxu1 %v8396_v25  ;;  %2227 = vmatpush.bf16.msra.mxu3 %v8397_v45  ;;  %v8407_v25 = vld [vmem:[#allocation47_spill] sm:$0xff]  ;;  %v8408_v45 = vld [vmem:[#allocation52_spill] sm:$0xff] }
 0x358   :  { %2234 = vmatpush.bf16.msrb.mxu0 %v8394_v22  ;;  %2260 = vmatpush.bf16.msrb.mxu2 %v8395_v24  ;;  %v8405_v22 = vld [vmem:[#allocation50_spill] sm:$0xff]  ;;  %v8406_v24 = vld [vmem:[#allocation45_spill] sm:$0xff] }
 0x35a   :  { %2246 = vmatpush.bf16.msrb.mxu1 %v8398_v17  ;;  %2272 = vmatpush.bf16.msrb.mxu3 %v8399_v46  ;;  %v8409_v17 = vld [vmem:[#allocation54_spill] sm:$0xff]  ;;  %v8410_v46 = vld [vmem:[#allocation49_spill] sm:$0xff] }
 0x35c   :  { %2235 = vmatpush.bf16.msrb.mxu0 %v8400_v38  ;;  %2261 = vmatpush.bf16.msrb.mxu2 %v8401_v62  ;;  %v8411_v38 = vld [vmem:[#allocation51_spill] sm:$0xff]  ;;  %v8412_v62 = vld [vmem:[#allocation56_spill] sm:$0xff] }
 0x35e   :  { %2247 = vmatpush.bf16.msrb.mxu1 %v8402_v47  ;;  %2273 = vmatpush.bf16.msrb.mxu3 %v8403_v40  ;;  %v8413_v47 = vld [vmem:[#allocation58_spill] sm:$0xff]  ;;  %v8414_v40 = vld [vmem:[#allocation53_spill] sm:$0xff] }
 0x360   :  { %2236 = vmatpush.bf16.msrb.mxu0 %v8404_v18  ;;  %2262 = vmatpush.bf16.msrb.mxu2 %v8405_v22  ;;  %v8415_v18 = vld [vmem:[#allocation55_spill] sm:$0xff]  ;;  %v8416_v22 = vld [vmem:[#allocation60_spill] sm:$0xff] }
 0x362   :  { %2248 = vmatpush.bf16.msrb.mxu1 %v8406_v24  ;;  %2274 = vmatpush.bf16.msrb.mxu3 %v8407_v25  ;;  %v8417_v24 = vld [vmem:[#allocation62_spill] sm:$0xff]  ;;  %v8418_v25 = vld [vmem:[#allocation57_spill] sm:$0xff] }
 0x364   :  { %2237 = vmatpush.bf16.msrb.mxu0 %v8408_v45  ;;  %2263 = vmatpush.bf16.msrb.mxu2 %v8409_v17  ;;  %v8419_v45 = vld [vmem:[#allocation59_spill] sm:$0xff]  ;;  %v8420_v17 = vld [vmem:[#allocation64_spill] sm:$0xff] }
 0x366   :  { %2249 = vmatpush.bf16.msrb.mxu1 %v8410_v46  ;;  %2275 = vmatpush.bf16.msrb.mxu3 %v8411_v38  ;;  %v8421_v46 = vld [vmem:[#allocation66_spill] sm:$0xff]  ;;  %v8422_v38 = vld [vmem:[#allocation61_spill] sm:$0xff] }
 0x368   :  { %2238 = vmatpush.bf16.msrb.mxu0 %v8412_v62  ;;  %2264 = vmatpush.bf16.msrb.mxu2 %v8413_v47  ;;  %v8423_v62 = vld [vmem:[#allocation63_spill] sm:$0xff]  ;;  %v8424_v47 = vld [vmem:[#allocation65_spill] sm:$0xff] }
 0x36a   :  { %2250 = vmatpush.bf16.msrb.mxu1 %v8414_v40  ;;  %2276 = vmatpush.bf16.msrb.mxu3 %v8415_v18  ;;  %v8425_v40 = vld [vmem:[#allocation67_spill] sm:$0xff] }
 0x36c   :  { %2239 = vmatpush.bf16.msrb.mxu0 %v8416_v22  ;;  %2265 = vmatpush.bf16.msrb.mxu2 %v8417_v24 }
 0x36e   :  { %2251 = vmatpush.bf16.msrb.mxu1 %v8418_v25  ;;  %2277 = vmatpush.bf16.msrb.mxu3 %v8419_v45 }
 0x370   :  { %2240 = vmatpush.bf16.msrb.mxu0 %v8420_v17  ;;  %2266 = vmatpush.bf16.msrb.mxu2 %v8421_v46  ;;  %v1845_v18 = vpop.f32.mrf.mxu0 }
 0x372   :  { %2252 = vmatpush.bf16.msrb.mxu1 %v8422_v38  ;;  %2278 = vmatpush.bf16.msrb.mxu3 %v8423_v62  ;;  %v4108_v62 = vld [vmem:[%s7697_s0 + $0xd0] sm:$0xff] }
 0x376   :  { %2253 = vmatpush.bf16.msrb.mxu1 %v8424_v47  ;;  %2279 = vmatpush.bf16.msrb.mxu3 %v8425_v40  ;;  %v1858_v22 = vpop.f32.mrf.mxu1  ;;  %v1871_v58 = vpop.f32.mrf.mxu2  ;;  %v4106_v40 = vld [vmem:[%s7697_s0 + $0xc0] sm:$0xff] }
 0x377   :  { %v1872_v32 = vadd.f32 %v4107_v42, %v1871_v58 }
 0x378   :  { %v1847_v24 = vpop.f32.mrf.mxu0 }
 0x37c   :  { %v1884_v4 = vpop.f32.mrf.mxu3 }
 0x37e   :  { %v1860_v25 = vpop.f32.mrf.mxu1  ;;  %v1873_v7 = vpop.f32.mrf.mxu2 }
 0x37f   :  { %v1846_v25 = vadd.f32 %v4106_v40, %v1845_v18 }
 0x380   :  { %v1897_v45 = vpop.f32.mrf.mxu0 }
 0x381   :  { %v1898_v47 = vadd.f32 %v4108_v62, %v1897_v45 }
 0x384   :  { %v1886_v13 = vpop.f32.mrf.mxu3 }
 0x385   :  { %v4109_v13 = vld [vmem:[%s7697_s0 + $0xd8] sm:$0xff] }
 0x386   :  { %v1910_v17 = vpop.f32.mrf.mxu1  ;;  %v1923_v14 = vpop.f32.mrf.mxu2 }
 0x387   :  { %v1911_v44 = vadd.f32 %v1910_v17, %v1898_v47  ;;  %v1924_v62 = vadd.f32 %v4109_v13, %v1923_v14  ;;  %v1885_v47 = vadd.f32 %v1884_v4, %v1872_v32 }
 0x388   :  { %v1899_v46 = vpop.f32.mrf.mxu0 }
 0x389   :  { %v1859_v46 = vadd.f32 %v1858_v22, %v1846_v25  ;;  %v4116_v33 = vmul.f32 -1.442695, %v1911_v44  ;;  %v4115_v18 = vmul.f32 -1.442695, %v1885_v47 }
 0x38b   :  { %4401 = vpow2.f32 %v4116_v33 }
 0x38c   :  { %v1936_v38 = vpop.f32.mrf.mxu3 }
 0x38d   :  { %v1937_v28 = vadd.f32 %v1936_v38, %v1924_v62 }
 0x38e   :  { %v1912_v53 = vpop.f32.mrf.mxu1  ;;  %v1925_v24 = vpop.f32.mrf.mxu2 }
 0x38f   :  { %v4114_v53 = vmul.f32 -1.442695, %v1859_v46  ;;  %v4117_v29 = vmul.f32 -1.442695, %v1937_v28 }
 0x390   :  { %v1949_v7 = vpop.f32.mrf.mxu0 }
 0x391   :  { %4403 = vpow2.f32 %v4114_v53  ;;  %v4402_v22 = vpop.eup %4401 }
 0x392   :  { %4405 = vpow2.f32 %v4117_v29  ;;  %v6614_v14 = vadd.f32 1.0, %v4402_v22 }
 0x393   :  { %4407 = vpow2.f32 %v4115_v18 }
 0x394   :  { %v1938_v45 = vpop.f32.mrf.mxu3  ;;  %4409 = vrcp.f32 %v6614_v14  ;;  %v2101_v10 = vand.u32 2147483648, %v6614_v14  ;;  %vm2095_vm9 = vweird.f32 %v6614_v14 }
 0x395   :  { %v4112_v45 = vld [vmem:[%s7697_s0 + $0xf0] sm:$0xff] }
 0x396   :  { %v6610_v23 = vpop.f32.mrf.mxu2  ;;  %v1962_v17 = vpop.f32.mrf.mxu1 }
 0x397   :  { %v4404_v42 = vpop.eup %4403 }
 0x398   :  { %v1951_v24 = vpop.f32.mrf.mxu0  ;;  %v4406_v58 = vpop.eup %4405  ;;  %v6616_v38 = vadd.f32 1.0, %v4404_v42 }
 0x399   :  { %v4408_v33 = vpop.eup %4407  ;;  %v6619_v28 = vadd.f32 1.0, %v4406_v58 }
 0x39a   :  { %4411 = vrcp.f32 %v6616_v38  ;;  %v6622_v29 = vadd.f32 1.0, %v4408_v33  ;;  %v6624_v4 = vpop.eup %4409  ;;  %vm2057_vm10 = vweird.f32 %v6616_v38 }
 0x39b   :  { %4413 = vrcp.f32 %v6619_v28  ;;  %v2091_v13 = vmul.f32 %v6624_v4, %v6614_v14  ;;  %vm2096_vm8 = vweird.f32 %v6624_v4  ;;  %vm2110_vm0 = vweird.f32 %v6619_v28 }
 0x39c   :  { %v6612_v40 = vpop.f32.mrf.mxu3  ;;  %4415 = vrcp.f32 %v6622_v29  ;;  %vm6663_vm11 = vmor %vm2095_vm9, %vm2096_vm8  ;;  %vm2072_vm4 = vweird.f32 %v6622_v29 }
 0x39d   :  { %v2092_v24 = vsub.f32 1.0, %v2091_v13  ;;  %v4113_v13 = vld [vmem:[%s7697_s0 + $0xf8] sm:$0xff] }
 0x39e   :  { %v1977_v25 = vpop.f32.mrf.mxu2  ;;  %v1964_v44 = vpop.f32.mrf.mxu1 }
 0x39f   :  { %v4110_v44 = vld [vmem:[%s7697_s0 + $0xe0] sm:$0xff]  ;;  %v2093_v61 = vmul.f32 %v6624_v4, %v2092_v24 }
 0x3a0   :  { %v6630_v62 = vpop.eup %4411  ;;  %v1950_v52 = vadd.f32 %v4110_v44, %v1949_v7  ;;  %v2061_v44 = vand.u32 2147483647, %v6616_v38 }
 0x3a1   :  { %v6635_v53 = vpop.eup %4413  ;;  %v2053_v47 = vmul.f32 %v6630_v62, %v6616_v38  ;;  %v2094_v24 = vadd.f32 %v6624_v4, %v2093_v61  ;;  %vm2058_vm12 = vweird.f32 %v6630_v62  ;;  %v2078_v61 = vand.u32 2147483648, %v6622_v29 }
 0x3a2   :  { %v6639_v22 = vpop.eup %4415  ;;  %v2106_v25 = vmul.f32 %v6635_v53, %v6619_v28  ;;  %v1963_v37 = vadd.f32 %v1962_v17, %v1950_v52  ;;  %v2099_v52 = vand.u32 2147483647, %v6614_v14  ;;  %vm2111_vm13 = vweird.f32 %v6635_v53  ;;  %vm6682_vm15 = vmor %vm2057_vm10, %vm2058_vm12 }
 0x3a3   :  { %v2054_v33 = vsub.f32 1.0, %v2053_v47  ;;  %v2098_v14 = vsel %vm6663_vm11, %v6624_v4, %v2094_v24  ;;  %v2114_v4 = vand.u32 2147483647, %v6619_v28  ;;  %vm6691_vm1 = vmor %vm2110_vm0, %vm2111_vm13  ;;  %vm2062_vm2 = vcmp.eq.f32.partialorder %v2061_v44, 8.507059e+37 }
 0x3a4   :  { %v1990_v32 = vpop.f32.mrf.mxu3  ;;  %v2107_v26 = vsub.f32 1.0, %v2106_v25  ;;  %vm2100_vm14 = vcmp.eq.f32.partialorder %v2099_v52, 8.507059e+37  ;;  %vm2073_vm3 = vweird.f32 %v6639_v22 }
 0x3a5   :  { %v2055_v47 = vmul.f32 %v6630_v62, %v2054_v33  ;;  %vm2115_vm5 = vcmp.eq.f32.partialorder %v2114_v4, 8.507059e+37  ;;  %vm2074_vm6 = vmor %vm2072_vm4, %vm2073_vm3 }
 0x3b0   :  { %v2001_v46 = vpop.f32.mrf.mxu0 }
 0x3b1   :  { %v2002_v18 = vadd.f32 %v4112_v45, %v2001_v46  ;;  %v2068_v45 = vmul.f32 %v6639_v22, %v6622_v29 }
 0x3b6   :  { %v2014_v42 = vpop.f32.mrf.mxu1  ;;  %v2027_v58 = vpop.f32.mrf.mxu2 }
 0x3b7   :  { %v2015_v32 = vadd.f32 %v2014_v42, %v2002_v18  ;;  %v2028_v0 = vadd.f32 %v4113_v13, %v2027_v58  ;;  %v4111_v18 = vld [vmem:[%s7697_s0 + $0xe8] sm:$0xff]  ;;  %v2102_v13 = vor.u32 1.1754944e-38, %v2101_v10 }
 0x3b8   :  { %v2003_v46 = vpop.f32.mrf.mxu0  ;;  %v1976_v58 = vadd.f32 %v4111_v18, %v6610_v23 }
 0x3b9   :  { %v4118_v16 = vmul.f32 -1.442695, %v2015_v32  ;;  %v2069_v46 = vsub.f32 1.0, %v2068_v45  ;;  %v2056_v32 = vadd.f32 %v6630_v62, %v2055_v47  ;;  %v2116_v47 = vand.u32 2147483648, %v6619_v28 }
 0x3ba   :  { %v1989_v45 = vadd.f32 %v6612_v40, %v1976_v58  ;;  %v2103_v10 = vsel %vm2100_vm14, %v2102_v13, %v2098_v14  ;;  %v2076_v58 = vand.u32 2147483647, %v6622_v29 }
 0x3bb   :  { %4417 = vpow2.f32 %v4118_v16  ;;  %v2108_v16 = vmul.f32 %v6635_v53, %v2107_v26  ;;  %v2063_v26 = vand.u32 2147483648, %v6616_v38  ;;  %v2060_v40 = vsel %vm6682_vm15, %v6630_v62, %v2056_v32 }
 0x3bc   :  { %v2040_v42 = vpop.f32.mrf.mxu3  ;;  %4419 = vtanh.f32 %v1963_v37  ;;  %vm2077_vm7 = vcmp.eq.f32.partialorder %v2076_v58, 8.507059e+37 }
 0x3bd   :  { %v2041_v7 = vadd.f32 %v2040_v42, %v2028_v0  ;;  %v2070_v42 = vmul.f32 %v6639_v22, %v2069_v46  ;;  %v2109_v37 = vadd.f32 %v6635_v53, %v2108_v16  ;;  %v2064_v38 = vor.u32 1.1754944e-38, %v2063_v26 }
 0x3be   :  { %v2016_v17 = vpop.f32.mrf.mxu1  ;;  %v2029_v25 = vpop.f32.mrf.mxu2  ;;  %v2160_v16 = vmul.f32 %v2103_v10, %v6442_v6 }
 0x3bf   :  { %v4119_v0 = vmul.f32 -1.442695, %v2041_v7  ;;  %v2071_v52 = vadd.f32 %v6639_v22, %v2070_v42  ;;  %v2113_v28 = vsel %vm6691_vm1, %v6635_v53, %v2109_v37  ;;  %v2117_v17 = vor.u32 1.1754944e-38, %v2116_v47 }
 0x3c0   :  { %v2065_v25 = vsel %vm2062_vm2, %v2064_v38, %v2060_v40 }
 0x3c1   :  { %v4418_v33 = vpop.eup %4417  ;;  %4421 = vpow2.f32 %v4119_v0  ;;  %v2118_v0 = vsel %vm2115_vm5, %v2117_v17, %v2113_v28  ;;  %v2075_v14 = vsel %vm2074_vm6, %v6639_v22, %v2071_v52 }
 0x3c2   :  { %v2128_v23 = vadd.f32 1.0, %v4418_v33  ;;  %v4420_v46 = vpop.eup %4419  ;;  %v2079_v33 = vor.u32 1.1754944e-38, %v2078_v61 }
 0x3c3   :  { %v2162_v44 = vmul.f32 %v4420_v46, %v2065_v25 }
 0x3c4   :  { %4423 = vrcp.f32 %v2128_v23  ;;  %v2042_v24 = vpop.f32.mrf.mxu3  ;;  %v2080_v42 = vsel %vm2077_vm7, %v2079_v33, %v2075_v14  ;;  %v2141_v47 = vand.u32 2147483648, %v2128_v23  ;;  %v2139_v10 = vand.u32 2147483647, %v2128_v23  ;;  %v8434_v33 = vld [vmem:[#allocation106_spill] sm:$0xff] }
 0x3c5   :  { %4425 = vtanh.f32 %v1989_v45  ;;  %v6704_v26 = vadd.f32 %v2162_v44, %v2160_v16  ;;  %v2161_v45 = vmul.f32 %v2118_v0, %v6447_v56  ;;  %vm2135_vm9 = vweird.f32 %v2128_v23 }
 0x3c6   :  { %v2142_v46 = vor.u32 1.1754944e-38, %v2141_v47  ;;  %vm2140_vm11 = vcmp.eq.f32.partialorder %v2139_v10, 8.507059e+37  ;;  %v8440_v47 = vld [vmem:[#allocation110_spill] sm:$0xff]  ;;  %v8442_v10 = vld [vmem:[#allocation107_spill] sm:$0xff] }
 0x3c7   :  { %v4422_v62 = vpop.eup %4421 }
 0x3c8   :  { %v2129_v6 = vadd.f32 1.0, %v4422_v62 }
 0x3ca   :  { %v4424_v32 = vpop.eup %4423  ;;  %4427 = vrcp.f32 %v2129_v6  ;;  %v2156_v52 = vand.u32 2147483648, %v2129_v6  ;;  %v2154_v17 = vand.u32 2147483647, %v2129_v6  ;;  %vm2150_vm13 = vweird.f32 %v2129_v6 }
 0x3cb   :  { %v4426_v53 = vpop.eup %4425  ;;  %v2131_v13 = vmul.f32 %v4424_v32, %v2128_v23  ;;  %4429 = vtanh.f32 %v6704_v26  ;;  %vm2136_vm8 = vweird.f32 %v4424_v32 }
 0x3cc   :  { %v2163_v29 = vmul.f32 %v4426_v53, %v2080_v42  ;;  %vm2137_vm10 = vmor %vm2135_vm9, %vm2136_vm8  ;;  %v2157_v23 = vor.u32 1.1754944e-38, %v2156_v52  ;;  %vm2155_vm15 = vcmp.eq.f32.partialorder %v2154_v17, 8.507059e+37  ;;  %v8433_v53 = vld [vmem:[#allocation104_spill] sm:$0xff]  ;;  %v8437_v42 = vld [vmem:[#allocation101_spill] sm:$0xff] }
 0x3cd   :  { %v2132_v37 = vsub.f32 1.0, %v2131_v13  ;;  %v8435_v13 = vld [vmem:[#allocation97_spill] sm:$0xff]  ;;  %v8451_v52 = vld [vmem:[#allocation120_spill] sm:$0xff]  ;;  %v8454_v17 = vld [vmem:[#allocation119_spill] sm:$0xff] }
 0x3ce   :  { %v6709_v4 = vadd.f32 %v2163_v29, %v2161_v45  ;;  %v8436_v45 = vld [vmem:[#allocation99_spill] sm:$0xff]  ;;  %v8439_v29 = vld [vmem:[#allocation108_spill] sm:$0xff] }
 0x3cf   :  { %v2133_v18 = vmul.f32 %v4424_v32, %v2132_v37  ;;  %v8438_v37 = vld [vmem:[#allocation103_spill] sm:$0xff] }
 0x3d0   :  { %v4428_v40 = vpop.eup %4427  ;;  %4431 = vtanh.f32 %v6709_v4 }
 0x3d1   :  { %v2134_v22 = vadd.f32 %v4424_v32, %v2133_v18  ;;  %v2146_v24 = vmul.f32 %v4428_v40, %v2129_v6  ;;  %v4430_v38 = vpop.eup %4429  ;;  %vm2151_vm12 = vweird.f32 %v4428_v40  ;;  %v8432_v6 = vld [vmem:[#allocation95_spill] sm:$0xff]  ;;  %v8441_v18 = vld [vmem:[#allocation105_spill] sm:$0xff] }
 0x3d2   :  { %vm2152_vm14 = vmor %vm2150_vm13, %vm2151_vm12 }
 0x3d3   :  { %v2138_v7 = vsel %vm2137_vm10, %v4424_v32, %v2134_v22  ;;  %v2147_v56 = vsub.f32 1.0, %v2146_v24  ;;  %v8444_v22 = vld [vmem:[#allocation114_spill] sm:$0xff]  ;;  %v8445_v24 = vld [vmem:[#allocation109_spill] sm:$0xff] }
 0x3d4   :  { %v2143_v16 = vsel %vm2140_vm11, %v2142_v46, %v2138_v7  ;;  %v8446_v46 = vld [vmem:[#allocation111_spill] sm:$0xff]  ;;  %v8447_v7 = vld [vmem:[#allocation116_spill] sm:$0xff] }
 0x3d5   :  { %v2168_v28 = vmul.f32 %v4430_v38, %v2143_v16  ;;  %v2148_v62 = vmul.f32 %v4428_v40, %v2147_v56  ;;  %v8448_v56 = vld [vmem:[#allocation118_spill] sm:$0xff]  ;;  %v8449_v38 = vld [vmem:[#allocation113_spill] sm:$0xff]  ;;  %v8450_v16 = vld [vmem:[#allocation115_spill] sm:$0xff] }
 0x3d6   :  { %v4432_v58 = vpop.eup %4431 }
 0x3d7   :  { %v6712_v25 = vpack.c.bf16 %v2168_v28, %v2168_v28  ;;  %v2149_v61 = vadd.f32 %v4428_v40, %v2148_v62  ;;  %v8452_v28 = vld [vmem:[#allocation122_spill] sm:$0xff]  ;;  %v8453_v62 = vld [vmem:[#allocation117_spill] sm:$0xff] }
 0x3d9   :  { %v2153_v44 = vsel %vm2152_vm14, %v4428_v40, %v2149_v61  ;;  %2189 = vmatmul.bf16.vlgmr.msra.gmra.mxu0 %v6712_v25  ;;  %2215 = vmatmul.bf16.vlgmr.msra.gmra.mxu2 %v6712_v25  ;;  %v8443_v40 = vld [vmem:[#allocation112_spill] sm:$0xff] }
 0x3da   :  { %v2158_v0 = vsel %vm2155_vm15, %v2157_v23, %v2153_v44  ;;  %2285 = vmatpush.bf16.msra.mxu0 %v8124_v11  ;;  %2311 = vmatpush.bf16.msra.mxu2 %v8125_v15  ;;  %v8455_v61 = vld [vmem:[#allocation124_spill] sm:$0xff]  ;;  %v8456_v23 = vld [vmem:[#allocation126_spill] sm:$0xff]  ;;  %v8457_v44 = vld [vmem:[#allocation121_spill] sm:$0xff] }
 0x3db   :  { %v2169_v32 = vmul.f32 %v4432_v58, %v2158_v0  ;;  %v8458_v58 = vld [vmem:[#allocation123_spill] sm:$0xff]  ;;  %v8459_v0 = vld [vmem:[#allocation128_spill] sm:$0xff] }
 0x3dd   :  { %v6718_v14 = vpack.c.bf16 %v2169_v32, %v2169_v32  ;;  %v8460_v32 = vld [vmem:[#allocation130_spill] sm:$0xff] }
 0x3de   :  { %2286 = vmatpush.bf16.msra.mxu0 %v8126_v48  ;;  %2312 = vmatpush.bf16.msra.mxu2 %v8127_v57 }
 0x3df   :  { %2202 = vmatmul.bf16.vlgmr.msra.gmra.mxu1 %v6718_v14  ;;  %2228 = vmatmul.bf16.vlgmr.msra.gmra.mxu3 %v6718_v14 }
 0x3e0   :  { %2298 = vmatpush.bf16.msra.mxu1 %v8128_v63  ;;  %2324 = vmatpush.bf16.msra.mxu3 %v8129_v2 }
 0x3e2   :  { %2287 = vmatpush.bf16.msra.mxu0 %v8130_v20  ;;  %2313 = vmatpush.bf16.msra.mxu2 %v8131_v30 }
 0x3e4   :  { %2299 = vmatpush.bf16.msra.mxu1 %v8132_v60  ;;  %2325 = vmatpush.bf16.msra.mxu3 %v8133_v41 }
 0x3e6   :  { %2288 = vmatpush.bf16.msra.mxu0 %v8134_v54  ;;  %2314 = vmatpush.bf16.msra.mxu2 %v8135_v55 }
 0x3e8   :  { %2300 = vmatpush.bf16.msra.mxu1 %v8136_v31  ;;  %2326 = vmatpush.bf16.msra.mxu3 %v8137_v9 }
 0x3e9   :  { %2241 = vmatmul.bf16.vlgmr.msrb.gmra.mxu0 %v6712_v25  ;;  %2267 = vmatmul.bf16.vlgmr.msrb.gmra.mxu2 %v6712_v25 }
 0x3ea   :  { %2289 = vmatpush.bf16.msra.mxu0 %v8138_v1  ;;  %2315 = vmatpush.bf16.msra.mxu2 %v8139_v51 }
 0x3ec   :  { %2301 = vmatpush.bf16.msra.mxu1 %v8140_v39  ;;  %2327 = vmatpush.bf16.msra.mxu3 %v8141_v35 }
 0x3ee   :  { %2290 = vmatpush.bf16.msra.mxu0 %v8142_v5  ;;  %2316 = vmatpush.bf16.msra.mxu2 %v8143_v43 }
 0x3ef   :  { %2254 = vmatmul.bf16.vlgmr.msrb.gmra.mxu1 %v6718_v14  ;;  %2280 = vmatmul.bf16.vlgmr.msrb.gmra.mxu3 %v6718_v14 }
 0x3f0   :  { %2302 = vmatpush.bf16.msra.mxu1 %v8144_v19  ;;  %2328 = vmatpush.bf16.msra.mxu3 %v8145_v59 }
 0x3f2   :  { %2291 = vmatpush.bf16.msra.mxu0 %v8146_v27  ;;  %2317 = vmatpush.bf16.msra.mxu2 %v8226_v49 }
 0x3f4   :  { %2303 = vmatpush.bf16.msra.mxu1 %v8227_v36  ;;  %2329 = vmatpush.bf16.msra.mxu3 %v8228_v34 }
 0x3f6   :  { %2292 = vmatpush.bf16.msra.mxu0 %v8229_v12  ;;  %2318 = vmatpush.bf16.msra.mxu2 %v8230_v50 }
 0x3f8   :  { %2304 = vmatpush.bf16.msra.mxu1 %v8233_v3  ;;  %2330 = vmatpush.bf16.msra.mxu3 %v8432_v6 }
 0x3f9   :  { %2293 = vmatmul.bf16.vlgmr.msra.gmra.mxu0 %v6712_v25  ;;  %2319 = vmatmul.bf16.vlgmr.msra.gmra.mxu2 %v6712_v25 }
 0x3fa   :  { %2337 = vmatpush.bf16.msrb.mxu0 %v8231_v21  ;;  %2363 = vmatpush.bf16.msrb.mxu2 %v8232_v8 }
 0x3fc   :  { %2305 = vmatpush.bf16.msra.mxu1 %v8435_v13  ;;  %2331 = vmatpush.bf16.msra.mxu3 %v8436_v45 }
 0x3fe   :  { %2338 = vmatpush.bf16.msrb.mxu0 %v8433_v53  ;;  %2364 = vmatpush.bf16.msrb.mxu2 %v8434_v33 }
 0x3ff   :  { %2306 = vmatmul.bf16.vlgmr.msra.gmra.mxu1 %v6718_v14  ;;  %2332 = vmatmul.bf16.vlgmr.msra.gmra.mxu3 %v6718_v14 }
 0x400   :  { %2350 = vmatpush.bf16.msrb.mxu1 %v8437_v42  ;;  %2376 = vmatpush.bf16.msrb.mxu3 %v8438_v37 }
 0x402   :  { %2339 = vmatpush.bf16.msrb.mxu0 %v8439_v29  ;;  %2365 = vmatpush.bf16.msrb.mxu2 %v8440_v47 }
 0x404   :  { %2351 = vmatpush.bf16.msrb.mxu1 %v8441_v18  ;;  %2377 = vmatpush.bf16.msrb.mxu3 %v8442_v10 }
 0x406   :  { %2340 = vmatpush.bf16.msrb.mxu0 %v8443_v40  ;;  %2366 = vmatpush.bf16.msrb.mxu2 %v8444_v22  ;;  %v4121_v22 = vld [vmem:[%s7697_s0 + $0x108] sm:$0xff] }
 0x408   :  { %2352 = vmatpush.bf16.msrb.mxu1 %v8445_v24  ;;  %2378 = vmatpush.bf16.msrb.mxu3 %v8446_v46 }
 0x40a   :  { %2341 = vmatpush.bf16.msrb.mxu0 %v8447_v7  ;;  %2367 = vmatpush.bf16.msrb.mxu2 %v8448_v56 }
 0x40c   :  { %2353 = vmatpush.bf16.msrb.mxu1 %v8449_v38  ;;  %2379 = vmatpush.bf16.msrb.mxu3 %v8450_v16  ;;  %v8461_v16 = vld [vmem:[#allocation4_spill] sm:$0xff] }
 0x40e   :  { %2342 = vmatpush.bf16.msrb.mxu0 %v8451_v52  ;;  %2368 = vmatpush.bf16.msrb.mxu2 %v8452_v28  ;;  %v8462_v52 = vld [vmem:[#allocation6_spill] sm:$0xff]  ;;  %v8463_v28 = vld [vmem:[#allocation125_spill] sm:$0xff] }
 0x410   :  { %2354 = vmatpush.bf16.msrb.mxu1 %v8453_v62  ;;  %2380 = vmatpush.bf16.msrb.mxu3 %v8454_v17  ;;  %v8464_v62 = vld [vmem:[#allocation127_spill] sm:$0xff] }
 0x412   :  { %2343 = vmatpush.bf16.msrb.mxu0 %v8455_v61  ;;  %2369 = vmatpush.bf16.msrb.mxu2 %v8456_v23  ;;  %v8465_v23 = vld [vmem:[#allocation8_spill] sm:$0xff] }
 0x414   :  { %2355 = vmatpush.bf16.msrb.mxu1 %v8457_v44  ;;  %2381 = vmatpush.bf16.msrb.mxu3 %v8458_v58  ;;  %v8466_v44 = vld [vmem:[#allocation10_spill] sm:$0xff]  ;;  %v8467_v58 = vld [vmem:[#allocation129_spill] sm:$0xff] }
 0x416   :  { %2344 = vmatpush.bf16.msrb.mxu0 %v8459_v0  ;;  %2370 = vmatpush.bf16.msrb.mxu2 %v8460_v32  ;;  %v8468_v0 = vld [vmem:[#allocation131_spill] sm:$0xff]  ;;  %v8469_v32 = vld [vmem:[#allocation5_spill] sm:$0xff] }
 0x418   :  { %2356 = vmatpush.bf16.msrb.mxu1 %v8463_v28  ;;  %2382 = vmatpush.bf16.msrb.mxu3 %v8464_v62  ;;  %v8471_v62 = vld [vmem:[#allocation12_spill] sm:$0xff]  ;;  %v8472_v28 = vld [vmem:[#allocation14_spill] sm:$0xff] }
 0x419   :  { %2345 = vmatmul.bf16.vlgmr.msrb.gmra.mxu0 %v6712_v25  ;;  %2371 = vmatmul.bf16.vlgmr.msrb.gmra.mxu2 %v6712_v25  ;;  %v8473_v25 = vld [vmem:[#allocation9_spill] sm:$0xff] }
 0x41a   :  { %2526 = vmatpush.bf16.msra.mxu0 %v8461_v16  ;;  %2552 = vmatpush.bf16.msra.mxu2 %v8462_v52  ;;  %v8470_v16 = vld [vmem:[#allocation7_spill] sm:$0xff]  ;;  %v8480_v52 = vld [vmem:[#allocation22_spill] sm:$0xff] }
 0x41c   :  { %2357 = vmatpush.bf16.msrb.mxu1 %v8467_v58  ;;  %2383 = vmatpush.bf16.msrb.mxu3 %v8468_v0  ;;  %v8476_v58 = vld [vmem:[#allocation18_spill] sm:$0xff]  ;;  %v8477_v0 = vld [vmem:[#allocation13_spill] sm:$0xff] }
 0x41e   :  { %2527 = vmatpush.bf16.msra.mxu0 %v8465_v23  ;;  %2553 = vmatpush.bf16.msra.mxu2 %v8466_v44  ;;  %v8474_v23 = vld [vmem:[#allocation11_spill] sm:$0xff]  ;;  %v8475_v44 = vld [vmem:[#allocation16_spill] sm:$0xff] }
 0x41f   :  { %2358 = vmatmul.bf16.vlgmr.msrb.gmra.mxu1 %v6718_v14  ;;  %2384 = vmatmul.bf16.vlgmr.msrb.gmra.mxu3 %v6718_v14  ;;  %v8481_v14 = vld [vmem:[#allocation17_spill] sm:$0xff] }
 0x420   :  { %2539 = vmatpush.bf16.msra.mxu1 %v8469_v32  ;;  %2565 = vmatpush.bf16.msra.mxu3 %v8470_v16  ;;  %v8478_v32 = vld [vmem:[#allocation15_spill] sm:$0xff]  ;;  %v8479_v16 = vld [vmem:[#allocation20_spill] sm:$0xff] }
 0x422   :  { %2528 = vmatpush.bf16.msra.mxu0 %v8471_v62  ;;  %2554 = vmatpush.bf16.msra.mxu2 %v8472_v28  ;;  %v8482_v62 = vld [vmem:[#allocation19_spill] sm:$0xff]  ;;  %v8483_v28 = vld [vmem:[#allocation24_spill] sm:$0xff] }
 0x424   :  { %2540 = vmatpush.bf16.msra.mxu1 %v8473_v25  ;;  %2566 = vmatpush.bf16.msra.mxu3 %v8474_v23  ;;  %v8484_v25 = vld [vmem:[#allocation26_spill] sm:$0xff]  ;;  %v8485_v23 = vld [vmem:[#allocation21_spill] sm:$0xff] }
 0x426   :  { %2529 = vmatpush.bf16.msra.mxu0 %v8475_v44  ;;  %2555 = vmatpush.bf16.msra.mxu2 %v8476_v58  ;;  %v8486_v44 = vld [vmem:[#allocation23_spill] sm:$0xff]  ;;  %v8487_v58 = vld [vmem:[#allocation28_spill] sm:$0xff] }
 0x428   :  { %2541 = vmatpush.bf16.msra.mxu1 %v8477_v0  ;;  %2567 = vmatpush.bf16.msra.mxu3 %v8478_v32  ;;  %v8488_v0 = vld [vmem:[#allocation30_spill] sm:$0xff]  ;;  %v8489_v32 = vld [vmem:[#allocation25_spill] sm:$0xff] }
 0x42a   :  { %2530 = vmatpush.bf16.msra.mxu0 %v8479_v16  ;;  %2556 = vmatpush.bf16.msra.mxu2 %v8480_v52  ;;  %v8490_v16 = vld [vmem:[#allocation27_spill] sm:$0xff]  ;;  %v8491_v52 = vld [vmem:[#allocation32_spill] sm:$0xff] }
 0x42c   :  { %2542 = vmatpush.bf16.msra.mxu1 %v8481_v14  ;;  %2568 = vmatpush.bf16.msra.mxu3 %v8482_v62  ;;  %v8492_v14 = vld [vmem:[#allocation34_spill] sm:$0xff]  ;;  %v8493_v62 = vld [vmem:[#allocation36_spill] sm:$0xff] }
 0x42e   :  { %2531 = vmatpush.bf16.msra.mxu0 %v8483_v28  ;;  %2557 = vmatpush.bf16.msra.mxu2 %v8484_v25  ;;  %v8494_v28 = vld [vmem:[#allocation38_spill] sm:$0xff]  ;;  %v8495_v25 = vld [vmem:[#allocation29_spill] sm:$0xff] }
 0x430   :  { %2543 = vmatpush.bf16.msra.mxu1 %v8485_v23  ;;  %2569 = vmatpush.bf16.msra.mxu3 %v8486_v44  ;;  %v8496_v23 = vld [vmem:[#allocation31_spill] sm:$0xff]  ;;  %v8497_v44 = vld [vmem:[#allocation40_spill] sm:$0xff] }
 0x432   :  { %2532 = vmatpush.bf16.msra.mxu0 %v8487_v58  ;;  %2558 = vmatpush.bf16.msra.mxu2 %v8488_v0  ;;  %v8498_v58 = vld [vmem:[#allocation42_spill] sm:$0xff]  ;;  %v8499_v0 = vld [vmem:[#allocation33_spill] sm:$0xff] }
 0x434   :  { %2544 = vmatpush.bf16.msra.mxu1 %v8489_v32  ;;  %2570 = vmatpush.bf16.msra.mxu3 %v8490_v16  ;;  %v8500_v32 = vld [vmem:[#allocation35_spill] sm:$0xff]  ;;  %v8501_v16 = vld [vmem:[#allocation37_spill] sm:$0xff] }
 0x436   :  { %2533 = vmatpush.bf16.msra.mxu0 %v8491_v52  ;;  %2559 = vmatpush.bf16.msra.mxu2 %v8492_v14  ;;  %v8502_v52 = vld [vmem:[#allocation39_spill] sm:$0xff]  ;;  %v8503_v14 = vld [vmem:[#allocation44_spill] sm:$0xff] }
 0x438   :  { %2545 = vmatpush.bf16.msra.mxu1 %v8495_v25  ;;  %2571 = vmatpush.bf16.msra.mxu3 %v8496_v23  ;;  %v8506_v25 = vld [vmem:[#allocation43_spill] sm:$0xff]  ;;  %v8507_v23 = vld [vmem:[#allocation48_spill] sm:$0xff] }
 0x43a   :  { %2578 = vmatpush.bf16.msrb.mxu0 %v8493_v62  ;;  %2604 = vmatpush.bf16.msrb.mxu2 %v8494_v28  ;;  %v8504_v62 = vld [vmem:[#allocation46_spill] sm:$0xff]  ;;  %v8505_v28 = vld [vmem:[#allocation41_spill] sm:$0xff] }
 0x43c   :  { %2546 = vmatpush.bf16.msra.mxu1 %v8499_v0  ;;  %2572 = vmatpush.bf16.msra.mxu3 %v8500_v32  ;;  %v8510_v0 = vld [vmem:[#allocation47_spill] sm:$0xff]  ;;  %v8511_v32 = vld [vmem:[#allocation52_spill] sm:$0xff] }
 0x43e   :  { %2579 = vmatpush.bf16.msrb.mxu0 %v8497_v44  ;;  %2605 = vmatpush.bf16.msrb.mxu2 %v8498_v58  ;;  %v8508_v44 = vld [vmem:[#allocation50_spill] sm:$0xff]  ;;  %v8509_v58 = vld [vmem:[#allocation45_spill] sm:$0xff] }
 0x440   :  { %2591 = vmatpush.bf16.msrb.mxu1 %v8501_v16  ;;  %2617 = vmatpush.bf16.msrb.mxu3 %v8502_v52  ;;  %v8512_v16 = vld [vmem:[#allocation54_spill] sm:$0xff]  ;;  %v8513_v52 = vld [vmem:[#allocation49_spill] sm:$0xff] }
 0x442   :  { %2580 = vmatpush.bf16.msrb.mxu0 %v8503_v14  ;;  %2606 = vmatpush.bf16.msrb.mxu2 %v8504_v62  ;;  %v8514_v14 = vld [vmem:[#allocation51_spill] sm:$0xff]  ;;  %v8515_v62 = vld [vmem:[#allocation56_spill] sm:$0xff] }
 0x444   :  { %2592 = vmatpush.bf16.msrb.mxu1 %v8505_v28  ;;  %2618 = vmatpush.bf16.msrb.mxu3 %v8506_v25  ;;  %v8516_v28 = vld [vmem:[#allocation58_spill] sm:$0xff]  ;;  %v8517_v25 = vld [vmem:[#allocation53_spill] sm:$0xff] }
 0x446   :  { %2581 = vmatpush.bf16.msrb.mxu0 %v8507_v23  ;;  %2607 = vmatpush.bf16.msrb.mxu2 %v8508_v44  ;;  %v8518_v23 = vld [vmem:[#allocation55_spill] sm:$0xff]  ;;  %v8519_v44 = vld [vmem:[#allocation60_spill] sm:$0xff] }
 0x448   :  { %2593 = vmatpush.bf16.msrb.mxu1 %v8509_v58  ;;  %2619 = vmatpush.bf16.msrb.mxu3 %v8510_v0  ;;  %v8520_v58 = vld [vmem:[#allocation62_spill] sm:$0xff]  ;;  %v8521_v0 = vld [vmem:[#allocation57_spill] sm:$0xff] }
 0x44a   :  { %2582 = vmatpush.bf16.msrb.mxu0 %v8511_v32  ;;  %2608 = vmatpush.bf16.msrb.mxu2 %v8512_v16  ;;  %v8522_v32 = vld [vmem:[#allocation59_spill] sm:$0xff]  ;;  %v8523_v16 = vld [vmem:[#allocation64_spill] sm:$0xff] }
 0x44c   :  { %2594 = vmatpush.bf16.msrb.mxu1 %v8513_v52  ;;  %2620 = vmatpush.bf16.msrb.mxu3 %v8514_v14  ;;  %v8524_v52 = vld [vmem:[#allocation66_spill] sm:$0xff]  ;;  %v8525_v14 = vld [vmem:[#allocation61_spill] sm:$0xff] }
 0x44e   :  { %2583 = vmatpush.bf16.msrb.mxu0 %v8515_v62  ;;  %2609 = vmatpush.bf16.msrb.mxu2 %v8516_v28  ;;  %v8526_v62 = vld [vmem:[#allocation63_spill] sm:$0xff]  ;;  %v8527_v28 = vld [vmem:[#allocation65_spill] sm:$0xff] }
 0x450   :  { %2595 = vmatpush.bf16.msrb.mxu1 %v8517_v25  ;;  %2621 = vmatpush.bf16.msrb.mxu3 %v8518_v23  ;;  %v8528_v25 = vld [vmem:[#allocation67_spill] sm:$0xff] }
 0x452   :  { %2584 = vmatpush.bf16.msrb.mxu0 %v8519_v44  ;;  %2610 = vmatpush.bf16.msrb.mxu2 %v8520_v58 }
 0x454   :  { %2596 = vmatpush.bf16.msrb.mxu1 %v8521_v0  ;;  %2622 = vmatpush.bf16.msrb.mxu3 %v8522_v32 }
 0x456   :  { %2585 = vmatpush.bf16.msrb.mxu0 %v8523_v16  ;;  %2611 = vmatpush.bf16.msrb.mxu2 %v8524_v52  ;;  %v2190_v23 = vpop.f32.mrf.mxu0 }
 0x458   :  { %2597 = vmatpush.bf16.msrb.mxu1 %v8525_v14  ;;  %2623 = vmatpush.bf16.msrb.mxu3 %v8526_v62  ;;  %v4122_v62 = vld [vmem:[%s7697_s0 + $0x110] sm:$0xff] }
 0x45c   :  { %2598 = vmatpush.bf16.msrb.mxu1 %v8527_v28  ;;  %2624 = vmatpush.bf16.msrb.mxu3 %v8528_v25  ;;  %v2203_v44 = vpop.f32.mrf.mxu1  ;;  %v2216_v61 = vpop.f32.mrf.mxu2  ;;  %v4120_v25 = vld [vmem:[%s7697_s0 + $0x100] sm:$0xff] }
 0x45d   :  { %v2217_v18 = vadd.f32 %v4121_v22, %v2216_v61 }
 0x45e   :  { %v2192_v58 = vpop.f32.mrf.mxu0 }
 0x462   :  { %v2229_v17 = vpop.f32.mrf.mxu3 }
 0x464   :  { %v2205_v0 = vpop.f32.mrf.mxu1  ;;  %v2218_v38 = vpop.f32.mrf.mxu2 }
 0x465   :  { %v2191_v0 = vadd.f32 %v4120_v25, %v2190_v23 }
 0x466   :  { %v2242_v32 = vpop.f32.mrf.mxu0 }
 0x467   :  { %v2243_v28 = vadd.f32 %v4122_v62, %v2242_v32 }
 0x46a   :  { %v2231_v56 = vpop.f32.mrf.mxu3 }
 0x46b   :  { %v4123_v56 = vld [vmem:[%s7697_s0 + $0x118] sm:$0xff] }
 0x46c   :  { %v2255_v16 = vpop.f32.mrf.mxu1  ;;  %v2268_v7 = vpop.f32.mrf.mxu2 }
 0x46d   :  { %v2256_v24 = vadd.f32 %v2255_v16, %v2243_v28  ;;  %v2269_v62 = vadd.f32 %v4123_v56, %v2268_v7  ;;  %v2230_v28 = vadd.f32 %v2229_v17, %v2217_v18 }
 0x46e   :  { %v2244_v52 = vpop.f32.mrf.mxu0 }
 0x46f   :  { %v2204_v52 = vadd.f32 %v2203_v44, %v2191_v0  ;;  %v4130_v40 = vmul.f32 -1.442695, %v2256_v24  ;;  %v4129_v23 = vmul.f32 -1.442695, %v2230_v28 }
 0x471   :  { %4433 = vpow2.f32 %v4130_v40 }
 0x472   :  { %v2281_v14 = vpop.f32.mrf.mxu3 }
 0x473   :  { %v2282_v10 = vadd.f32 %v2281_v14, %v2269_v62 }
 0x474   :  { %v2257_v46 = vpop.f32.mrf.mxu1  ;;  %v2270_v58 = vpop.f32.mrf.mxu2 }
 0x475   :  { %v4128_v46 = vmul.f32 -1.442695, %v2204_v52  ;;  %v4131_v29 = vmul.f32 -1.442695, %v2282_v10 }
 0x476   :  { %v2294_v38 = vpop.f32.mrf.mxu0 }
 0x477   :  { %4435 = vpow2.f32 %v4128_v46  ;;  %v4434_v44 = vpop.eup %4433 }
 0x478   :  { %4437 = vpow2.f32 %v4131_v29  ;;  %v6876_v7 = vadd.f32 1.0, %v4434_v44 }
 0x479   :  { %4439 = vpow2.f32 %v4129_v23 }
 0x47a   :  { %v2283_v32 = vpop.f32.mrf.mxu3  ;;  %4441 = vrcp.f32 %v6876_v7  ;;  %v2446_v6 = vand.u32 2147483648, %v6876_v7  ;;  %vm2440_vm1 = vweird.f32 %v6876_v7 }
 0x47b   :  { %v4126_v32 = vld [vmem:[%s7697_s0 + $0x130] sm:$0xff] }
 0x47c   :  { %v6872_v47 = vpop.f32.mrf.mxu2  ;;  %v2307_v16 = vpop.f32.mrf.mxu1 }
 0x47d   :  { %v4436_v22 = vpop.eup %4435 }
 0x47e   :  { %v2296_v58 = vpop.f32.mrf.mxu0  ;;  %v4438_v61 = vpop.eup %4437  ;;  %v6878_v14 = vadd.f32 1.0, %v4436_v22 }
 0x47f   :  { %v4440_v40 = vpop.eup %4439  ;;  %v6881_v10 = vadd.f32 1.0, %v4438_v61 }
 0x480   :  { %4443 = vrcp.f32 %v6878_v14  ;;  %v6884_v29 = vadd.f32 1.0, %v4440_v40  ;;  %v6886_v17 = vpop.eup %4441  ;;  %vm2402_vm2 = vweird.f32 %v6878_v14 }
 0x481   :  { %4445 = vrcp.f32 %v6881_v10  ;;  %v2436_v56 = vmul.f32 %v6886_v17, %v6876_v7  ;;  %vm2441_vm0 = vweird.f32 %v6886_v17  ;;  %vm2455_vm8 = vweird.f32 %v6881_v10 }
 0x482   :  { %v6874_v25 = vpop.f32.mrf.mxu3  ;;  %4447 = vrcp.f32 %v6884_v29  ;;  %vm6925_vm3 = vmor %vm2440_vm1, %vm2441_vm0  ;;  %vm2417_vm12 = vweird.f32 %v6884_v29 }
 0x483   :  { %v2437_v58 = vsub.f32 1.0, %v2436_v56  ;;  %v4127_v56 = vld [vmem:[%s7697_s0 + $0x138] sm:$0xff] }
 0x484   :  { %v2322_v0 = vpop.f32.mrf.mxu2  ;;  %v2309_v24 = vpop.f32.mrf.mxu1 }
 0x485   :  { %v4124_v24 = vld [vmem:[%s7697_s0 + $0x120] sm:$0xff]  ;;  %v2438_v37 = vmul.f32 %v6886_v17, %v2437_v58 }
 0x486   :  { %v6892_v62 = vpop.eup %4443  ;;  %v2295_v42 = vadd.f32 %v4124_v24, %v2294_v38  ;;  %v2406_v24 = vand.u32 2147483647, %v6878_v14 }
 0x487   :  { %v6897_v46 = vpop.eup %4445  ;;  %v2398_v28 = vmul.f32 %v6892_v62, %v6878_v14  ;;  %v2439_v58 = vadd.f32 %v6886_v17, %v2438_v37  ;;  %vm2403_vm4 = vweird.f32 %v6892_v62  ;;  %v2423_v37 = vand.u32 2147483648, %v6884_v29 }
 0x488   :  { %v6901_v44 = vpop.eup %4447  ;;  %v2451_v0 = vmul.f32 %v6897_v46, %v6881_v10  ;;  %v2308_v33 = vadd.f32 %v2307_v16, %v2295_v42  ;;  %v2444_v42 = vand.u32 2147483647, %v6876_v7  ;;  %vm2456_vm5 = vweird.f32 %v6897_v46  ;;  %vm6944_vm7 = vmor %vm2402_vm2, %vm2403_vm4 }
 0x489   :  { %v2399_v40 = vsub.f32 1.0, %v2398_v28  ;;  %v2443_v7 = vsel %vm6925_vm3, %v6886_v17, %v2439_v58  ;;  %v2459_v17 = vand.u32 2147483647, %v6881_v10  ;;  %vm6953_vm9 = vmor %vm2455_vm8, %vm2456_vm5  ;;  %vm2407_vm10 = vcmp.eq.f32.partialorder %v2406_v24, 8.507059e+37 }
 0x48a   :  { %v2335_v18 = vpop.f32.mrf.mxu3  ;;  %v2452_v13 = vsub.f32 1.0, %v2451_v0  ;;  %vm2445_vm6 = vcmp.eq.f32.partialorder %v2444_v42, 8.507059e+37  ;;  %vm2418_vm11 = vweird.f32 %v6901_v44 }
 0x48b   :  { %v2400_v28 = vmul.f32 %v6892_v62, %v2399_v40  ;;  %vm2460_vm13 = vcmp.eq.f32.partialorder %v2459_v17, 8.507059e+37  ;;  %vm2419_vm14 = vmor %vm2417_vm12, %vm2418_vm11 }
 0x496   :  { %v2346_v52 = vpop.f32.mrf.mxu0 }
 0x497   :  { %v2347_v23 = vadd.f32 %v4126_v32, %v2346_v52  ;;  %v2413_v32 = vmul.f32 %v6901_v44, %v6884_v29 }
 0x49c   :  { %v2359_v22 = vpop.f32.mrf.mxu1  ;;  %v2372_v61 = vpop.f32.mrf.mxu2 }
 0x49d   :  { %v2360_v18 = vadd.f32 %v2359_v22, %v2347_v23  ;;  %v2373_v53 = vadd.f32 %v4127_v56, %v2372_v61  ;;  %v4125_v23 = vld [vmem:[%s7697_s0 + $0x128] sm:$0xff]  ;;  %v2447_v56 = vor.u32 1.1754944e-38, %v2446_v6 }
 0x49e   :  { %v2348_v52 = vpop.f32.mrf.mxu0  ;;  %v2321_v61 = vadd.f32 %v4125_v23, %v6872_v47 }
 0x49f   :  { %v4132_v45 = vmul.f32 -1.442695, %v2360_v18  ;;  %v2414_v52 = vsub.f32 1.0, %v2413_v32  ;;  %v2401_v18 = vadd.f32 %v6892_v62, %v2400_v28  ;;  %v2461_v28 = vand.u32 2147483648, %v6881_v10 }
 0x4a0   :  { %v2334_v32 = vadd.f32 %v6874_v25, %v2321_v61  ;;  %v2448_v6 = vsel %vm2445_vm6, %v2447_v56, %v2443_v7  ;;  %v2421_v61 = vand.u32 2147483647, %v6884_v29 }
 0x4a1   :  { %4449 = vpow2.f32 %v4132_v45  ;;  %v2453_v45 = vmul.f32 %v6897_v46, %v2452_v13  ;;  %v2408_v13 = vand.u32 2147483648, %v6878_v14  ;;  %v2405_v25 = vsel %vm6944_vm7, %v6892_v62, %v2401_v18 }
 0x4a2   :  { %v2385_v22 = vpop.f32.mrf.mxu3  ;;  %4451 = vtanh.f32 %v2308_v33  ;;  %vm2422_vm15 = vcmp.eq.f32.partialorder %v2421_v61, 8.507059e+37 }
 0x4a3   :  { %v2386_v38 = vadd.f32 %v2385_v22, %v2373_v53  ;;  %v2415_v22 = vmul.f32 %v6901_v44, %v2414_v52  ;;  %v2454_v33 = vadd.f32 %v6897_v46, %v2453_v45  ;;  %v2409_v14 = vor.u32 1.1754944e-38, %v2408_v13 }
 0x4a4   :  { %v2361_v16 = vpop.f32.mrf.mxu1  ;;  %v2374_v0 = vpop.f32.mrf.mxu2  ;;  %v2505_v45 = vmul.f32 %v2448_v6, %v6704_v26 }
 0x4a5   :  { %v4133_v53 = vmul.f32 -1.442695, %v2386_v38  ;;  %v2416_v42 = vadd.f32 %v6901_v44, %v2415_v22  ;;  %v2458_v10 = vsel %vm6953_vm9, %v6897_v46, %v2454_v33  ;;  %v2462_v16 = vor.u32 1.1754944e-38, %v2461_v28 }
 0x4a6   :  { %v2410_v0 = vsel %vm2407_vm10, %v2409_v14, %v2405_v25 }
 0x4a7   :  { %v4450_v40 = vpop.eup %4449  ;;  %4453 = vpow2.f32 %v4133_v53  ;;  %v2463_v53 = vsel %vm2460_vm13, %v2462_v16, %v2458_v10  ;;  %v2420_v7 = vsel %vm2419_vm14, %v6901_v44, %v2416_v42 }
 0x4a8   :  { %v2473_v47 = vadd.f32 1.0, %v4450_v40  ;;  %v4452_v52 = vpop.eup %4451  ;;  %v2424_v40 = vor.u32 1.1754944e-38, %v2423_v37 }
 0x4a9   :  { %v2507_v24 = vmul.f32 %v4452_v52, %v2410_v0 }
 0x4aa   :  { %4455 = vrcp.f32 %v2473_v47  ;;  %v2387_v58 = vpop.f32.mrf.mxu3  ;;  %v2425_v22 = vsel %vm2422_vm15, %v2424_v40, %v2420_v7  ;;  %v2486_v28 = vand.u32 2147483648, %v2473_v47  ;;  %v2484_v6 = vand.u32 2147483647, %v2473_v47  ;;  %v8537_v40 = vld [vmem:[#allocation106_spill] sm:$0xff] }
 0x4ab   :  { %4457 = vtanh.f32 %v2334_v32  ;;  %v6966_v13 = vadd.f32 %v2507_v24, %v2505_v45  ;;  %v2506_v32 = vmul.f32 %v2463_v53, %v6709_v4  ;;  %vm2480_vm1 = vweird.f32 %v2473_v47 }
 0x4ac   :  { %v2487_v52 = vor.u32 1.1754944e-38, %v2486_v28  ;;  %vm2485_vm3 = vcmp.eq.f32.partialorder %v2484_v6, 8.507059e+37  ;;  %v8543_v28 = vld [vmem:[#allocation110_spill] sm:$0xff]  ;;  %v8545_v6 = vld [vmem:[#allocation107_spill] sm:$0xff] }
 0x4ad   :  { %v4454_v62 = vpop.eup %4453 }
 0x4ae   :  { %v2474_v26 = vadd.f32 1.0, %v4454_v62 }
 0x4b0   :  { %v4456_v18 = vpop.eup %4455  ;;  %4459 = vrcp.f32 %v2474_v26  ;;  %v2501_v42 = vand.u32 2147483648, %v2474_v26  ;;  %v2499_v16 = vand.u32 2147483647, %v2474_v26  ;;  %vm2495_vm5 = vweird.f32 %v2474_v26 }
 0x4b1   :  { %v4458_v46 = vpop.eup %4457  ;;  %v2476_v56 = vmul.f32 %v4456_v18, %v2473_v47  ;;  %4461 = vtanh.f32 %v6966_v13  ;;  %vm2481_vm0 = vweird.f32 %v4456_v18 }
 0x4b2   :  { %v2508_v29 = vmul.f32 %v4458_v46, %v2425_v22  ;;  %vm2482_vm2 = vmor %vm2480_vm1, %vm2481_vm0  ;;  %v2502_v47 = vor.u32 1.1754944e-38, %v2501_v42  ;;  %vm2500_vm7 = vcmp.eq.f32.partialorder %v2499_v16, 8.507059e+37  ;;  %v8536_v46 = vld [vmem:[#allocation104_spill] sm:$0xff]  ;;  %v8540_v22 = vld [vmem:[#allocation101_spill] sm:$0xff] }
 0x4b3   :  { %v2477_v33 = vsub.f32 1.0, %v2476_v56  ;;  %v8538_v56 = vld [vmem:[#allocation97_spill] sm:$0xff]  ;;  %v8554_v42 = vld [vmem:[#allocation120_spill] sm:$0xff]  ;;  %v8557_v16 = vld [vmem:[#allocation119_spill] sm:$0xff] }
 0x4b4   :  { %v6971_v17 = vadd.f32 %v2508_v29, %v2506_v32  ;;  %v8539_v32 = vld [vmem:[#allocation99_spill] sm:$0xff]  ;;  %v8542_v29 = vld [vmem:[#allocation108_spill] sm:$0xff] }
 0x4b5   :  { %v2478_v23 = vmul.f32 %v4456_v18, %v2477_v33  ;;  %v8541_v33 = vld [vmem:[#allocation103_spill] sm:$0xff] }
 0x4b6   :  { %v4460_v25 = vpop.eup %4459  ;;  %4463 = vtanh.f32 %v6971_v17 }
 0x4b7   :  { %v2479_v44 = vadd.f32 %v4456_v18, %v2478_v23  ;;  %v2491_v58 = vmul.f32 %v4460_v25, %v2474_v26  ;;  %v4462_v14 = vpop.eup %4461  ;;  %vm2496_vm4 = vweird.f32 %v4460_v25  ;;  %v8535_v26 = vld [vmem:[#allocation95_spill] sm:$0xff]  ;;  %v8544_v23 = vld [vmem:[#allocation105_spill] sm:$0xff] }
 0x4b8   :  { %vm2497_vm6 = vmor %vm2495_vm5, %vm2496_vm4 }
 0x4b9   :  { %v2483_v38 = vsel %vm2482_vm2, %v4456_v18, %v2479_v44  ;;  %v2492_v4 = vsub.f32 1.0, %v2491_v58  ;;  %v8547_v44 = vld [vmem:[#allocation114_spill] sm:$0xff]  ;;  %v8548_v58 = vld [vmem:[#allocation109_spill] sm:$0xff] }
 0x4ba   :  { %v2488_v45 = vsel %vm2485_vm3, %v2487_v52, %v2483_v38  ;;  %v8549_v52 = vld [vmem:[#allocation111_spill] sm:$0xff]  ;;  %v8550_v38 = vld [vmem:[#allocation116_spill] sm:$0xff] }
 0x4bb   :  { %v2513_v10 = vmul.f32 %v4462_v14, %v2488_v45  ;;  %v2493_v62 = vmul.f32 %v4460_v25, %v2492_v4  ;;  %v8551_v4 = vld [vmem:[#allocation118_spill] sm:$0xff]  ;;  %v8552_v14 = vld [vmem:[#allocation113_spill] sm:$0xff]  ;;  %v8553_v45 = vld [vmem:[#allocation115_spill] sm:$0xff] }
 0x4bc   :  { %v4464_v61 = vpop.eup %4463 }
 0x4bd   :  { %v6974_v0 = vpack.c.bf16 %v2513_v10, %v2513_v10  ;;  %v2494_v37 = vadd.f32 %v4460_v25, %v2493_v62  ;;  %v8555_v10 = vld [vmem:[#allocation122_spill] sm:$0xff]  ;;  %v8556_v62 = vld [vmem:[#allocation117_spill] sm:$0xff] }
 0x4bf   :  { %v2498_v24 = vsel %vm2497_vm6, %v4460_v25, %v2494_v37  ;;  %2534 = vmatmul.bf16.vlgmr.msra.gmra.mxu0 %v6974_v0  ;;  %2560 = vmatmul.bf16.vlgmr.msra.gmra.mxu2 %v6974_v0  ;;  %v8546_v25 = vld [vmem:[#allocation112_spill] sm:$0xff] }
 0x4c0   :  { %v2503_v53 = vsel %vm2500_vm7, %v2502_v47, %v2498_v24  ;;  %2630 = vmatpush.bf16.msra.mxu0 %v8124_v11  ;;  %2656 = vmatpush.bf16.msra.mxu2 %v8125_v15  ;;  %v8558_v37 = vld [vmem:[#allocation124_spill] sm:$0xff]  ;;  %v8559_v47 = vld [vmem:[#allocation126_spill] sm:$0xff]  ;;  %v8560_v24 = vld [vmem:[#allocation121_spill] sm:$0xff] }
 0x4c1   :  { %v2514_v18 = vmul.f32 %v4464_v61, %v2503_v53  ;;  %v8561_v61 = vld [vmem:[#allocation123_spill] sm:$0xff]  ;;  %v8562_v53 = vld [vmem:[#allocation128_spill] sm:$0xff] }
 0x4c3   :  { %v6980_v7 = vpack.c.bf16 %v2514_v18, %v2514_v18  ;;  %v8563_v18 = vld [vmem:[#allocation130_spill] sm:$0xff] }
 0x4c4   :  { %2631 = vmatpush.bf16.msra.mxu0 %v8126_v48  ;;  %2657 = vmatpush.bf16.msra.mxu2 %v8127_v57 }
 0x4c5   :  { %2547 = vmatmul.bf16.vlgmr.msra.gmra.mxu1 %v6980_v7  ;;  %2573 = vmatmul.bf16.vlgmr.msra.gmra.mxu3 %v6980_v7 }
 0x4c6   :  { %2643 = vmatpush.bf16.msra.mxu1 %v8128_v63  ;;  %2669 = vmatpush.bf16.msra.mxu3 %v8129_v2 }
 0x4c8   :  { %2632 = vmatpush.bf16.msra.mxu0 %v8130_v20  ;;  %2658 = vmatpush.bf16.msra.mxu2 %v8131_v30 }
 0x4ca   :  { %2644 = vmatpush.bf16.msra.mxu1 %v8132_v60  ;;  %2670 = vmatpush.bf16.msra.mxu3 %v8133_v41 }
 0x4cc   :  { %2633 = vmatpush.bf16.msra.mxu0 %v8134_v54  ;;  %2659 = vmatpush.bf16.msra.mxu2 %v8135_v55 }
 0x4ce   :  { %2645 = vmatpush.bf16.msra.mxu1 %v8136_v31  ;;  %2671 = vmatpush.bf16.msra.mxu3 %v8137_v9 }
 0x4cf   :  { %2586 = vmatmul.bf16.vlgmr.msrb.gmra.mxu0 %v6974_v0  ;;  %2612 = vmatmul.bf16.vlgmr.msrb.gmra.mxu2 %v6974_v0 }
 0x4d0   :  { %2634 = vmatpush.bf16.msra.mxu0 %v8138_v1  ;;  %2660 = vmatpush.bf16.msra.mxu2 %v8139_v51 }
 0x4d2   :  { %2646 = vmatpush.bf16.msra.mxu1 %v8140_v39  ;;  %2672 = vmatpush.bf16.msra.mxu3 %v8141_v35 }
 0x4d4   :  { %2635 = vmatpush.bf16.msra.mxu0 %v8142_v5  ;;  %2661 = vmatpush.bf16.msra.mxu2 %v8143_v43 }
 0x4d5   :  { %2599 = vmatmul.bf16.vlgmr.msrb.gmra.mxu1 %v6980_v7  ;;  %2625 = vmatmul.bf16.vlgmr.msrb.gmra.mxu3 %v6980_v7 }
 0x4d6   :  { %2647 = vmatpush.bf16.msra.mxu1 %v8144_v19  ;;  %2673 = vmatpush.bf16.msra.mxu3 %v8145_v59 }
 0x4d8   :  { %2636 = vmatpush.bf16.msra.mxu0 %v8146_v27  ;;  %2662 = vmatpush.bf16.msra.mxu2 %v8226_v49 }
 0x4da   :  { %2648 = vmatpush.bf16.msra.mxu1 %v8227_v36  ;;  %2674 = vmatpush.bf16.msra.mxu3 %v8228_v34 }
 0x4dc   :  { %2637 = vmatpush.bf16.msra.mxu0 %v8229_v12  ;;  %2663 = vmatpush.bf16.msra.mxu2 %v8230_v50 }
 0x4de   :  { %2649 = vmatpush.bf16.msra.mxu1 %v8233_v3  ;;  %2675 = vmatpush.bf16.msra.mxu3 %v8535_v26 }
 0x4df   :  { %2638 = vmatmul.bf16.vlgmr.msra.gmra.mxu0 %v6974_v0  ;;  %2664 = vmatmul.bf16.vlgmr.msra.gmra.mxu2 %v6974_v0 }
 0x4e0   :  { %2682 = vmatpush.bf16.msrb.mxu0 %v8231_v21  ;;  %2708 = vmatpush.bf16.msrb.mxu2 %v8232_v8 }
 0x4e2   :  { %2650 = vmatpush.bf16.msra.mxu1 %v8538_v56  ;;  %2676 = vmatpush.bf16.msra.mxu3 %v8539_v32 }
 0x4e4   :  { %2683 = vmatpush.bf16.msrb.mxu0 %v8536_v46  ;;  %2709 = vmatpush.bf16.msrb.mxu2 %v8537_v40 }
 0x4e5   :  { %2651 = vmatmul.bf16.vlgmr.msra.gmra.mxu1 %v6980_v7  ;;  %2677 = vmatmul.bf16.vlgmr.msra.gmra.mxu3 %v6980_v7 }
 0x4e6   :  { %2695 = vmatpush.bf16.msrb.mxu1 %v8540_v22  ;;  %2721 = vmatpush.bf16.msrb.mxu3 %v8541_v33 }
 0x4e8   :  { %2684 = vmatpush.bf16.msrb.mxu0 %v8542_v29  ;;  %2710 = vmatpush.bf16.msrb.mxu2 %v8543_v28 }
 0x4ea   :  { %2696 = vmatpush.bf16.msrb.mxu1 %v8544_v23  ;;  %2722 = vmatpush.bf16.msrb.mxu3 %v8545_v6 }
 0x4ec   :  { %2685 = vmatpush.bf16.msrb.mxu0 %v8546_v25  ;;  %2711 = vmatpush.bf16.msrb.mxu2 %v8547_v44  ;;  %v4135_v44 = vld [vmem:[%s7697_s0 + $0x148] sm:$0xff] }
 0x4ee   :  { %2697 = vmatpush.bf16.msrb.mxu1 %v8548_v58  ;;  %2723 = vmatpush.bf16.msrb.mxu3 %v8549_v52 }
 0x4f0   :  { %2686 = vmatpush.bf16.msrb.mxu0 %v8550_v38  ;;  %2712 = vmatpush.bf16.msrb.mxu2 %v8551_v4 }
 0x4f2   :  { %2698 = vmatpush.bf16.msrb.mxu1 %v8552_v14  ;;  %2724 = vmatpush.bf16.msrb.mxu3 %v8553_v45  ;;  %v8564_v45 = vld [vmem:[#allocation4_spill] sm:$0xff] }
 0x4f4   :  { %2687 = vmatpush.bf16.msrb.mxu0 %v8554_v42  ;;  %2713 = vmatpush.bf16.msrb.mxu2 %v8555_v10  ;;  %v8565_v42 = vld [vmem:[#allocation6_spill] sm:$0xff]  ;;  %v8566_v10 = vld [vmem:[#allocation125_spill] sm:$0xff] }
 0x4f6   :  { %2699 = vmatpush.bf16.msrb.mxu1 %v8556_v62  ;;  %2725 = vmatpush.bf16.msrb.mxu3 %v8557_v16  ;;  %v8567_v62 = vld [vmem:[#allocation127_spill] sm:$0xff] }
 0x4f8   :  { %2688 = vmatpush.bf16.msrb.mxu0 %v8558_v37  ;;  %2714 = vmatpush.bf16.msrb.mxu2 %v8559_v47  ;;  %v8568_v47 = vld [vmem:[#allocation8_spill] sm:$0xff] }
 0x4fa   :  { %2700 = vmatpush.bf16.msrb.mxu1 %v8560_v24  ;;  %2726 = vmatpush.bf16.msrb.mxu3 %v8561_v61  ;;  %v8569_v24 = vld [vmem:[#allocation10_spill] sm:$0xff]  ;;  %v8570_v61 = vld [vmem:[#allocation129_spill] sm:$0xff] }
 0x4fc   :  { %2689 = vmatpush.bf16.msrb.mxu0 %v8562_v53  ;;  %2715 = vmatpush.bf16.msrb.mxu2 %v8563_v18  ;;  %v8571_v53 = vld [vmem:[#allocation131_spill] sm:$0xff]  ;;  %v8572_v18 = vld [vmem:[#allocation5_spill] sm:$0xff] }
 0x4fe   :  { %2701 = vmatpush.bf16.msrb.mxu1 %v8566_v10  ;;  %2727 = vmatpush.bf16.msrb.mxu3 %v8567_v62  ;;  %v8574_v62 = vld [vmem:[#allocation12_spill] sm:$0xff]  ;;  %v8575_v10 = vld [vmem:[#allocation14_spill] sm:$0xff] }
 0x4ff   :  { %2690 = vmatmul.bf16.vlgmr.msrb.gmra.mxu0 %v6974_v0  ;;  %2716 = vmatmul.bf16.vlgmr.msrb.gmra.mxu2 %v6974_v0  ;;  %v8576_v0 = vld [vmem:[#allocation9_spill] sm:$0xff] }
 0x500   :  { %2871 = vmatpush.bf16.msra.mxu0 %v8564_v45  ;;  %2897 = vmatpush.bf16.msra.mxu2 %v8565_v42  ;;  %v8573_v45 = vld [vmem:[#allocation7_spill] sm:$0xff]  ;;  %v8583_v42 = vld [vmem:[#allocation22_spill] sm:$0xff] }
 0x502   :  { %2702 = vmatpush.bf16.msrb.mxu1 %v8570_v61  ;;  %2728 = vmatpush.bf16.msrb.mxu3 %v8571_v53  ;;  %v8579_v61 = vld [vmem:[#allocation18_spill] sm:$0xff]  ;;  %v8580_v53 = vld [vmem:[#allocation13_spill] sm:$0xff] }
 0x504   :  { %2872 = vmatpush.bf16.msra.mxu0 %v8568_v47  ;;  %2898 = vmatpush.bf16.msra.mxu2 %v8569_v24  ;;  %v8577_v47 = vld [vmem:[#allocation11_spill] sm:$0xff]  ;;  %v8578_v24 = vld [vmem:[#allocation16_spill] sm:$0xff] }
 0x505   :  { %2703 = vmatmul.bf16.vlgmr.msrb.gmra.mxu1 %v6980_v7  ;;  %2729 = vmatmul.bf16.vlgmr.msrb.gmra.mxu3 %v6980_v7  ;;  %v8584_v7 = vld [vmem:[#allocation17_spill] sm:$0xff] }
 0x506   :  { %2884 = vmatpush.bf16.msra.mxu1 %v8572_v18  ;;  %2910 = vmatpush.bf16.msra.mxu3 %v8573_v45  ;;  %v8581_v18 = vld [vmem:[#allocation15_spill] sm:$0xff]  ;;  %v8582_v45 = vld [vmem:[#allocation20_spill] sm:$0xff] }
 0x508   :  { %2873 = vmatpush.bf16.msra.mxu0 %v8574_v62  ;;  %2899 = vmatpush.bf16.msra.mxu2 %v8575_v10  ;;  %v8585_v62 = vld [vmem:[#allocation19_spill] sm:$0xff]  ;;  %v8586_v10 = vld [vmem:[#allocation24_spill] sm:$0xff] }
 0x50a   :  { %2885 = vmatpush.bf16.msra.mxu1 %v8576_v0  ;;  %2911 = vmatpush.bf16.msra.mxu3 %v8577_v47  ;;  %v8587_v0 = vld [vmem:[#allocation26_spill] sm:$0xff]  ;;  %v8588_v47 = vld [vmem:[#allocation21_spill] sm:$0xff] }
 0x50c   :  { %2874 = vmatpush.bf16.msra.mxu0 %v8578_v24  ;;  %2900 = vmatpush.bf16.msra.mxu2 %v8579_v61  ;;  %v8589_v24 = vld [vmem:[#allocation23_spill] sm:$0xff]  ;;  %v8590_v61 = vld [vmem:[#allocation28_spill] sm:$0xff] }
 0x50e   :  { %2886 = vmatpush.bf16.msra.mxu1 %v8580_v53  ;;  %2912 = vmatpush.bf16.msra.mxu3 %v8581_v18  ;;  %v8591_v53 = vld [vmem:[#allocation30_spill] sm:$0xff]  ;;  %v8592_v18 = vld [vmem:[#allocation25_spill] sm:$0xff] }
 0x510   :  { %2875 = vmatpush.bf16.msra.mxu0 %v8582_v45  ;;  %2901 = vmatpush.bf16.msra.mxu2 %v8583_v42  ;;  %v8593_v45 = vld [vmem:[#allocation27_spill] sm:$0xff]  ;;  %v8594_v42 = vld [vmem:[#allocation32_spill] sm:$0xff] }
 0x512   :  { %2887 = vmatpush.bf16.msra.mxu1 %v8584_v7  ;;  %2913 = vmatpush.bf16.msra.mxu3 %v8585_v62  ;;  %v8595_v7 = vld [vmem:[#allocation34_spill] sm:$0xff]  ;;  %v8596_v62 = vld [vmem:[#allocation36_spill] sm:$0xff] }
 0x514   :  { %2876 = vmatpush.bf16.msra.mxu0 %v8586_v10  ;;  %2902 = vmatpush.bf16.msra.mxu2 %v8587_v0  ;;  %v8597_v10 = vld [vmem:[#allocation38_spill] sm:$0xff]  ;;  %v8598_v0 = vld [vmem:[#allocation29_spill] sm:$0xff] }
 0x516   :  { %2888 = vmatpush.bf16.msra.mxu1 %v8588_v47  ;;  %2914 = vmatpush.bf16.msra.mxu3 %v8589_v24  ;;  %v8599_v47 = vld [vmem:[#allocation31_spill] sm:$0xff]  ;;  %v8600_v24 = vld [vmem:[#allocation40_spill] sm:$0xff] }
 0x518   :  { %2877 = vmatpush.bf16.msra.mxu0 %v8590_v61  ;;  %2903 = vmatpush.bf16.msra.mxu2 %v8591_v53  ;;  %v8601_v61 = vld [vmem:[#allocation42_spill] sm:$0xff]  ;;  %v8602_v53 = vld [vmem:[#allocation33_spill] sm:$0xff] }
 0x51a   :  { %2889 = vmatpush.bf16.msra.mxu1 %v8592_v18  ;;  %2915 = vmatpush.bf16.msra.mxu3 %v8593_v45  ;;  %v8603_v18 = vld [vmem:[#allocation35_spill] sm:$0xff]  ;;  %v8604_v45 = vld [vmem:[#allocation37_spill] sm:$0xff] }
 0x51c   :  { %2878 = vmatpush.bf16.msra.mxu0 %v8594_v42  ;;  %2904 = vmatpush.bf16.msra.mxu2 %v8595_v7  ;;  %v8605_v42 = vld [vmem:[#allocation39_spill] sm:$0xff]  ;;  %v8606_v7 = vld [vmem:[#allocation44_spill] sm:$0xff] }
 0x51e   :  { %2890 = vmatpush.bf16.msra.mxu1 %v8598_v0  ;;  %2916 = vmatpush.bf16.msra.mxu3 %v8599_v47  ;;  %v8609_v0 = vld [vmem:[#allocation43_spill] sm:$0xff]  ;;  %v8610_v47 = vld [vmem:[#allocation48_spill] sm:$0xff] }
 0x520   :  { %2923 = vmatpush.bf16.msrb.mxu0 %v8596_v62  ;;  %2949 = vmatpush.bf16.msrb.mxu2 %v8597_v10  ;;  %v8607_v62 = vld [vmem:[#allocation46_spill] sm:$0xff]  ;;  %v8608_v10 = vld [vmem:[#allocation41_spill] sm:$0xff] }
 0x522   :  { %2891 = vmatpush.bf16.msra.mxu1 %v8602_v53  ;;  %2917 = vmatpush.bf16.msra.mxu3 %v8603_v18  ;;  %v8613_v53 = vld [vmem:[#allocation47_spill] sm:$0xff]  ;;  %v8614_v18 = vld [vmem:[#allocation52_spill] sm:$0xff] }
 0x524   :  { %2924 = vmatpush.bf16.msrb.mxu0 %v8600_v24  ;;  %2950 = vmatpush.bf16.msrb.mxu2 %v8601_v61  ;;  %v8611_v24 = vld [vmem:[#allocation50_spill] sm:$0xff]  ;;  %v8612_v61 = vld [vmem:[#allocation45_spill] sm:$0xff] }
 0x526   :  { %2936 = vmatpush.bf16.msrb.mxu1 %v8604_v45  ;;  %2962 = vmatpush.bf16.msrb.mxu3 %v8605_v42  ;;  %v8615_v45 = vld [vmem:[#allocation54_spill] sm:$0xff]  ;;  %v8616_v42 = vld [vmem:[#allocation49_spill] sm:$0xff] }
 0x528   :  { %2925 = vmatpush.bf16.msrb.mxu0 %v8606_v7  ;;  %2951 = vmatpush.bf16.msrb.mxu2 %v8607_v62  ;;  %v8617_v7 = vld [vmem:[#allocation51_spill] sm:$0xff]  ;;  %v8618_v62 = vld [vmem:[#allocation56_spill] sm:$0xff] }
 0x52a   :  { %2937 = vmatpush.bf16.msrb.mxu1 %v8608_v10  ;;  %2963 = vmatpush.bf16.msrb.mxu3 %v8609_v0  ;;  %v8619_v10 = vld [vmem:[#allocation58_spill] sm:$0xff]  ;;  %v8620_v0 = vld [vmem:[#allocation53_spill] sm:$0xff] }
 0x52c   :  { %2926 = vmatpush.bf16.msrb.mxu0 %v8610_v47  ;;  %2952 = vmatpush.bf16.msrb.mxu2 %v8611_v24  ;;  %v8621_v47 = vld [vmem:[#allocation55_spill] sm:$0xff]  ;;  %v8622_v24 = vld [vmem:[#allocation60_spill] sm:$0xff] }
 0x52e   :  { %2938 = vmatpush.bf16.msrb.mxu1 %v8612_v61  ;;  %2964 = vmatpush.bf16.msrb.mxu3 %v8613_v53  ;;  %v8623_v61 = vld [vmem:[#allocation62_spill] sm:$0xff]  ;;  %v8624_v53 = vld [vmem:[#allocation57_spill] sm:$0xff] }
 0x530   :  { %2927 = vmatpush.bf16.msrb.mxu0 %v8614_v18  ;;  %2953 = vmatpush.bf16.msrb.mxu2 %v8615_v45  ;;  %v8625_v18 = vld [vmem:[#allocation59_spill] sm:$0xff]  ;;  %v8626_v45 = vld [vmem:[#allocation64_spill] sm:$0xff] }
 0x532   :  { %2939 = vmatpush.bf16.msrb.mxu1 %v8616_v42  ;;  %2965 = vmatpush.bf16.msrb.mxu3 %v8617_v7  ;;  %v8627_v42 = vld [vmem:[#allocation66_spill] sm:$0xff]  ;;  %v8628_v7 = vld [vmem:[#allocation61_spill] sm:$0xff] }
 0x534   :  { %2928 = vmatpush.bf16.msrb.mxu0 %v8618_v62  ;;  %2954 = vmatpush.bf16.msrb.mxu2 %v8619_v10  ;;  %v8629_v62 = vld [vmem:[#allocation63_spill] sm:$0xff]  ;;  %v8630_v10 = vld [vmem:[#allocation65_spill] sm:$0xff] }
 0x536   :  { %2940 = vmatpush.bf16.msrb.mxu1 %v8620_v0  ;;  %2966 = vmatpush.bf16.msrb.mxu3 %v8621_v47  ;;  %v8631_v0 = vld [vmem:[#allocation67_spill] sm:$0xff] }
 0x538   :  { %2929 = vmatpush.bf16.msrb.mxu0 %v8622_v24  ;;  %2955 = vmatpush.bf16.msrb.mxu2 %v8623_v61 }
 0x53a   :  { %2941 = vmatpush.bf16.msrb.mxu1 %v8624_v53  ;;  %2967 = vmatpush.bf16.msrb.mxu3 %v8625_v18 }
 0x53c   :  { %2930 = vmatpush.bf16.msrb.mxu0 %v8626_v45  ;;  %2956 = vmatpush.bf16.msrb.mxu2 %v8627_v42  ;;  %v2535_v47 = vpop.f32.mrf.mxu0 }
 0x53e   :  { %2942 = vmatpush.bf16.msrb.mxu1 %v8628_v7  ;;  %2968 = vmatpush.bf16.msrb.mxu3 %v8629_v62  ;;  %v4136_v62 = vld [vmem:[%s7697_s0 + $0x150] sm:$0xff] }
 0x542   :  { %2943 = vmatpush.bf16.msrb.mxu1 %v8630_v10  ;;  %2969 = vmatpush.bf16.msrb.mxu3 %v8631_v0  ;;  %v2548_v24 = vpop.f32.mrf.mxu1  ;;  %v2561_v37 = vpop.f32.mrf.mxu2  ;;  %v4134_v0 = vld [vmem:[%s7697_s0 + $0x140] sm:$0xff] }
 0x543   :  { %v2562_v23 = vadd.f32 %v4135_v44, %v2561_v37 }
 0x544   :  { %v2537_v61 = vpop.f32.mrf.mxu0 }
 0x548   :  { %v2574_v16 = vpop.f32.mrf.mxu3 }
 0x54a   :  { %v2550_v53 = vpop.f32.mrf.mxu1  ;;  %v2563_v14 = vpop.f32.mrf.mxu2 }
 0x54b   :  { %v2536_v53 = vadd.f32 %v4134_v0, %v2535_v47 }
 0x54c   :  { %v2587_v18 = vpop.f32.mrf.mxu0 }
 0x54d   :  { %v2588_v10 = vadd.f32 %v4136_v62, %v2587_v18 }
 0x550   :  { %v2576_v4 = vpop.f32.mrf.mxu3 }
 0x551   :  { %v4137_v4 = vld [vmem:[%s7697_s0 + $0x158] sm:$0xff] }
 0x552   :  { %v2600_v45 = vpop.f32.mrf.mxu1  ;;  %v2613_v38 = vpop.f32.mrf.mxu2 }
 0x553   :  { %v2601_v58 = vadd.f32 %v2600_v45, %v2588_v10  ;;  %v2614_v62 = vadd.f32 %v4137_v4, %v2613_v38  ;;  %v2575_v10 = vadd.f32 %v2574_v16, %v2562_v23 }
 0x554   :  { %v2589_v42 = vpop.f32.mrf.mxu0 }
 0x555   :  { %v2549_v42 = vadd.f32 %v2548_v24, %v2536_v53  ;;  %v4144_v25 = vmul.f32 -1.442695, %v2601_v58  ;;  %v4143_v47 = vmul.f32 -1.442695, %v2575_v10 }
 0x557   :  { %4465 = vpow2.f32 %v4144_v25 }
 0x558   :  { %v2626_v7 = vpop.f32.mrf.mxu3 }
 0x559   :  { %v2627_v6 = vadd.f32 %v2626_v7, %v2614_v62 }
 0x55a   :  { %v2602_v52 = vpop.f32.mrf.mxu1  ;;  %v2615_v61 = vpop.f32.mrf.mxu2 }
 0x55b   :  { %v4142_v52 = vmul.f32 -1.442695, %v2549_v42  ;;  %v4145_v29 = vmul.f32 -1.442695, %v2627_v6 }
 0x55c   :  { %v2639_v14 = vpop.f32.mrf.mxu0 }
 0x55d   :  { %4467 = vpow2.f32 %v4142_v52  ;;  %v4466_v24 = vpop.eup %4465 }
 0x55e   :  { %4469 = vpow2.f32 %v4145_v29  ;;  %v7138_v38 = vadd.f32 1.0, %v4466_v24 }
 0x55f   :  { %4471 = vpow2.f32 %v4143_v47 }
 0x560   :  { %v2628_v18 = vpop.f32.mrf.mxu3  ;;  %4473 = vrcp.f32 %v7138_v38  ;;  %v2791_v26 = vand.u32 2147483648, %v7138_v38  ;;  %vm2785_vm9 = vweird.f32 %v7138_v38 }
 0x561   :  { %v4140_v18 = vld [vmem:[%s7697_s0 + $0x170] sm:$0xff] }
 0x562   :  { %v7134_v28 = vpop.f32.mrf.mxu2  ;;  %v2652_v45 = vpop.f32.mrf.mxu1 }
 0x563   :  { %v4468_v44 = vpop.eup %4467 }
 0x564   :  { %v2641_v61 = vpop.f32.mrf.mxu0  ;;  %v4470_v37 = vpop.eup %4469  ;;  %v7140_v7 = vadd.f32 1.0, %v4468_v44 }
 0x565   :  { %v4472_v25 = vpop.eup %4471  ;;  %v7143_v6 = vadd.f32 1.0, %v4470_v37 }
 0x566   :  { %4475 = vrcp.f32 %v7140_v7  ;;  %v7146_v29 = vadd.f32 1.0, %v4472_v25  ;;  %v7148_v16 = vpop.eup %4473  ;;  %vm2747_vm10 = vweird.f32 %v7140_v7 }
 0x567   :  { %4477 = vrcp.f32 %v7143_v6  ;;  %v2781_v4 = vmul.f32 %v7148_v16, %v7138_v38  ;;  %vm2786_vm8 = vweird.f32 %v7148_v16  ;;  %vm2800_vm0 = vweird.f32 %v7143_v6 }
 0x568   :  { %v7136_v0 = vpop.f32.mrf.mxu3  ;;  %4479 = vrcp.f32 %v7146_v29  ;;  %vm7187_vm11 = vmor %vm2785_vm9, %vm2786_vm8  ;;  %vm2762_vm4 = vweird.f32 %v7146_v29 }
 0x569   :  { %v2782_v61 = vsub.f32 1.0, %v2781_v4  ;;  %v4141_v4 = vld [vmem:[%s7697_s0 + $0x178] sm:$0xff] }
 0x56a   :  { %v2667_v53 = vpop.f32.mrf.mxu2  ;;  %v2654_v58 = vpop.f32.mrf.mxu1 }
 0x56b   :  { %v4138_v58 = vld [vmem:[%s7697_s0 + $0x160] sm:$0xff]  ;;  %v2783_v33 = vmul.f32 %v7148_v16, %v2782_v61 }
 0x56c   :  { %v7154_v62 = vpop.eup %4475  ;;  %v2640_v22 = vadd.f32 %v4138_v58, %v2639_v14  ;;  %v2751_v58 = vand.u32 2147483647, %v7140_v7 }
 0x56d   :  { %v7159_v52 = vpop.eup %4477  ;;  %v2743_v10 = vmul.f32 %v7154_v62, %v7140_v7  ;;  %v2784_v61 = vadd.f32 %v7148_v16, %v2783_v33  ;;  %vm2748_vm12 = vweird.f32 %v7154_v62  ;;  %v2768_v33 = vand.u32 2147483648, %v7146_v29 }
 0x56e   :  { %v7163_v24 = vpop.eup %4479  ;;  %v2796_v53 = vmul.f32 %v7159_v52, %v7143_v6  ;;  %v2653_v40 = vadd.f32 %v2652_v45, %v2640_v22  ;;  %v2789_v22 = vand.u32 2147483647, %v7138_v38  ;;  %vm2801_vm13 = vweird.f32 %v7159_v52  ;;  %vm7206_vm15 = vmor %vm2747_vm10, %vm2748_vm12 }
 0x56f   :  { %v2744_v25 = vsub.f32 1.0, %v2743_v10  ;;  %v2788_v38 = vsel %vm7187_vm11, %v7148_v16, %v2784_v61  ;;  %v2804_v16 = vand.u32 2147483647, %v7143_v6  ;;  %vm7215_vm1 = vmor %vm2800_vm0, %vm2801_vm13  ;;  %vm2752_vm2 = vcmp.eq.f32.partialorder %v2751_v58, 8.507059e+37 }
 0x570   :  { %v2680_v23 = vpop.f32.mrf.mxu3  ;;  %v2797_v56 = vsub.f32 1.0, %v2796_v53  ;;  %vm2790_vm14 = vcmp.eq.f32.partialorder %v2789_v22, 8.507059e+37  ;;  %vm2763_vm3 = vweird.f32 %v7163_v24 }
 0x571   :  { %v2745_v10 = vmul.f32 %v7154_v62, %v2744_v25  ;;  %vm2805_vm5 = vcmp.eq.f32.partialorder %v2804_v16, 8.507059e+37  ;;  %vm2764_vm6 = vmor %vm2762_vm4, %vm2763_vm3 }
 0x57c   :  { %v2691_v42 = vpop.f32.mrf.mxu0 }
 0x57d   :  { %v2692_v47 = vadd.f32 %v4140_v18, %v2691_v42  ;;  %v2758_v18 = vmul.f32 %v7163_v24, %v7146_v29 }
 0x582   :  { %v2704_v44 = vpop.f32.mrf.mxu1  ;;  %v2717_v37 = vpop.f32.mrf.mxu2 }
 0x583   :  { %v2705_v23 = vadd.f32 %v2704_v44, %v2692_v47  ;;  %v2718_v46 = vadd.f32 %v4141_v4, %v2717_v37  ;;  %v4139_v47 = vld [vmem:[%s7697_s0 + $0x168] sm:$0xff]  ;;  %v2792_v4 = vor.u32 1.1754944e-38, %v2791_v26 }
 0x584   :  { %v2693_v42 = vpop.f32.mrf.mxu0  ;;  %v2666_v37 = vadd.f32 %v4139_v47, %v7134_v28 }
 0x585   :  { %v4146_v32 = vmul.f32 -1.442695, %v2705_v23  ;;  %v2759_v42 = vsub.f32 1.0, %v2758_v18  ;;  %v2746_v23 = vadd.f32 %v7154_v62, %v2745_v10  ;;  %v2806_v10 = vand.u32 2147483648, %v7143_v6 }
 0x586   :  { %v2679_v18 = vadd.f32 %v7136_v0, %v2666_v37  ;;  %v2793_v26 = vsel %vm2790_vm14, %v2792_v4, %v2788_v38  ;;  %v2766_v37 = vand.u32 2147483647, %v7146_v29 }
 0x587   :  { %4481 = vpow2.f32 %v4146_v32  ;;  %v2798_v32 = vmul.f32 %v7159_v52, %v2797_v56  ;;  %v2753_v56 = vand.u32 2147483648, %v7140_v7  ;;  %v2750_v0 = vsel %vm7206_vm15, %v7154_v62, %v2746_v23 }
 0x588   :  { %v2730_v44 = vpop.f32.mrf.mxu3  ;;  %4483 = vtanh.f32 %v2653_v40  ;;  %vm2767_vm7 = vcmp.eq.f32.partialorder %v2766_v37, 8.507059e+37 }
 0x589   :  { %v2731_v14 = vadd.f32 %v2730_v44, %v2718_v46  ;;  %v2760_v44 = vmul.f32 %v7163_v24, %v2759_v42  ;;  %v2799_v40 = vadd.f32 %v7159_v52, %v2798_v32  ;;  %v2754_v7 = vor.u32 1.1754944e-38, %v2753_v56 }
 0x58a   :  { %v2706_v45 = vpop.f32.mrf.mxu1  ;;  %v2719_v53 = vpop.f32.mrf.mxu2  ;;  %v2850_v32 = vmul.f32 %v2793_v26, %v6966_v13 }
 0x58b   :  { %v4147_v46 = vmul.f32 -1.442695, %v2731_v14  ;;  %v2761_v22 = vadd.f32 %v7163_v24, %v2760_v44  ;;  %v2803_v6 = vsel %vm7215_vm1, %v7159_v52, %v2799_v40  ;;  %v2807_v45 = vor.u32 1.1754944e-38, %v2806_v10 }
 0x58c   :  { %v2755_v53 = vsel %vm2752_vm2, %v2754_v7, %v2750_v0 }
 0x58d   :  { %v4482_v25 = vpop.eup %4481  ;;  %4485 = vpow2.f32 %v4147_v46  ;;  %v2808_v46 = vsel %vm2805_vm5, %v2807_v45, %v2803_v6  ;;  %v2765_v38 = vsel %vm2764_vm6, %v7163_v24, %v2761_v22 }
 0x58e   :  { %v2818_v28 = vadd.f32 1.0, %v4482_v25  ;;  %v4484_v42 = vpop.eup %4483  ;;  %v2769_v25 = vor.u32 1.1754944e-38, %v2768_v33 }
 0x58f   :  { %v2852_v58 = vmul.f32 %v4484_v42, %v2755_v53 }
 0x590   :  { %4487 = vrcp.f32 %v2818_v28  ;;  %v2732_v61 = vpop.f32.mrf.mxu3  ;;  %v2770_v44 = vsel %vm2767_vm7, %v2769_v25, %v2765_v38  ;;  %v2831_v10 = vand.u32 2147483648, %v2818_v28  ;;  %v2829_v26 = vand.u32 2147483647, %v2818_v28  ;;  %v8640_v25 = vld [vmem:[#allocation106_spill] sm:$0xff] }
 0x591   :  { %4489 = vtanh.f32 %v2679_v18  ;;  %v7228_v56 = vadd.f32 %v2852_v58, %v2850_v32  ;;  %v2851_v18 = vmul.f32 %v2808_v46, %v6971_v17  ;;  %vm2825_vm9 = vweird.f32 %v2818_v28 }
 0x592   :  { %v2832_v42 = vor.u32 1.1754944e-38, %v2831_v10  ;;  %vm2830_vm11 = vcmp.eq.f32.partialorder %v2829_v26, 8.507059e+37  ;;  %v8646_v10 = vld [vmem:[#allocation110_spill] sm:$0xff]  ;;  %v8648_v26 = vld [vmem:[#allocation107_spill] sm:$0xff] }
 0x593   :  { %v4486_v62 = vpop.eup %4485 }
 0x594   :  { %v2819_v13 = vadd.f32 1.0, %v4486_v62 }
 0x596   :  { %v4488_v23 = vpop.eup %4487  ;;  %4491 = vrcp.f32 %v2819_v13  ;;  %v2846_v22 = vand.u32 2147483648, %v2819_v13  ;;  %v2844_v45 = vand.u32 2147483647, %v2819_v13  ;;  %vm2840_vm13 = vweird.f32 %v2819_v13 }
 0x597   :  { %v4490_v52 = vpop.eup %4489  ;;  %v2821_v4 = vmul.f32 %v4488_v23, %v2818_v28  ;;  %4493 = vtanh.f32 %v7228_v56  ;;  %vm2826_vm8 = vweird.f32 %v4488_v23 }
 0x598   :  { %v2853_v29 = vmul.f32 %v4490_v52, %v2770_v44  ;;  %vm2827_vm10 = vmor %vm2825_vm9, %vm2826_vm8  ;;  %v2847_v28 = vor.u32 1.1754944e-38, %v2846_v22  ;;  %vm2845_vm15 = vcmp.eq.f32.partialorder %v2844_v45, 8.507059e+37  ;;  %v8639_v52 = vld [vmem:[#allocation104_spill] sm:$0xff]  ;;  %v8643_v44 = vld [vmem:[#allocation101_spill] sm:$0xff] }
 0x599   :  { %v2822_v40 = vsub.f32 1.0, %v2821_v4  ;;  %v8641_v4 = vld [vmem:[#allocation97_spill] sm:$0xff]  ;;  %v8657_v22 = vld [vmem:[#allocation120_spill] sm:$0xff]  ;;  %v8660_v45 = vld [vmem:[#allocation119_spill] sm:$0xff] }
 0x59a   :  { %v7233_v16 = vadd.f32 %v2853_v29, %v2851_v18  ;;  %v8642_v18 = vld [vmem:[#allocation99_spill] sm:$0xff]  ;;  %v8645_v29 = vld [vmem:[#allocation108_spill] sm:$0xff] }
 0x59b   :  { %v2823_v47 = vmul.f32 %v4488_v23, %v2822_v40  ;;  %v8644_v40 = vld [vmem:[#allocation103_spill] sm:$0xff] }
 0x59c   :  { %v4492_v0 = vpop.eup %4491  ;;  %4495 = vtanh.f32 %v7233_v16 }
 0x59d   :  { %v2824_v24 = vadd.f32 %v4488_v23, %v2823_v47  ;;  %v2836_v61 = vmul.f32 %v4492_v0, %v2819_v13  ;;  %v4494_v7 = vpop.eup %4493  ;;  %vm2841_vm12 = vweird.f32 %v4492_v0  ;;  %v8638_v13 = vld [vmem:[#allocation95_spill] sm:$0xff]  ;;  %v8647_v47 = vld [vmem:[#allocation105_spill] sm:$0xff] }
 0x59e   :  { %vm2842_vm14 = vmor %vm2840_vm13, %vm2841_vm12 }
 0x59f   :  { %v2828_v14 = vsel %vm2827_vm10, %v4488_v23, %v2824_v24  ;;  %v2837_v17 = vsub.f32 1.0, %v2836_v61  ;;  %v8650_v24 = vld [vmem:[#allocation114_spill] sm:$0xff]  ;;  %v8651_v61 = vld [vmem:[#allocation109_spill] sm:$0xff] }
 0x5a0   :  { %v2833_v32 = vsel %vm2830_vm11, %v2832_v42, %v2828_v14  ;;  %v8652_v42 = vld [vmem:[#allocation111_spill] sm:$0xff]  ;;  %v8653_v14 = vld [vmem:[#allocation116_spill] sm:$0xff] }
 0x5a1   :  { %v2858_v6 = vmul.f32 %v4494_v7, %v2833_v32  ;;  %v2838_v62 = vmul.f32 %v4492_v0, %v2837_v17  ;;  %v8654_v17 = vld [vmem:[#allocation118_spill] sm:$0xff]  ;;  %v8655_v7 = vld [vmem:[#allocation113_spill] sm:$0xff]  ;;  %v8656_v32 = vld [vmem:[#allocation115_spill] sm:$0xff] }
 0x5a2   :  { %v4496_v37 = vpop.eup %4495 }
 0x5a3   :  { %v7236_v53 = vpack.c.bf16 %v2858_v6, %v2858_v6  ;;  %v2839_v33 = vadd.f32 %v4492_v0, %v2838_v62  ;;  %v8658_v6 = vld [vmem:[#allocation122_spill] sm:$0xff]  ;;  %v8659_v62 = vld [vmem:[#allocation117_spill] sm:$0xff] }
 0x5a5   :  { %v2843_v58 = vsel %vm2842_vm14, %v4492_v0, %v2839_v33  ;;  %2879 = vmatmul.bf16.vlgmr.msra.gmra.mxu0 %v7236_v53  ;;  %2905 = vmatmul.bf16.vlgmr.msra.gmra.mxu2 %v7236_v53  ;;  %v8649_v0 = vld [vmem:[#allocation112_spill] sm:$0xff] }
 0x5a6   :  { %v2848_v46 = vsel %vm2845_vm15, %v2847_v28, %v2843_v58  ;;  %2975 = vmatpush.bf16.msra.mxu0 %v8124_v11  ;;  %3001 = vmatpush.bf16.msra.mxu2 %v8125_v15  ;;  %v8661_v33 = vld [vmem:[#allocation124_spill] sm:$0xff]  ;;  %v8662_v28 = vld [vmem:[#allocation126_spill] sm:$0xff]  ;;  %v8663_v58 = vld [vmem:[#allocation121_spill] sm:$0xff] }
 0x5a7   :  { %v2859_v23 = vmul.f32 %v4496_v37, %v2848_v46  ;;  %v8664_v37 = vld [vmem:[#allocation123_spill] sm:$0xff]  ;;  %v8665_v46 = vld [vmem:[#allocation128_spill] sm:$0xff] }
 0x5a9   :  { %v7242_v38 = vpack.c.bf16 %v2859_v23, %v2859_v23  ;;  %v8666_v23 = vld [vmem:[#allocation130_spill] sm:$0xff] }
 0x5aa   :  { %2976 = vmatpush.bf16.msra.mxu0 %v8126_v48  ;;  %3002 = vmatpush.bf16.msra.mxu2 %v8127_v57 }
 0x5ab   :  { %2892 = vmatmul.bf16.vlgmr.msra.gmra.mxu1 %v7242_v38  ;;  %2918 = vmatmul.bf16.vlgmr.msra.gmra.mxu3 %v7242_v38 }
 0x5ac   :  { %2988 = vmatpush.bf16.msra.mxu1 %v8128_v63  ;;  %3014 = vmatpush.bf16.msra.mxu3 %v8129_v2 }
 0x5ae   :  { %2977 = vmatpush.bf16.msra.mxu0 %v8130_v20  ;;  %3003 = vmatpush.bf16.msra.mxu2 %v8131_v30 }
 0x5b0   :  { %2989 = vmatpush.bf16.msra.mxu1 %v8132_v60  ;;  %3015 = vmatpush.bf16.msra.mxu3 %v8133_v41 }
 0x5b2   :  { %2978 = vmatpush.bf16.msra.mxu0 %v8134_v54  ;;  %3004 = vmatpush.bf16.msra.mxu2 %v8135_v55 }
 0x5b4   :  { %2990 = vmatpush.bf16.msra.mxu1 %v8136_v31  ;;  %3016 = vmatpush.bf16.msra.mxu3 %v8137_v9 }
 0x5b5   :  { %2931 = vmatmul.bf16.vlgmr.msrb.gmra.mxu0 %v7236_v53  ;;  %2957 = vmatmul.bf16.vlgmr.msrb.gmra.mxu2 %v7236_v53 }
 0x5b6   :  { %2979 = vmatpush.bf16.msra.mxu0 %v8138_v1  ;;  %3005 = vmatpush.bf16.msra.mxu2 %v8139_v51 }
 0x5b8   :  { %2991 = vmatpush.bf16.msra.mxu1 %v8140_v39  ;;  %3017 = vmatpush.bf16.msra.mxu3 %v8141_v35 }
 0x5ba   :  { %2980 = vmatpush.bf16.msra.mxu0 %v8142_v5  ;;  %3006 = vmatpush.bf16.msra.mxu2 %v8143_v43 }
 0x5bb   :  { %2944 = vmatmul.bf16.vlgmr.msrb.gmra.mxu1 %v7242_v38  ;;  %2970 = vmatmul.bf16.vlgmr.msrb.gmra.mxu3 %v7242_v38 }
 0x5bc   :  { %2992 = vmatpush.bf16.msra.mxu1 %v8144_v19  ;;  %3018 = vmatpush.bf16.msra.mxu3 %v8145_v59 }
 0x5be   :  { %2981 = vmatpush.bf16.msra.mxu0 %v8146_v27  ;;  %3007 = vmatpush.bf16.msra.mxu2 %v8226_v49 }
 0x5c0   :  { %2993 = vmatpush.bf16.msra.mxu1 %v8227_v36  ;;  %3019 = vmatpush.bf16.msra.mxu3 %v8228_v34 }
 0x5c2   :  { %2982 = vmatpush.bf16.msra.mxu0 %v8229_v12  ;;  %3008 = vmatpush.bf16.msra.mxu2 %v8230_v50 }
 0x5c4   :  { %2994 = vmatpush.bf16.msra.mxu1 %v8233_v3  ;;  %3020 = vmatpush.bf16.msra.mxu3 %v8638_v13 }
 0x5c5   :  { %2983 = vmatmul.bf16.vlgmr.msra.gmra.mxu0 %v7236_v53  ;;  %3009 = vmatmul.bf16.vlgmr.msra.gmra.mxu2 %v7236_v53 }
 0x5c6   :  { %3027 = vmatpush.bf16.msrb.mxu0 %v8231_v21  ;;  %3053 = vmatpush.bf16.msrb.mxu2 %v8232_v8 }
 0x5c8   :  { %2995 = vmatpush.bf16.msra.mxu1 %v8641_v4  ;;  %3021 = vmatpush.bf16.msra.mxu3 %v8642_v18 }
 0x5ca   :  { %3028 = vmatpush.bf16.msrb.mxu0 %v8639_v52  ;;  %3054 = vmatpush.bf16.msrb.mxu2 %v8640_v25 }
 0x5cb   :  { %2996 = vmatmul.bf16.vlgmr.msra.gmra.mxu1 %v7242_v38  ;;  %3022 = vmatmul.bf16.vlgmr.msra.gmra.mxu3 %v7242_v38 }
 0x5cc   :  { %3040 = vmatpush.bf16.msrb.mxu1 %v8643_v44  ;;  %3066 = vmatpush.bf16.msrb.mxu3 %v8644_v40 }
 0x5ce   :  { %3029 = vmatpush.bf16.msrb.mxu0 %v8645_v29  ;;  %3055 = vmatpush.bf16.msrb.mxu2 %v8646_v10 }
 0x5d0   :  { %3041 = vmatpush.bf16.msrb.mxu1 %v8647_v47  ;;  %3067 = vmatpush.bf16.msrb.mxu3 %v8648_v26 }
 0x5d2   :  { %3030 = vmatpush.bf16.msrb.mxu0 %v8649_v0  ;;  %3056 = vmatpush.bf16.msrb.mxu2 %v8650_v24  ;;  %v4149_v24 = vld [vmem:[%s7697_s0 + $0x188] sm:$0xff] }
 0x5d4   :  { %3042 = vmatpush.bf16.msrb.mxu1 %v8651_v61  ;;  %3068 = vmatpush.bf16.msrb.mxu3 %v8652_v42 }
 0x5d6   :  { %3031 = vmatpush.bf16.msrb.mxu0 %v8653_v14  ;;  %3057 = vmatpush.bf16.msrb.mxu2 %v8654_v17 }
 0x5d8   :  { %3043 = vmatpush.bf16.msrb.mxu1 %v8655_v7  ;;  %3069 = vmatpush.bf16.msrb.mxu3 %v8656_v32  ;;  %v8667_v32 = vld [vmem:[#allocation4_spill] sm:$0xff] }
 0x5da   :  { %3032 = vmatpush.bf16.msrb.mxu0 %v8657_v22  ;;  %3058 = vmatpush.bf16.msrb.mxu2 %v8658_v6  ;;  %v8668_v22 = vld [vmem:[#allocation6_spill] sm:$0xff]  ;;  %v8669_v6 = vld [vmem:[#allocation125_spill] sm:$0xff] }
 0x5dc   :  { %3044 = vmatpush.bf16.msrb.mxu1 %v8659_v62  ;;  %3070 = vmatpush.bf16.msrb.mxu3 %v8660_v45  ;;  %v8670_v62 = vld [vmem:[#allocation127_spill] sm:$0xff] }
 0x5de   :  { %3033 = vmatpush.bf16.msrb.mxu0 %v8661_v33  ;;  %3059 = vmatpush.bf16.msrb.mxu2 %v8662_v28  ;;  %v8671_v28 = vld [vmem:[#allocation8_spill] sm:$0xff] }
 0x5e0   :  { %3045 = vmatpush.bf16.msrb.mxu1 %v8663_v58  ;;  %3071 = vmatpush.bf16.msrb.mxu3 %v8664_v37  ;;  %v8672_v58 = vld [vmem:[#allocation10_spill] sm:$0xff]  ;;  %v8673_v37 = vld [vmem:[#allocation129_spill] sm:$0xff] }
 0x5e2   :  { %3034 = vmatpush.bf16.msrb.mxu0 %v8665_v46  ;;  %3060 = vmatpush.bf16.msrb.mxu2 %v8666_v23  ;;  %v8674_v46 = vld [vmem:[#allocation131_spill] sm:$0xff]  ;;  %v8675_v23 = vld [vmem:[#allocation5_spill] sm:$0xff] }
 0x5e4   :  { %3046 = vmatpush.bf16.msrb.mxu1 %v8669_v6  ;;  %3072 = vmatpush.bf16.msrb.mxu3 %v8670_v62  ;;  %v8678_v62 = vld [vmem:[#allocation14_spill] sm:$0xff] }
 0x5e5   :  { %3035 = vmatmul.bf16.vlgmr.msrb.gmra.mxu0 %v7236_v53  ;;  %3061 = vmatmul.bf16.vlgmr.msrb.gmra.mxu2 %v7236_v53  ;;  %v8679_v53 = vld [vmem:[#allocation9_spill] sm:$0xff]  ;;  %v8686_v6 = vld [vmem:[#allocation22_spill] sm:$0xff] }
 0x5e6   :  { %3216 = vmatpush.bf16.msra.mxu0 %v8667_v32  ;;  %3242 = vmatpush.bf16.msra.mxu2 %v8668_v22  ;;  %v8676_v32 = vld [vmem:[#allocation7_spill] sm:$0xff]  ;;  %v8677_v22 = vld [vmem:[#allocation12_spill] sm:$0xff] }
 0x5e8   :  { %3047 = vmatpush.bf16.msrb.mxu1 %v8673_v37  ;;  %3073 = vmatpush.bf16.msrb.mxu3 %v8674_v46  ;;  %v8682_v37 = vld [vmem:[#allocation18_spill] sm:$0xff]  ;;  %v8683_v46 = vld [vmem:[#allocation13_spill] sm:$0xff] }
 0x5ea   :  { %3217 = vmatpush.bf16.msra.mxu0 %v8671_v28  ;;  %3243 = vmatpush.bf16.msra.mxu2 %v8672_v58  ;;  %v8680_v28 = vld [vmem:[#allocation11_spill] sm:$0xff]  ;;  %v8681_v58 = vld [vmem:[#allocation16_spill] sm:$0xff] }
 0x5eb   :  { %3048 = vmatmul.bf16.vlgmr.msrb.gmra.mxu1 %v7242_v38  ;;  %3074 = vmatmul.bf16.vlgmr.msrb.gmra.mxu3 %v7242_v38  ;;  %v8687_v38 = vld [vmem:[#allocation17_spill] sm:$0xff] }
 0x5ec   :  { %3229 = vmatpush.bf16.msra.mxu1 %v8675_v23  ;;  %3255 = vmatpush.bf16.msra.mxu3 %v8676_v32  ;;  %v8684_v23 = vld [vmem:[#allocation15_spill] sm:$0xff]  ;;  %v8685_v32 = vld [vmem:[#allocation20_spill] sm:$0xff] }
 0x5ee   :  { %3218 = vmatpush.bf16.msra.mxu0 %v8677_v22  ;;  %3244 = vmatpush.bf16.msra.mxu2 %v8678_v62  ;;  %v8688_v22 = vld [vmem:[#allocation19_spill] sm:$0xff]  ;;  %v8689_v62 = vld [vmem:[#allocation24_spill] sm:$0xff] }
 0x5f0   :  { %3230 = vmatpush.bf16.msra.mxu1 %v8679_v53  ;;  %3256 = vmatpush.bf16.msra.mxu3 %v8680_v28  ;;  %v8690_v53 = vld [vmem:[#allocation26_spill] sm:$0xff]  ;;  %v8691_v28 = vld [vmem:[#allocation21_spill] sm:$0xff] }
 0x5f2   :  { %3219 = vmatpush.bf16.msra.mxu0 %v8681_v58  ;;  %3245 = vmatpush.bf16.msra.mxu2 %v8682_v37  ;;  %v8692_v58 = vld [vmem:[#allocation23_spill] sm:$0xff]  ;;  %v8693_v37 = vld [vmem:[#allocation28_spill] sm:$0xff] }
 0x5f4   :  { %3231 = vmatpush.bf16.msra.mxu1 %v8683_v46  ;;  %3257 = vmatpush.bf16.msra.mxu3 %v8684_v23  ;;  %v8694_v46 = vld [vmem:[#allocation30_spill] sm:$0xff]  ;;  %v8695_v23 = vld [vmem:[#allocation25_spill] sm:$0xff] }
 0x5f6   :  { %3220 = vmatpush.bf16.msra.mxu0 %v8685_v32  ;;  %3246 = vmatpush.bf16.msra.mxu2 %v8686_v6  ;;  %v8696_v32 = vld [vmem:[#allocation27_spill] sm:$0xff]  ;;  %v8697_v6 = vld [vmem:[#allocation32_spill] sm:$0xff] }
 0x5f8   :  { %3232 = vmatpush.bf16.msra.mxu1 %v8687_v38  ;;  %3258 = vmatpush.bf16.msra.mxu3 %v8688_v22  ;;  %v8698_v38 = vld [vmem:[#allocation34_spill] sm:$0xff]  ;;  %v8699_v22 = vld [vmem:[#allocation36_spill] sm:$0xff] }
 0x5fa   :  { %3221 = vmatpush.bf16.msra.mxu0 %v8689_v62  ;;  %3247 = vmatpush.bf16.msra.mxu2 %v8690_v53  ;;  %v8700_v62 = vld [vmem:[#allocation38_spill] sm:$0xff]  ;;  %v8701_v53 = vld [vmem:[#allocation29_spill] sm:$0xff] }
 0x5fc   :  { %3233 = vmatpush.bf16.msra.mxu1 %v8691_v28  ;;  %3259 = vmatpush.bf16.msra.mxu3 %v8692_v58  ;;  %v8702_v28 = vld [vmem:[#allocation31_spill] sm:$0xff]  ;;  %v8703_v58 = vld [vmem:[#allocation40_spill] sm:$0xff] }
 0x5fe   :  { %3222 = vmatpush.bf16.msra.mxu0 %v8693_v37  ;;  %3248 = vmatpush.bf16.msra.mxu2 %v8694_v46  ;;  %v8704_v37 = vld [vmem:[#allocation42_spill] sm:$0xff]  ;;  %v8705_v46 = vld [vmem:[#allocation33_spill] sm:$0xff] }
 0x600   :  { %3234 = vmatpush.bf16.msra.mxu1 %v8695_v23  ;;  %3260 = vmatpush.bf16.msra.mxu3 %v8696_v32  ;;  %v8706_v23 = vld [vmem:[#allocation35_spill] sm:$0xff]  ;;  %v8707_v32 = vld [vmem:[#allocation37_spill] sm:$0xff] }
 0x602   :  { %3223 = vmatpush.bf16.msra.mxu0 %v8697_v6  ;;  %3249 = vmatpush.bf16.msra.mxu2 %v8698_v38  ;;  %v8708_v6 = vld [vmem:[#allocation39_spill] sm:$0xff]  ;;  %v8709_v38 = vld [vmem:[#allocation44_spill] sm:$0xff] }
 0x604   :  { %3235 = vmatpush.bf16.msra.mxu1 %v8701_v53  ;;  %3261 = vmatpush.bf16.msra.mxu3 %v8702_v28  ;;  %v8712_v53 = vld [vmem:[#allocation43_spill] sm:$0xff]  ;;  %v8713_v28 = vld [vmem:[#allocation48_spill] sm:$0xff] }
 0x606   :  { %3268 = vmatpush.bf16.msrb.mxu0 %v8699_v22  ;;  %3294 = vmatpush.bf16.msrb.mxu2 %v8700_v62  ;;  %v8710_v22 = vld [vmem:[#allocation46_spill] sm:$0xff]  ;;  %v8711_v62 = vld [vmem:[#allocation41_spill] sm:$0xff] }
 0x608   :  { %3236 = vmatpush.bf16.msra.mxu1 %v8705_v46  ;;  %3262 = vmatpush.bf16.msra.mxu3 %v8706_v23  ;;  %v8716_v46 = vld [vmem:[#allocation47_spill] sm:$0xff]  ;;  %v8717_v23 = vld [vmem:[#allocation52_spill] sm:$0xff] }
 0x60a   :  { %3269 = vmatpush.bf16.msrb.mxu0 %v8703_v58  ;;  %3295 = vmatpush.bf16.msrb.mxu2 %v8704_v37  ;;  %v8714_v58 = vld [vmem:[#allocation50_spill] sm:$0xff]  ;;  %v8715_v37 = vld [vmem:[#allocation45_spill] sm:$0xff] }
 0x60c   :  { %3281 = vmatpush.bf16.msrb.mxu1 %v8707_v32  ;;  %3307 = vmatpush.bf16.msrb.mxu3 %v8708_v6  ;;  %v8718_v32 = vld [vmem:[#allocation54_spill] sm:$0xff]  ;;  %v8719_v6 = vld [vmem:[#allocation49_spill] sm:$0xff] }
 0x60e   :  { %3270 = vmatpush.bf16.msrb.mxu0 %v8709_v38  ;;  %3296 = vmatpush.bf16.msrb.mxu2 %v8710_v22  ;;  %v8720_v38 = vld [vmem:[#allocation51_spill] sm:$0xff]  ;;  %v8721_v22 = vld [vmem:[#allocation56_spill] sm:$0xff] }
 0x610   :  { %3282 = vmatpush.bf16.msrb.mxu1 %v8711_v62  ;;  %3308 = vmatpush.bf16.msrb.mxu3 %v8712_v53  ;;  %v8722_v62 = vld [vmem:[#allocation58_spill] sm:$0xff]  ;;  %v8723_v53 = vld [vmem:[#allocation53_spill] sm:$0xff] }
 0x612   :  { %3271 = vmatpush.bf16.msrb.mxu0 %v8713_v28  ;;  %3297 = vmatpush.bf16.msrb.mxu2 %v8714_v58  ;;  %v8724_v28 = vld [vmem:[#allocation55_spill] sm:$0xff]  ;;  %v8725_v58 = vld [vmem:[#allocation60_spill] sm:$0xff] }
 0x614   :  { %3283 = vmatpush.bf16.msrb.mxu1 %v8715_v37  ;;  %3309 = vmatpush.bf16.msrb.mxu3 %v8716_v46  ;;  %v8726_v37 = vld [vmem:[#allocation62_spill] sm:$0xff]  ;;  %v8727_v46 = vld [vmem:[#allocation57_spill] sm:$0xff] }
 0x616   :  { %3272 = vmatpush.bf16.msrb.mxu0 %v8717_v23  ;;  %3298 = vmatpush.bf16.msrb.mxu2 %v8718_v32  ;;  %v8728_v23 = vld [vmem:[#allocation59_spill] sm:$0xff]  ;;  %v8729_v32 = vld [vmem:[#allocation64_spill] sm:$0xff] }
 0x618   :  { %3284 = vmatpush.bf16.msrb.mxu1 %v8719_v6  ;;  %3310 = vmatpush.bf16.msrb.mxu3 %v8720_v38  ;;  %v8730_v6 = vld [vmem:[#allocation66_spill] sm:$0xff]  ;;  %v8731_v38 = vld [vmem:[#allocation61_spill] sm:$0xff] }
 0x61a   :  { %3273 = vmatpush.bf16.msrb.mxu0 %v8721_v22  ;;  %3299 = vmatpush.bf16.msrb.mxu2 %v8722_v62  ;;  %v8732_v22 = vld [vmem:[#allocation63_spill] sm:$0xff]  ;;  %v8733_v62 = vld [vmem:[#allocation65_spill] sm:$0xff] }
 0x61c   :  { %3285 = vmatpush.bf16.msrb.mxu1 %v8723_v53  ;;  %3311 = vmatpush.bf16.msrb.mxu3 %v8724_v28  ;;  %v8734_v53 = vld [vmem:[#allocation67_spill] sm:$0xff] }
 0x61e   :  { %3274 = vmatpush.bf16.msrb.mxu0 %v8725_v58  ;;  %3300 = vmatpush.bf16.msrb.mxu2 %v8726_v37 }
 0x620   :  { %3286 = vmatpush.bf16.msrb.mxu1 %v8727_v46  ;;  %3312 = vmatpush.bf16.msrb.mxu3 %v8728_v23 }
 0x622   :  { %3275 = vmatpush.bf16.msrb.mxu0 %v8729_v32  ;;  %3301 = vmatpush.bf16.msrb.mxu2 %v8730_v6  ;;  %v2880_v28 = vpop.f32.mrf.mxu0 }
 0x624   :  { %3287 = vmatpush.bf16.msrb.mxu1 %v8731_v38  ;;  %3313 = vmatpush.bf16.msrb.mxu3 %v8732_v22  ;;  %v4150_v38 = vld [vmem:[%s7697_s0 + $0x190] sm:$0xff] }
 0x628   :  { %3288 = vmatpush.bf16.msrb.mxu1 %v8733_v62  ;;  %3314 = vmatpush.bf16.msrb.mxu3 %v8734_v53  ;;  %v2893_v58 = vpop.f32.mrf.mxu1  ;;  %v2906_v33 = vpop.f32.mrf.mxu2  ;;  %v4148_v53 = vld [vmem:[%s7697_s0 + $0x180] sm:$0xff] }
 0x629   :  { %v2907_v47 = vadd.f32 %v4149_v24, %v2906_v33 }
 0x62a   :  { %v2882_v37 = vpop.f32.mrf.mxu0 }
 0x62e   :  { %v2919_v45 = vpop.f32.mrf.mxu3 }
 0x630   :  { %v2895_v46 = vpop.f32.mrf.mxu1  ;;  %v2908_v7 = vpop.f32.mrf.mxu2 }
 0x631   :  { %v2881_v46 = vadd.f32 %v4148_v53, %v2880_v28 }
 0x632   :  { %v2932_v23 = vpop.f32.mrf.mxu0 }
 0x633   :  { %v2933_v62 = vadd.f32 %v4150_v38, %v2932_v23 }
 0x636   :  { %v2921_v17 = vpop.f32.mrf.mxu3 }
 0x637   :  { %v4151_v17 = vld [vmem:[%s7697_s0 + $0x198] sm:$0xff] }
 0x638   :  { %v2945_v32 = vpop.f32.mrf.mxu1  ;;  %v2958_v14 = vpop.f32.mrf.mxu2 }
 0x639   :  { %v2946_v61 = vadd.f32 %v2945_v32, %v2933_v62  ;;  %v2959_v23 = vadd.f32 %v4151_v17, %v2958_v14  ;;  %v2920_v62 = vadd.f32 %v2919_v45, %v2907_v47 }
 0x63a   :  { %v2934_v6 = vpop.f32.mrf.mxu0 }
 0x63b   :  { %v2894_v6 = vadd.f32 %v2893_v58, %v2881_v46  ;;  %v4158_v0 = vmul.f32 -1.442695, %v2946_v61  ;;  %v4157_v28 = vmul.f32 -1.442695, %v2920_v62 }
 0x63d   :  { %4497 = vpow2.f32 %v4158_v0 }
 0x63e   :  { %v2971_v22 = vpop.f32.mrf.mxu3 }
 0x63f   :  { %v2972_v26 = vadd.f32 %v2971_v22, %v2959_v23 }
 0x640   :  { %v2947_v42 = vpop.f32.mrf.mxu1  ;;  %v2960_v37 = vpop.f32.mrf.mxu2 }
 0x641   :  { %v4156_v42 = vmul.f32 -1.442695, %v2894_v6  ;;  %v4159_v29 = vmul.f32 -1.442695, %v2972_v26 }
 0x642   :  { %v2984_v7 = vpop.f32.mrf.mxu0 }
 0x643   :  { %4499 = vpow2.f32 %v4156_v42  ;;  %v4498_v58 = vpop.eup %4497 }
 0x644   :  { %4501 = vpow2.f32 %v4159_v29  ;;  %v7400_v14 = vadd.f32 1.0, %v4498_v58 }
 0x645   :  { %4503 = vpow2.f32 %v4157_v28 }
 0x646   :  { %v2973_v38 = vpop.f32.mrf.mxu3  ;;  %4505 = vrcp.f32 %v7400_v14  ;;  %v3136_v13 = vand.u32 2147483648, %v7400_v14  ;;  %vm3130_vm1 = vweird.f32 %v7400_v14 }
 0x647   :  { %v4154_v38 = vld [vmem:[%s7697_s0 + $0x1b0] sm:$0xff] }
 0x648   :  { %v7396_v10 = vpop.f32.mrf.mxu2  ;;  %v2997_v32 = vpop.f32.mrf.mxu1 }
 0x649   :  { %v4500_v24 = vpop.eup %4499 }
 0x64a   :  { %v2986_v37 = vpop.f32.mrf.mxu0  ;;  %v4502_v33 = vpop.eup %4501  ;;  %v7402_v22 = vadd.f32 1.0, %v4500_v24 }
 0x64b   :  { %v4504_v0 = vpop.eup %4503  ;;  %v7405_v26 = vadd.f32 1.0, %v4502_v33 }
 0x64c   :  { %4507 = vrcp.f32 %v7402_v22  ;;  %v7408_v29 = vadd.f32 1.0, %v4504_v0  ;;  %v7410_v45 = vpop.eup %4505  ;;  %vm3092_vm2 = vweird.f32 %v7402_v22 }
 0x64d   :  { %4509 = vrcp.f32 %v7405_v26  ;;  %v3126_v17 = vmul.f32 %v7410_v45, %v7400_v14  ;;  %vm3131_vm0 = vweird.f32 %v7410_v45  ;;  %vm3145_vm8 = vweird.f32 %v7405_v26 }
 0x64e   :  { %v7398_v53 = vpop.f32.mrf.mxu3  ;;  %4511 = vrcp.f32 %v7408_v29  ;;  %vm7449_vm3 = vmor %vm3130_vm1, %vm3131_vm0  ;;  %vm3107_vm12 = vweird.f32 %v7408_v29 }
 0x64f   :  { %v3127_v37 = vsub.f32 1.0, %v3126_v17  ;;  %v4155_v17 = vld [vmem:[%s7697_s0 + $0x1b8] sm:$0xff] }
 0x650   :  { %v3012_v46 = vpop.f32.mrf.mxu2  ;;  %v2999_v61 = vpop.f32.mrf.mxu1 }
 0x651   :  { %v4152_v61 = vld [vmem:[%s7697_s0 + $0x1a0] sm:$0xff]  ;;  %v3128_v40 = vmul.f32 %v7410_v45, %v3127_v37 }
 0x652   :  { %v7416_v23 = vpop.eup %4507  ;;  %v2985_v44 = vadd.f32 %v4152_v61, %v2984_v7  ;;  %v3096_v61 = vand.u32 2147483647, %v7402_v22 }
 0x653   :  { %v7421_v42 = vpop.eup %4509  ;;  %v3088_v62 = vmul.f32 %v7416_v23, %v7402_v22  ;;  %v3129_v37 = vadd.f32 %v7410_v45, %v3128_v40  ;;  %vm3093_vm4 = vweird.f32 %v7416_v23  ;;  %v3113_v40 = vand.u32 2147483648, %v7408_v29 }
 0x654   :  { %v7425_v58 = vpop.eup %4511  ;;  %v3141_v46 = vmul.f32 %v7421_v42, %v7405_v26  ;;  %v2998_v25 = vadd.f32 %v2997_v32, %v2985_v44  ;;  %v3134_v44 = vand.u32 2147483647, %v7400_v14  ;;  %vm3146_vm5 = vweird.f32 %v7421_v42  ;;  %vm7468_vm7 = vmor %vm3092_vm2, %vm3093_vm4 }
 0x655   :  { %v3089_v0 = vsub.f32 1.0, %v3088_v62  ;;  %v3133_v14 = vsel %vm7449_vm3, %v7410_v45, %v3129_v37  ;;  %v3149_v45 = vand.u32 2147483647, %v7405_v26  ;;  %vm7477_vm9 = vmor %vm3145_vm8, %vm3146_vm5  ;;  %vm3097_vm10 = vcmp.eq.f32.partialorder %v3096_v61, 8.507059e+37 }
 0x656   :  { %v3025_v47 = vpop.f32.mrf.mxu3  ;;  %v3142_v4 = vsub.f32 1.0, %v3141_v46  ;;  %vm3135_vm6 = vcmp.eq.f32.partialorder %v3134_v44, 8.507059e+37  ;;  %vm3108_vm11 = vweird.f32 %v7425_v58 }
 0x657   :  { %v3090_v62 = vmul.f32 %v7416_v23, %v3089_v0  ;;  %vm3150_vm13 = vcmp.eq.f32.partialorder %v3149_v45, 8.507059e+37  ;;  %vm3109_vm14 = vmor %vm3107_vm12, %vm3108_vm11 }
 0x662   :  { %v3036_v6 = vpop.f32.mrf.mxu0 }
 0x663   :  { %v3037_v28 = vadd.f32 %v4154_v38, %v3036_v6  ;;  %v3103_v38 = vmul.f32 %v7425_v58, %v7408_v29 }
 0x668   :  { %v3049_v24 = vpop.f32.mrf.mxu1  ;;  %v3062_v33 = vpop.f32.mrf.mxu2 }
 0x669   :  { %v3050_v47 = vadd.f32 %v3049_v24, %v3037_v28  ;;  %v3063_v52 = vadd.f32 %v4155_v17, %v3062_v33  ;;  %v4153_v28 = vld [vmem:[%s7697_s0 + $0x1a8] sm:$0xff]  ;;  %v3137_v17 = vor.u32 1.1754944e-38, %v3136_v13 }
 0x66a   :  { %v3038_v6 = vpop.f32.mrf.mxu0  ;;  %v3011_v33 = vadd.f32 %v4153_v28, %v7396_v10 }
 0x66b   :  { %v4160_v18 = vmul.f32 -1.442695, %v3050_v47  ;;  %v3104_v6 = vsub.f32 1.0, %v3103_v38  ;;  %v3091_v47 = vadd.f32 %v7416_v23, %v3090_v62  ;;  %v3151_v62 = vand.u32 2147483648, %v7405_v26 }
 0x66c   :  { %v3024_v38 = vadd.f32 %v7398_v53, %v3011_v33  ;;  %v3138_v13 = vsel %vm3135_vm6, %v3137_v17, %v3133_v14  ;;  %v3111_v33 = vand.u32 2147483647, %v7408_v29 }
 0x66d   :  { %4513 = vpow2.f32 %v4160_v18  ;;  %v3143_v18 = vmul.f32 %v7421_v42, %v3142_v4  ;;  %v3098_v4 = vand.u32 2147483648, %v7402_v22  ;;  %v3095_v53 = vsel %vm7468_vm7, %v7416_v23, %v3091_v47 }
 0x66e   :  { %v3075_v24 = vpop.f32.mrf.mxu3  ;;  %4515 = vtanh.f32 %v2998_v25  ;;  %vm3112_vm15 = vcmp.eq.f32.partialorder %v3111_v33, 8.507059e+37 }
 0x66f   :  { %v3076_v7 = vadd.f32 %v3075_v24, %v3063_v52  ;;  %v3105_v24 = vmul.f32 %v7425_v58, %v3104_v6  ;;  %v3144_v25 = vadd.f32 %v7421_v42, %v3143_v18  ;;  %v3099_v22 = vor.u32 1.1754944e-38, %v3098_v4 }
 0x670   :  { %v3051_v32 = vpop.f32.mrf.mxu1  ;;  %v3064_v46 = vpop.f32.mrf.mxu2  ;;  %v3195_v18 = vmul.f32 %v3138_v13, %v7228_v56 }
 0x671   :  { %v4161_v52 = vmul.f32 -1.442695, %v3076_v7  ;;  %v3106_v44 = vadd.f32 %v7425_v58, %v3105_v24  ;;  %v3148_v26 = vsel %vm7477_vm9, %v7421_v42, %v3144_v25  ;;  %v3152_v32 = vor.u32 1.1754944e-38, %v3151_v62 }
 0x672   :  { %v3100_v46 = vsel %vm3097_vm10, %v3099_v22, %v3095_v53 }
 0x673   :  { %v4514_v0 = vpop.eup %4513  ;;  %4517 = vpow2.f32 %v4161_v52  ;;  %v3153_v52 = vsel %vm3150_vm13, %v3152_v32, %v3148_v26  ;;  %v3110_v14 = vsel %vm3109_vm14, %v7425_v58, %v3106_v44 }
 0x674   :  { %v3163_v10 = vadd.f32 1.0, %v4514_v0  ;;  %v4516_v6 = vpop.eup %4515  ;;  %v3114_v0 = vor.u32 1.1754944e-38, %v3113_v40 }
 0x675   :  { %v3197_v61 = vmul.f32 %v4516_v6, %v3100_v46 }
 0x676   :  { %4519 = vrcp.f32 %v3163_v10  ;;  %v3077_v37 = vpop.f32.mrf.mxu3  ;;  %v3115_v24 = vsel %vm3112_vm15, %v3114_v0, %v3110_v14  ;;  %v3176_v62 = vand.u32 2147483648, %v3163_v10  ;;  %v3174_v13 = vand.u32 2147483647, %v3163_v10 }
 0x677   :  { %4521 = vtanh.f32 %v3024_v38  ;;  %v7490_v4 = vadd.f32 %v3197_v61, %v3195_v18  ;;  %v3196_v38 = vmul.f32 %v3153_v52, %v7233_v16  ;;  %vm3170_vm1 = vweird.f32 %v3163_v10 }
 0x678   :  { %v3177_v6 = vor.u32 1.1754944e-38, %v3176_v62  ;;  %vm3175_vm3 = vcmp.eq.f32.partialorder %v3174_v13, 8.507059e+37 }
 0x679   :  { %v4518_v23 = vpop.eup %4517 }
 0x67a   :  { %v3164_v56 = vadd.f32 1.0, %v4518_v23 }
 0x67c   :  { %v4520_v47 = vpop.eup %4519  ;;  %4523 = vrcp.f32 %v3164_v56  ;;  %v3191_v44 = vand.u32 2147483648, %v3164_v56  ;;  %v3189_v32 = vand.u32 2147483647, %v3164_v56  ;;  %vm3185_vm5 = vweird.f32 %v3164_v56 }
 0x67d   :  { %v4522_v42 = vpop.eup %4521  ;;  %v3166_v17 = vmul.f32 %v4520_v47, %v3163_v10  ;;  %4525 = vtanh.f32 %v7490_v4  ;;  %vm3171_vm0 = vweird.f32 %v4520_v47 }
 0x67e   :  { %v3198_v29 = vmul.f32 %v4522_v42, %v3115_v24  ;;  %vm3172_vm2 = vmor %vm3170_vm1, %vm3171_vm0  ;;  %v3192_v10 = vor.u32 1.1754944e-38, %v3191_v44  ;;  %vm3190_vm7 = vcmp.eq.f32.partialorder %v3189_v32, 8.507059e+37  ;;  %v8773_v42 = vld [vmem:[#allocation131_spill] sm:$0xff] }
 0x67f   :  { %v3167_v25 = vsub.f32 1.0, %v3166_v17 }
 0x680   :  { %v7495_v45 = vadd.f32 %v3198_v29, %v3196_v38 }
 0x681   :  { %v3168_v28 = vmul.f32 %v4520_v47, %v3167_v25 }
 0x682   :  { %v4524_v53 = vpop.eup %4523  ;;  %4527 = vtanh.f32 %v7495_v45 }
 0x683   :  { %v3169_v58 = vadd.f32 %v4520_v47, %v3168_v28  ;;  %v3181_v37 = vmul.f32 %v4524_v53, %v3164_v56  ;;  %v4526_v22 = vpop.eup %4525  ;;  %vm3186_vm4 = vweird.f32 %v4524_v53  ;;  %v8772_v56 = vld [vmem:[#allocation129_spill] sm:$0xff] }
 0x684   :  { %vm3187_vm6 = vmor %vm3185_vm5, %vm3186_vm4 }
 0x685   :  { %v3173_v7 = vsel %vm3172_vm2, %v4520_v47, %v3169_v58  ;;  %v3182_v16 = vsub.f32 1.0, %v3181_v37 }
 0x686   :  { %v3178_v18 = vsel %vm3175_vm3, %v3177_v6, %v3173_v7  ;;  %v4164_v6 = vld [vmem:[%s7697_s0 + $0x1d0] sm:$0xff] }
 0x687   :  { %v3203_v26 = vmul.f32 %v4526_v22, %v3178_v18  ;;  %v3183_v23 = vmul.f32 %v4524_v53, %v3182_v16  ;;  %v4162_v22 = vld [vmem:[%s7697_s0 + $0x1c0] sm:$0xff] }
 0x688   :  { %v4528_v33 = vpop.eup %4527 }
 0x689   :  { %v7498_v46 = vpack.c.bf16 %v3203_v26, %v3203_v26  ;;  %v3184_v40 = vadd.f32 %v4524_v53, %v3183_v23  ;;  %v4165_v23 = vld [vmem:[%s7697_s0 + $0x1d8] sm:$0xff] }
 0x68b   :  { %v3188_v61 = vsel %vm3187_vm6, %v4524_v53, %v3184_v40  ;;  %3224 = vmatmul.bf16.vlgmr.msra.gmra.mxu0 %v7498_v46  ;;  %3250 = vmatmul.bf16.vlgmr.msra.gmra.mxu2 %v7498_v46 }
 0x68c   :  { %v3193_v52 = vsel %vm3190_vm7, %v3192_v10, %v3188_v61  ;;  %3320 = vmatpush.bf16.msra.mxu0 %v8124_v11  ;;  %3346 = vmatpush.bf16.msra.mxu2 %v8125_v15  ;;  %v8741_v11 = vld [vmem:[#allocation95_spill] sm:$0xff]  ;;  %v8742_v15 = vld [vmem:[#allocation104_spill] sm:$0xff]  ;;  %v4163_v10 = vld [vmem:[%s7697_s0 + $0x1c8] sm:$0xff] }
 0x68d   :  { %v3204_v47 = vmul.f32 %v4528_v33, %v3193_v52 }
 0x68f   :  { %v7504_v14 = vpack.c.bf16 %v3204_v47, %v3204_v47 }
 0x690   :  { %3321 = vmatpush.bf16.msra.mxu0 %v8126_v48  ;;  %3347 = vmatpush.bf16.msra.mxu2 %v8127_v57  ;;  %v8743_v48 = vld [vmem:[#allocation106_spill] sm:$0xff]  ;;  %v8744_v57 = vld [vmem:[#allocation97_spill] sm:$0xff] }
 0x691   :  { %3237 = vmatmul.bf16.vlgmr.msra.gmra.mxu1 %v7504_v14  ;;  %3263 = vmatmul.bf16.vlgmr.msra.gmra.mxu3 %v7504_v14 }
 0x692   :  { %3333 = vmatpush.bf16.msra.mxu1 %v8128_v63  ;;  %3359 = vmatpush.bf16.msra.mxu3 %v8129_v2  ;;  %v8745_v63 = vld [vmem:[#allocation99_spill] sm:$0xff]  ;;  %v8746_v2 = vld [vmem:[#allocation101_spill] sm:$0xff] }
 0x694   :  { %3322 = vmatpush.bf16.msra.mxu0 %v8130_v20  ;;  %3348 = vmatpush.bf16.msra.mxu2 %v8131_v30  ;;  %v8747_v20 = vld [vmem:[#allocation103_spill] sm:$0xff]  ;;  %v8748_v30 = vld [vmem:[#allocation108_spill] sm:$0xff] }
 0x696   :  { %3334 = vmatpush.bf16.msra.mxu1 %v8132_v60  ;;  %3360 = vmatpush.bf16.msra.mxu3 %v8133_v41  ;;  %v8749_v60 = vld [vmem:[#allocation110_spill] sm:$0xff]  ;;  %v8750_v41 = vld [vmem:[#allocation105_spill] sm:$0xff] }
 0x698   :  { %3323 = vmatpush.bf16.msra.mxu0 %v8134_v54  ;;  %3349 = vmatpush.bf16.msra.mxu2 %v8135_v55  ;;  %v8751_v54 = vld [vmem:[#allocation107_spill] sm:$0xff]  ;;  %v8752_v55 = vld [vmem:[#allocation112_spill] sm:$0xff] }
 0x69a   :  { %3335 = vmatpush.bf16.msra.mxu1 %v8136_v31  ;;  %3361 = vmatpush.bf16.msra.mxu3 %v8137_v9  ;;  %v8753_v31 = vld [vmem:[#allocation114_spill] sm:$0xff]  ;;  %v8754_v9 = vld [vmem:[#allocation109_spill] sm:$0xff] }
 0x69b   :  { %3276 = vmatmul.bf16.vlgmr.msrb.gmra.mxu0 %v7498_v46  ;;  %3302 = vmatmul.bf16.vlgmr.msrb.gmra.mxu2 %v7498_v46 }
 0x69c   :  { %3324 = vmatpush.bf16.msra.mxu0 %v8138_v1  ;;  %3350 = vmatpush.bf16.msra.mxu2 %v8139_v51  ;;  %v8755_v1 = vld [vmem:[#allocation111_spill] sm:$0xff]  ;;  %v8756_v51 = vld [vmem:[#allocation116_spill] sm:$0xff] }
 0x69e   :  { %3336 = vmatpush.bf16.msra.mxu1 %v8140_v39  ;;  %3362 = vmatpush.bf16.msra.mxu3 %v8141_v35  ;;  %v8757_v39 = vld [vmem:[#allocation118_spill] sm:$0xff]  ;;  %v8758_v35 = vld [vmem:[#allocation113_spill] sm:$0xff] }
 0x6a0   :  { %3325 = vmatpush.bf16.msra.mxu0 %v8142_v5  ;;  %3351 = vmatpush.bf16.msra.mxu2 %v8143_v43  ;;  %v8759_v5 = vld [vmem:[#allocation115_spill] sm:$0xff]  ;;  %v8760_v43 = vld [vmem:[#allocation120_spill] sm:$0xff] }
 0x6a1   :  { %3289 = vmatmul.bf16.vlgmr.msrb.gmra.mxu1 %v7504_v14  ;;  %3315 = vmatmul.bf16.vlgmr.msrb.gmra.mxu3 %v7504_v14 }
 0x6a2   :  { %3337 = vmatpush.bf16.msra.mxu1 %v8144_v19  ;;  %3363 = vmatpush.bf16.msra.mxu3 %v8145_v59  ;;  %v8761_v19 = vld [vmem:[#allocation122_spill] sm:$0xff]  ;;  %v8762_v59 = vld [vmem:[#allocation117_spill] sm:$0xff] }
 0x6a4   :  { %3326 = vmatpush.bf16.msra.mxu0 %v8146_v27  ;;  %3352 = vmatpush.bf16.msra.mxu2 %v8226_v49  ;;  %v8763_v27 = vld [vmem:[#allocation119_spill] sm:$0xff]  ;;  %v8764_v49 = vld [vmem:[#allocation124_spill] sm:$0xff] }
 0x6a6   :  { %3338 = vmatpush.bf16.msra.mxu1 %v8227_v36  ;;  %3364 = vmatpush.bf16.msra.mxu3 %v8228_v34  ;;  %v8765_v36 = vld [vmem:[#allocation126_spill] sm:$0xff]  ;;  %v8766_v34 = vld [vmem:[#allocation121_spill] sm:$0xff] }
 0x6a8   :  { %3327 = vmatpush.bf16.msra.mxu0 %v8229_v12  ;;  %3353 = vmatpush.bf16.msra.mxu2 %v8230_v50  ;;  %v8767_v12 = vld [vmem:[#allocation123_spill] sm:$0xff]  ;;  %v8768_v50 = vld [vmem:[#allocation128_spill] sm:$0xff] }
 0x6aa   :  { %3339 = vmatpush.bf16.msra.mxu1 %v8233_v3  ;;  %3365 = vmatpush.bf16.msra.mxu3 %v8741_v11  ;;  %v8771_v3 = vld [vmem:[#allocation127_spill] sm:$0xff] }
 0x6ab   :  { %3328 = vmatmul.bf16.vlgmr.msra.gmra.mxu0 %v7498_v46  ;;  %3354 = vmatmul.bf16.vlgmr.msra.gmra.mxu2 %v7498_v46 }
 0x6ac   :  { %3372 = vmatpush.bf16.msrb.mxu0 %v8231_v21  ;;  %3398 = vmatpush.bf16.msrb.mxu2 %v8232_v8  ;;  %v8769_v21 = vld [vmem:[#allocation130_spill] sm:$0xff]  ;;  %v8770_v8 = vld [vmem:[#allocation125_spill] sm:$0xff] }
 0x6ae   :  { %3340 = vmatpush.bf16.msra.mxu1 %v8744_v57  ;;  %3366 = vmatpush.bf16.msra.mxu3 %v8745_v63 }
 0x6b0   :  { %3373 = vmatpush.bf16.msrb.mxu0 %v8742_v15  ;;  %3399 = vmatpush.bf16.msrb.mxu2 %v8743_v48 }
 0x6b1   :  { %3341 = vmatmul.bf16.vlgmr.msra.gmra.mxu1 %v7504_v14  ;;  %3367 = vmatmul.bf16.vlgmr.msra.gmra.mxu3 %v7504_v14 }
 0x6b2   :  { %3385 = vmatpush.bf16.msrb.mxu1 %v8746_v2  ;;  %3411 = vmatpush.bf16.msrb.mxu3 %v8747_v20 }
 0x6b4   :  { %3374 = vmatpush.bf16.msrb.mxu0 %v8748_v30  ;;  %3400 = vmatpush.bf16.msrb.mxu2 %v8749_v60 }
 0x6b6   :  { %3386 = vmatpush.bf16.msrb.mxu1 %v8750_v41  ;;  %3412 = vmatpush.bf16.msrb.mxu3 %v8751_v54 }
 0x6b8   :  { %3375 = vmatpush.bf16.msrb.mxu0 %v8752_v55  ;;  %3401 = vmatpush.bf16.msrb.mxu2 %v8753_v31 }
 0x6ba   :  { %3387 = vmatpush.bf16.msrb.mxu1 %v8754_v9  ;;  %3413 = vmatpush.bf16.msrb.mxu3 %v8755_v1 }
 0x6bc   :  { %3376 = vmatpush.bf16.msrb.mxu0 %v8756_v51  ;;  %3402 = vmatpush.bf16.msrb.mxu2 %v8757_v39 }
 0x6be   :  { %3388 = vmatpush.bf16.msrb.mxu1 %v8758_v35  ;;  %3414 = vmatpush.bf16.msrb.mxu3 %v8759_v5 }
 0x6c0   :  { %3377 = vmatpush.bf16.msrb.mxu0 %v8760_v43  ;;  %3403 = vmatpush.bf16.msrb.mxu2 %v8761_v19 }
 0x6c2   :  { %3389 = vmatpush.bf16.msrb.mxu1 %v8762_v59  ;;  %3415 = vmatpush.bf16.msrb.mxu3 %v8763_v27 }
 0x6c4   :  { %3378 = vmatpush.bf16.msrb.mxu0 %v8764_v49  ;;  %3404 = vmatpush.bf16.msrb.mxu2 %v8765_v36  ;;  %v4168_v49 = vld [vmem:[%s7697_s0 + $0x1f0] sm:$0xff] }
 0x6c6   :  { %3390 = vmatpush.bf16.msrb.mxu1 %v8766_v34  ;;  %3416 = vmatpush.bf16.msrb.mxu3 %v8767_v12 }
 0x6c8   :  { %3379 = vmatpush.bf16.msrb.mxu0 %v8768_v50  ;;  %3405 = vmatpush.bf16.msrb.mxu2 %v8769_v21 }
 0x6ca   :  { %3391 = vmatpush.bf16.msrb.mxu1 %v8770_v8  ;;  %3417 = vmatpush.bf16.msrb.mxu3 %v8771_v3  ;;  %v4166_v3 = vld [vmem:[%s7697_s0 + $0x1e0] sm:$0xff] }
 0x6cb   :  { %3380 = vmatmul.bf16.vlgmr.msrb.gmra.mxu0 %v7498_v46  ;;  %3406 = vmatmul.bf16.vlgmr.msrb.gmra.mxu2 %v7498_v46 }
 0x6ce   :  { %3392 = vmatpush.bf16.msrb.mxu1 %v8772_v56  ;;  %3418 = vmatpush.bf16.msrb.mxu3 %v8773_v42 }
 0x6d1   :  { %3393 = vmatmul.bf16.vlgmr.msrb.gmra.mxu1 %v7504_v14  ;;  %3419 = vmatmul.bf16.vlgmr.msrb.gmra.mxu3 %v7504_v14 }
 0x708   :  { %v3225_v0 = vpop.f32.mrf.mxu0 }
 0x709   :  { %v3226_v46 = vadd.f32 %v4162_v22, %v3225_v0 }
 0x70e   :  { %v3238_v17 = vpop.f32.mrf.mxu1  ;;  %v3251_v38 = vpop.f32.mrf.mxu2 }
 0x70f   :  { %v3239_v40 = vadd.f32 %v3238_v17, %v3226_v46  ;;  %v3252_v14 = vadd.f32 %v4163_v10, %v3251_v38 }
 0x710   :  { %v3227_v24 = vpop.f32.mrf.mxu0 }
 0x711   :  { %v4170_v15 = vmul.f32 -1.442695, %v3239_v40  ;;  %v4169_v24 = vld [vmem:[%s7697_s0 + $0x1f8] sm:$0xff] }
 0x714   :  { %v3264_v25 = vpop.f32.mrf.mxu3 }
 0x715   :  { %v3265_v57 = vadd.f32 %v3264_v25, %v3252_v14 }
 0x716   :  { %v3240_v29 = vpop.f32.mrf.mxu1  ;;  %v3253_v62 = vpop.f32.mrf.mxu2 }
 0x717   :  { %v4171_v20 = vmul.f32 -1.442695, %v3265_v57 }
 0x718   :  { %v3277_v28 = vpop.f32.mrf.mxu0 }
 0x719   :  { %v3278_v16 = vadd.f32 %v4164_v6, %v3277_v28 }
 0x71c   :  { %v3266_v13 = vpop.f32.mrf.mxu3 }
 0x71e   :  { %v3290_v53 = vpop.f32.mrf.mxu1  ;;  %v3303_v58 = vpop.f32.mrf.mxu2 }
 0x71f   :  { %v3291_v26 = vadd.f32 %v3290_v53, %v3278_v16  ;;  %v3304_v33 = vadd.f32 %v4165_v23, %v3303_v58 }
 0x720   :  { %v3279_v37 = vpop.f32.mrf.mxu0 }
 0x721   :  { %v4172_v61 = vmul.f32 -1.442695, %v3291_v26 }
 0x723   :  { %4529 = vpow2.f32 %v4172_v61 }
 0x724   :  { %v3316_v7 = vpop.f32.mrf.mxu3  ;;  %4531 = vpow2.f32 %v4170_v15 }
 0x725   :  { %v3317_v47 = vadd.f32 %v3316_v7, %v3304_v33  ;;  %v4167_v7 = vld [vmem:[%s7697_s0 + $0x1e8] sm:$0xff] }
 0x726   :  { %v3292_v18 = vpop.f32.mrf.mxu1  ;;  %v3305_v44 = vpop.f32.mrf.mxu2 }
 0x727   :  { %v4173_v2 = vmul.f32 -1.442695, %v3317_v47 }
 0x728   :  { %v3329_v32 = vpop.f32.mrf.mxu0 }
 0x729   :  { %v4530_v30 = vpop.eup %4529  ;;  %4533 = vpow2.f32 %v4173_v2  ;;  %v3330_v62 = vadd.f32 %v4166_v3, %v3329_v32 }
 0x72a   :  { %4535 = vpow2.f32 %v4171_v20  ;;  %v7598_v55 = vadd.f32 1.0, %v4530_v30  ;;  %v4532_v31 = vpop.eup %4531 }
 0x72b   :  { %v7600_v1 = vadd.f32 1.0, %v4532_v31 }
 0x72c   :  { %v3318_v52 = vpop.f32.mrf.mxu3  ;;  %4537 = vrcp.f32 %v7598_v55  ;;  %v3481_v18 = vand.u32 2147483648, %v7598_v55  ;;  %vm3475_vm9 = vweird.f32 %v7598_v55  ;;  %v3479_v23 = vand.u32 2147483647, %v7598_v55 }
 0x72d   :  { %4539 = vrcp.f32 %v7600_v1  ;;  %vm3437_vm10 = vweird.f32 %v7600_v1  ;;  %v3441_v10 = vand.u32 2147483647, %v7600_v1  ;;  %v3443_v47 = vand.u32 2147483648, %v7600_v1 }
 0x72e   :  { %v7594_v11 = vpop.f32.mrf.mxu2  ;;  %v3342_v48 = vpop.f32.mrf.mxu1  ;;  %vm3480_vm14 = vcmp.eq.f32.partialorder %v3479_v23, 8.507059e+37 }
 0x72f   :  { %v4534_v9 = vpop.eup %4533  ;;  %v3343_v53 = vadd.f32 %v3342_v48, %v3330_v62  ;;  %v3356_v61 = vadd.f32 %v4167_v7, %v7594_v11  ;;  %v3482_v48 = vor.u32 1.1754944e-38, %v3481_v18  ;;  %vm3442_vm2 = vcmp.eq.f32.partialorder %v3441_v10, 8.507059e+37 }
 0x730   :  { %v3331_v63 = vpop.f32.mrf.mxu0  ;;  %v4536_v39 = vpop.eup %4535  ;;  %v7603_v35 = vadd.f32 1.0, %v4534_v9 }
 0x731   :  { %v7606_v5 = vadd.f32 1.0, %v4536_v39 }
 0x732   :  { %v7608_v43 = vpop.eup %4537  ;;  %4541 = vrcp.f32 %v7603_v35  ;;  %v3496_v20 = vand.u32 2147483648, %v7603_v35  ;;  %vm3490_vm0 = vweird.f32 %v7603_v35 }
 0x733   :  { %4543 = vrcp.f32 %v7606_v5  ;;  %v3471_v19 = vmul.f32 %v7608_v43, %v7598_v55  ;;  %v7614_v27 = vpop.eup %4539  ;;  %vm3476_vm8 = vweird.f32 %v7608_v43  ;;  %vm3452_vm4 = vweird.f32 %v7606_v5 }
 0x734   :  { %v7596_v60 = vpop.f32.mrf.mxu3  ;;  %v3433_v34 = vmul.f32 %v7614_v27, %v7600_v1  ;;  %vm7647_vm11 = vmor %vm3475_vm9, %vm3476_vm8  ;;  %vm3438_vm12 = vweird.f32 %v7614_v27  ;;  %v3444_v1 = vor.u32 1.1754944e-38, %v3443_v47 }
 0x735   :  { %v3472_v12 = vsub.f32 1.0, %v3471_v19  ;;  %v3369_v57 = vadd.f32 %v7596_v60, %v3356_v61  ;;  %vm7666_vm15 = vmor %vm3437_vm10, %vm3438_vm12  ;;  %v3497_v19 = vor.u32 1.1754944e-38, %v3496_v20 }
 0x736   :  { %v3357_v41 = vpop.f32.mrf.mxu2  ;;  %v3344_v54 = vpop.f32.mrf.mxu1  ;;  %v3434_v17 = vsub.f32 1.0, %v3433_v34  ;;  %v3456_v34 = vand.u32 2147483647, %v7606_v5 }
 0x737   :  { %v3473_v38 = vmul.f32 %v7608_v43, %v3472_v12  ;;  %v3494_v54 = vand.u32 2147483647, %v7603_v35 }
 0x738   :  { %v7619_v36 = vpop.eup %4541  ;;  %v3435_v37 = vmul.f32 %v7614_v27, %v3434_v17  ;;  %vm3457_vm7 = vcmp.eq.f32.partialorder %v3456_v34, 8.507059e+37 }
 0x739   :  { %v7623_v21 = vpop.eup %4543  ;;  %v3486_v8 = vmul.f32 %v7619_v36, %v7603_v35  ;;  %v3474_v6 = vadd.f32 %v7608_v43, %v3473_v38  ;;  %vm3491_vm13 = vweird.f32 %v7619_v36  ;;  %vm3495_vm5 = vcmp.eq.f32.partialorder %v3494_v54, 8.507059e+37 }
 0x73a   :  { %v3448_v29 = vmul.f32 %v7623_v21, %v7606_v5  ;;  %v3436_v52 = vadd.f32 %v7614_v27, %v3435_v37  ;;  %vm7675_vm1 = vmor %vm3490_vm0, %vm3491_vm13  ;;  %vm3453_vm3 = vweird.f32 %v7623_v21 }
 0x73b   :  { %v3487_v13 = vsub.f32 1.0, %v3486_v8  ;;  %v3478_v14 = vsel %vm7647_vm11, %v7608_v43, %v3474_v6  ;;  %vm3454_vm6 = vmor %vm3452_vm4, %vm3453_vm3 }
 0x73c   :  { %v3370_v51 = vpop.f32.mrf.mxu3  ;;  %v3449_v22 = vsub.f32 1.0, %v3448_v29  ;;  %v3483_v41 = vsel %vm3480_vm14, %v3482_v48, %v3478_v14  ;;  %v3440_v60 = vsel %vm7666_vm15, %v7614_v27, %v3436_v52  ;;  %v3458_v27 = vand.u32 2147483648, %v7606_v5 }
 0x73d   :  { %v3488_v26 = vmul.f32 %v7619_v36, %v3487_v13  ;;  %v3540_v51 = vmul.f32 %v3483_v41, %v7490_v4 }
 0x73e   :  { %v3450_v63 = vmul.f32 %v7623_v21, %v3449_v22 }
 0x73f   :  { %v3489_v11 = vadd.f32 %v7619_v36, %v3488_v26 }
 0x740   :  { %v3451_v39 = vadd.f32 %v7623_v21, %v3450_v63 }
 0x741   :  { %v3493_v35 = vsel %vm7675_vm1, %v7619_v36, %v3489_v11 }
 0x742   :  { %v3498_v12 = vsel %vm3495_vm5, %v3497_v19, %v3493_v35  ;;  %v3455_v3 = vsel %vm3454_vm6, %v7623_v21, %v3451_v39 }
 0x748   :  { %v3381_v59 = vpop.f32.mrf.mxu0 }
 0x749   :  { %v3382_v50 = vadd.f32 %v4168_v49, %v3381_v59  ;;  %v3445_v59 = vsel %vm3442_vm2, %v3444_v1, %v3440_v60 }
 0x74e   :  { %v3394_v56 = vpop.f32.mrf.mxu1  ;;  %v3407_v42 = vpop.f32.mrf.mxu2 }
 0x74f   :  { %v3395_v0 = vadd.f32 %v3394_v56, %v3382_v50  ;;  %v3408_v58 = vadd.f32 %v4169_v24, %v3407_v42  ;;  %v3459_v56 = vor.u32 1.1754944e-38, %v3458_v27 }
 0x750   :  { %v3383_v25 = vpop.f32.mrf.mxu0 }
 0x751   :  { %v4174_v28 = vmul.f32 -1.442695, %v3395_v0  ;;  %v3541_v0 = vmul.f32 %v3498_v12, %v7495_v45  ;;  %v3460_v17 = vsel %vm3457_vm7, %v3459_v56, %v3455_v3 }
 0x753   :  { %4545 = vpow2.f32 %v4174_v28 }
 0x754   :  { %v3420_v16 = vpop.f32.mrf.mxu3  ;;  %4547 = vtanh.f32 %v3343_v53 }
 0x755   :  { %v3421_v44 = vadd.f32 %v3420_v16, %v3408_v58 }
 0x756   :  { %v3396_v32 = vpop.f32.mrf.mxu1  ;;  %v3409_v46 = vpop.f32.mrf.mxu2 }
 0x757   :  { %v4175_v33 = vmul.f32 -1.442695, %v3421_v44 }
 0x759   :  { %v4546_v15 = vpop.eup %4545  ;;  %4549 = vpow2.f32 %v4175_v33 }
 0x75a   :  { %v3508_v2 = vadd.f32 1.0, %v4546_v15  ;;  %v4548_v31 = vpop.eup %4547 }
 0x75b   :  { %v3542_v49 = vmul.f32 %v4548_v31, %v3445_v59 }
 0x75c   :  { %4551 = vrcp.f32 %v3508_v2  ;;  %v3422_v55 = vpop.f32.mrf.mxu3  ;;  %v3521_v5 = vand.u32 2147483648, %v3508_v2  ;;  %v3519_v29 = vand.u32 2147483647, %v3508_v2  ;;  %vm3515_vm9 = vweird.f32 %v3508_v2 }
 0x75d   :  { %4553 = vtanh.f32 %v3369_v57  ;;  %v3544_v8 = vadd.f32 %v3542_v49, %v3540_v51 }
 0x75e   :  { %v3522_v53 = vor.u32 1.1754944e-38, %v3521_v5  ;;  %vm3520_vm11 = vcmp.eq.f32.partialorder %v3519_v29, 8.507059e+37 }
 0x75f   :  { %v4550_v43 = vpop.eup %4549 }
 0x760   :  { %v3509_v4 = vadd.f32 1.0, %v4550_v43 }
 0x762   :  { %v4552_v50 = vpop.eup %4551  ;;  %4555 = vrcp.f32 %v3509_v4  ;;  %v3536_v7 = vand.u32 2147483648, %v3509_v4  ;;  %v3534_v18 = vand.u32 2147483647, %v3509_v4  ;;  %vm3530_vm13 = vweird.f32 %v3509_v4 }
 0x763   :  { %v4554_v36 = vpop.eup %4553  ;;  %v3511_v42 = vmul.f32 %v4552_v50, %v3508_v2  ;;  %4557 = vtanh.f32 %v3544_v8  ;;  %vm3516_vm8 = vweird.f32 %v4552_v50 }
 0x764   :  { %v3543_v24 = vmul.f32 %v4554_v36, %v3460_v17  ;;  %vm3517_vm10 = vmor %vm3515_vm9, %vm3516_vm8  ;;  %v3537_v26 = vor.u32 1.1754944e-38, %v3536_v7  ;;  %vm3535_vm15 = vcmp.eq.f32.partialorder %v3534_v18, 8.507059e+37 }
 0x765   :  { %v3512_v38 = vsub.f32 1.0, %v3511_v42 }
 0x766   :  { %v3545_v28 = vadd.f32 %v3543_v24, %v3541_v0 }
 0x767   :  { %v3513_v25 = vmul.f32 %v4552_v50, %v3512_v38 }
 0x768   :  { %v4556_v62 = vpop.eup %4555  ;;  %4559 = vtanh.f32 %v3545_v28 }
 0x769   :  { %v3514_v13 = vadd.f32 %v4552_v50, %v3513_v25  ;;  %v3526_v21 = vmul.f32 %v4556_v62, %v3509_v4  ;;  %v4558_v6 = vpop.eup %4557  ;;  %vm3531_vm12 = vweird.f32 %v4556_v62 }
 0x76a   :  { %vm3532_vm14 = vmor %vm3530_vm13, %vm3531_vm12 }
 0x76b   :  { %v3518_v58 = vsel %vm3517_vm10, %v4552_v50, %v3514_v13  ;;  %v3527_v37 = vsub.f32 1.0, %v3526_v21 }
 0x76c   :  { %v3523_v45 = vsel %vm3520_vm11, %v3522_v53, %v3518_v58 }
 0x76d   :  { %v3548_v16 = vmul.f32 %v4558_v6, %v3523_v45  ;;  %v3528_v22 = vmul.f32 %v4556_v62, %v3527_v37 }
 0x76e   :  { %v4560_v32 = vpop.eup %4559 }
 0x76f   :  { %3554 = vst [vmem:[%s7698_s2] sm:$0xff] %v3548_v16  ;;  %v3529_v44 = vadd.f32 %v4556_v62, %v3528_v22 }
 0x771   :  { %v3533_v23 = vsel %vm3532_vm14, %v4556_v62, %v3529_v44 }
 0x772   :  { %v3538_v46 = vsel %vm3535_vm15, %v3537_v26, %v3533_v23 }
 0x773   :  { %v3549_v40 = vmul.f32 %v4560_v32, %v3538_v46 }
 0x775   :  { %3555 = vst [vmem:[%s7698_s2 + $0x8] sm:$0xff] %v3549_v40 }

</bundles_post_ra>
